<compile_context>
chip_gen: v7x
topology: tpu7x:2x2x1
jax: 0.10.0
libtpu: 0.0.40
codegen_flags: <defaults>
</compile_context>

<pallas_src>
import jax
import jax.numpy as jnp
from jax.experimental import pallas as pl
from jax.experimental.pallas import tpu as pltpu

# ---------------- model configuration (small, deterministic) ----------------
B = 2              # batch
TIME = 512         # waveform length -> n_frames = 128 (lane-dense)
ENC_L = 4          # encoder kernel == stride
N_FILTERS = 16     # in_chan == out_chan (encoder filters)
N_SRC = 2
N_BLOCKS = 3
N_REPEATS = 2
BN_CHAN = 16
HID_CHAN = 32
SKIP_CHAN = 16
KSIZE = 3          # conv_kernel_size
EPS = 1e-8
N_TCN = N_REPEATS * N_BLOCKS


# ---------------- in-kernel helpers ----------------
def _fgln(x, gamma, beta):
    # asteroid 'fgLN' (FeatsGlobLN): normalize over the time axis per channel
    # (unbiased=False variance, eps inside sqrt), then per-channel gain & bias.
    mean = jnp.mean(x, axis=1, keepdims=True)
    var = jnp.mean((x - mean) ** 2, axis=1, keepdims=True)
    return gamma * ((x - mean) * jax.lax.rsqrt(var + EPS)) + beta


# ---------------- the single fused kernel ----------------
def _fused_kernel(frames_ref, enc_w_ref, dec_wt_ref, ln_gb_ref, bn_w_ref, bn_b_ref,
                  w_in_ref, w_dw_ref, w_rs_ref, hid_vec_ref, b_rs_ref,
                  w_ds_ref, b_ds_ref,
                  mask_w_ref, mask_b_ref, cons_w_ref, cons_b_ref,
                  prelu_a_ref, mask_a_ref, scales_ref,
                  mask_out_ref, src_out_ref, wts_out_ref):
    frames = frames_ref[0]                                   # (L, F) mixture, frame layout
    n_frames = frames.shape[1]

    # Boundary masks for the dilated depth-wise conv, hoisted: one pair per
    # distinct dilation (JAX does not CSE broadcast_in_dim inside the unrolled loop).
    t_idx = jax.lax.broadcasted_iota(jnp.int32, (1, n_frames), 1)
    dilations = sorted({2 ** x for x in range(N_BLOCKS)})
    left_ok = {d: t_idx >= d for d in dilations}             # valid h[:, t-d]
    right_ok = {d: t_idx < n_frames - d for d in dilations}  # valid h[:, t+d]

    # ---- encoder: Conv1d(1, N, L, stride=L, bias=False) == (N,L)@(L,F) ----
    encoded = jnp.dot(enc_w_ref[...], frames, preferred_element_type=jnp.float32)  # (N, F)

    # ---- bottleneck: fgLN + 1x1 conv ----
    xn = _fgln(encoded, ln_gb_ref[:, 0:1], ln_gb_ref[:, 1:2])
    output = jnp.dot(bn_w_ref[...], xn, preferred_element_type=jnp.float32) + bn_b_ref[...]
    output_copy = output
    skip_acc = jnp.zeros((SKIP_CHAN, n_frames), jnp.float32)             # (skip, F)

    # ---- TCN (fully unrolled: weights resident, skip accumulator on-chip) ----
    for r in range(N_REPEATS):
        if r != 0:
            dense = jnp.dot(w_ds_ref[r - 1], output_copy,
                            preferred_element_type=jnp.float32) + b_ds_ref[r - 1]
            output = dense + output
            output_copy = output
        for x in range(N_BLOCKS):
            i = r * N_BLOCKS + x
            d = 2 ** x
            hv = hid_vec_ref[i]                 # (hid, 6) = [b_in, g1, be1, b_dw, g2, be2]
            # 1x1 conv -> PReLU -> fgLN
            h = jnp.dot(w_in_ref[i], output, preferred_element_type=jnp.float32) + hv[:, 0:1]
            h = jnp.where(h >= 0, h, prelu_a_ref[i, 0] * h)
            h = _fgln(h, hv[:, 1:2], hv[:, 2:3])
            # depth-wise dilated conv (K=3, padding == dilation -> same length):
            # y[c,t] = w0[c]*h[c,t-d] + w1[c]*h[c,t] + w2[c]*h[c,t+d] + b[c]
            # implemented with XLU lane rotations + boundary masks (no (T,T) matmuls).
            w_dw = w_dw_ref[i]                                          # (hid, 3)
            left = jnp.where(left_ok[d], pltpu.roll(h, shift=d, axis=1), 0.0)
            right = jnp.where(right_ok[d],
                              pltpu.roll(h, shift=n_frames - d, axis=1), 0.0)
            h = w_dw[:, 0:1] * left + w_dw[:, 1:2] * h + w_dw[:, 2:3] * right + hv[:, 3:4]
            # PReLU -> fgLN
            h = jnp.where(h >= 0, h, prelu_a_ref[i, 1] * h)
            h = _fgln(h, hv[:, 4:5], hv[:, 5:6])
            # residual + skip 1x1 convs fused into ONE matmul, split on a
            # sublane-aligned (multiple-of-8) row boundary afterwards.
            rs = jnp.dot(w_rs_ref[i], h, preferred_element_type=jnp.float32) + b_rs_ref[i]
            res = rs[:BN_CHAN, :]
            skip = rs[BN_CHAN:, :]
            skip_acc = skip_acc + skip
            output = output + res * scales_ref[r, x]        # scale==1.0 for x==0

    # ---- mask head: PReLU -> 1x1 conv -> relu ----
    hm = jnp.where(skip_acc >= 0, skip_acc, mask_a_ref[0] * skip_acc)
    score = jnp.dot(mask_w_ref[...], hm, preferred_element_type=jnp.float32) + mask_b_ref[...]
    est_mask = jnp.maximum(score, 0.0)                       # (n_src*N, F)
    mask_out_ref[0] = est_mask

    # ---- consistency weights: Linear(mean over time of skip) + softmax ----
    # mean(W @ skip) over time == W @ mean(skip) (linear) — keeps lanes dense.
    logits_t = jnp.dot(cons_w_ref[...], skip_acc, preferred_element_type=jnp.float32)
    logits = jnp.mean(logits_t, axis=1, keepdims=True) + cons_b_ref[...]     # (n_src, 1)
    logits = logits - jnp.max(logits, axis=0, keepdims=True)
    e = jnp.exp(logits)
    wts = e / jnp.sum(e, axis=0, keepdims=True)              # softmax over sources
    wts_out_ref[0] = wts

    # ---- masking + decoder (ConvTranspose1d(N,1,L,stride=L)) + mixture consistency ----
    n_filt = enc_w_ref.shape[0]
    # reference mixture_consistency re-normalizes the weights with +1e-8
    wts_n = wts / (jnp.sum(wts, axis=0, keepdims=True) + 1e-8)
    dec = []
    for s in range(N_SRC):
        masked_s = est_mask[s * n_filt:(s + 1) * n_filt, :] * encoded        # (N, F)
        dec.append(jnp.dot(dec_wt_ref[...], masked_s,
                           preferred_element_type=jnp.float32))              # (L, F)
    residual = frames - sum(dec)                                             # (L, F)
    out_rows = [dec[s] + wts_n[s:s + 1, 0:1] * residual for s in range(N_SRC)]
    src_out_ref[0] = jnp.concatenate(out_rows, axis=0)                       # (n_src*L, F)


# ---------------- wrapper ----------------
def _rep_spec(arr):
    """BlockSpec for a parameter replicated across the batch grid (stays resident)."""
    n = arr.ndim
    return pl.BlockSpec(arr.shape, lambda i, _n=n: (0,) * _n)


def tdconvnetpp_forward(wave, params):
    bsz, time = wave.shape
    n_frames = time // ENC_L

    # layout plumbing (cheap XLA): mixture in (B, L, F) frame layout, lane-dense time.
    frames_lt = wave.reshape(bsz, n_frames, ENC_L).transpose(0, 2, 1)

    # ---- pack / stack parameters so the fused kernel sees a few resident slabs ----
    tcn = params["tcn"]
    w_in_s = jnp.stack([p["w_in"] for p in tcn])              # (NB, hid, bn)
    w_dw_s = jnp.stack([p["w_dw"] for p in tcn])              # (NB, hid, K)
    w_rs_s = jnp.stack([jnp.concatenate([p["w_res"], p["w_skip"]], axis=0)
                        for p in tcn])                        # (NB, bn+skip, hid)
    b_rs_s = jnp.stack([jnp.concatenate([p["b_res"], p["b_skip"]], axis=0)
                        for p in tcn])                        # (NB, bn+skip, 1)
    hid_vec_s = jnp.stack([jnp.concatenate(                   # (NB, hid, 6)
        [p["b_in"], p["g1"], p["be1"], p["b_dw"], p["g2"], p["be2"]], axis=1)
        for p in tcn])
    w_ds_s = jnp.stack([d["w"] for d in params["dense_skip"]])
    b_ds_s = jnp.stack([d["b"] for d in params["dense_skip"]])
    ln_gb = jnp.concatenate([params["ln_g"], params["ln_b"]], axis=1)   # (N, 2)
    dec_wt = params["dec_w"].T                                          # (L, N)
    cons_b = params["cons_b"].reshape(N_SRC, 1)

    # scalar tables -> SMEM
    prelu_a = jnp.stack([jnp.concatenate([p["a1"].reshape(1), p["a2"].reshape(1)])
                         for p in tcn])                                  # (NB, 2)
    mask_a = params["mask_a"].reshape(1)                                 # (1,)
    scales = jnp.concatenate(                                            # (reps, blocks)
        [jnp.ones((N_REPEATS, 1), jnp.float32), params["scaling_param"]], axis=1)

    vmem_args = [frames_lt, params["enc_w"], dec_wt, ln_gb, params["bn_w"], params["bn_b"],
                 w_in_s, w_dw_s, w_rs_s, hid_vec_s, b_rs_s, w_ds_s, b_ds_s,
                 params["mask_w"], params["mask_b"], params["cons_w"], cons_b]
    smem_args = [prelu_a, mask_a, scales]

    smem_spec = pl.BlockSpec(memory_space=pltpu.MemorySpace.SMEM)
    in_specs = ([pl.BlockSpec((1, ENC_L, n_frames), lambda i: (i, 0, 0))]
                + [_rep_spec(a) for a in vmem_args[1:]]
                + [smem_spec] * len(smem_args))

    out_shape = [jax.ShapeDtypeStruct((bsz, N_SRC * N_FILTERS, n_frames), jnp.float32),
                 jax.ShapeDtypeStruct((bsz, N_SRC * ENC_L, n_frames), jnp.float32),
                 jax.ShapeDtypeStruct((bsz, N_SRC, 1), jnp.float32)]
    out_specs = [pl.BlockSpec((1, N_SRC * N_FILTERS, n_frames), lambda i: (i, 0, 0)),
                 pl.BlockSpec((1, N_SRC * ENC_L, n_frames), lambda i: (i, 0, 0)),
                 pl.BlockSpec((1, N_SRC, 1), lambda i: (i, 0, 0))]

    mask_flat, src_lt, wts = pl.pallas_call(
        _fused_kernel,
        grid=(bsz,),
        in_specs=in_specs,
        out_specs=out_specs,
        out_shape=out_shape,
        compiler_params=pltpu.CompilerParams(dimension_semantics=("parallel",)),
    )(*vmem_args, *smem_args)

    # layout plumbing back to PyTorch conventions
    est_mask = mask_flat.reshape(bsz, N_SRC, N_FILTERS, n_frames)
    est_source = (src_lt.reshape(bsz, N_SRC, ENC_L, n_frames)
                  .transpose(0, 1, 3, 2)
                  .reshape(bsz, N_SRC, n_frames * ENC_L))
    weights = wts[..., 0]
    return est_mask, est_source, weights


# ---------------- parameter init (deterministic, synthetic) ----------------
def init_params(key):
    keys = iter(jax.random.split(key, 512))

    def rnd(shape, scale=0.2):
        return scale * jax.random.normal(next(keys), shape, dtype=jnp.float32)

    params = {
        "enc_w": rnd((N_FILTERS, ENC_L), 0.5),       # Conv1d(1, N, L, stride=L)
        "dec_w": rnd((N_FILTERS, ENC_L), 0.5),       # ConvTranspose1d(N, 1, L, stride=L)
        "ln_g": jnp.ones((N_FILTERS, 1), jnp.float32),
        "ln_b": jnp.zeros((N_FILTERS, 1), jnp.float32),
        "bn_w": rnd((BN_CHAN, N_FILTERS)),
        "bn_b": rnd((BN_CHAN, 1), 0.05),
    }
    tcn = []
    for _ in range(N_TCN):
        tcn.append(dict(
            w_in=rnd((HID_CHAN, BN_CHAN)),
            b_in=rnd((HID_CHAN, 1), 0.05),
            a1=jnp.full((1, 1), 0.25, jnp.float32),
            g1=jnp.ones((HID_CHAN, 1), jnp.float32),
            be1=jnp.zeros((HID_CHAN, 1), jnp.float32),
            w_dw=rnd((HID_CHAN, KSIZE)),
            b_dw=rnd((HID_CHAN, 1), 0.05),
            a2=jnp.full((1, 1), 0.25, jnp.float32),
            g2=jnp.ones((HID_CHAN, 1), jnp.float32),
            be2=jnp.zeros((HID_CHAN, 1), jnp.float32),
            w_res=rnd((BN_CHAN, HID_CHAN)),
            b_res=rnd((BN_CHAN, 1), 0.05),
            w_skip=rnd((SKIP_CHAN, HID_CHAN)),
            b_skip=rnd((SKIP_CHAN, 1), 0.05),
        ))
    params["tcn"] = tcn
    params["dense_skip"] = [dict(w=rnd((BN_CHAN, BN_CHAN)), b=rnd((BN_CHAN, 1), 0.05))
                            for _ in range(N_REPEATS - 1)]
    params["scaling_param"] = jnp.broadcast_to(
        jnp.array([0.9 ** l for l in range(1, N_BLOCKS)], jnp.float32),
        (N_REPEATS, N_BLOCKS - 1))
    params["mask_a"] = jnp.full((1, 1), 0.25, jnp.float32)
    params["mask_w"] = rnd((N_SRC * N_FILTERS, SKIP_CHAN))
    params["mask_b"] = rnd((N_SRC * N_FILTERS, 1), 0.05)
    params["cons_w"] = rnd((N_SRC, SKIP_CHAN))                 # nn.Linear(skip, n_src)
    params["cons_b"] = rnd((N_SRC,), 0.05)
    return params


if __name__ == "__main__":
    key = jax.random.PRNGKey(0)
    k_wave, k_params = jax.random.split(key)
    wave = jax.random.normal(k_wave, (B, TIME), dtype=jnp.float32)
    params = init_params(k_params)

    fwd = jax.jit(tdconvnetpp_forward)
    est_mask, est_source, weights = fwd(wave, params)
    jax.block_until_ready((est_mask, est_source, weights))

    assert est_mask.shape == (B, N_SRC, N_FILTERS, TIME // ENC_L)
    assert est_source.shape == (B, N_SRC, TIME)
    assert weights.shape == (B, N_SRC)
    assert bool(jnp.all(jnp.isfinite(est_mask)))
    assert bool(jnp.all(jnp.isfinite(est_source)))
    assert bool(jnp.all(jnp.isfinite(weights)))
    print("KERNEL_OK")
</pallas_src>

<mosaic_0001>
module attributes {stable_mosaic.version = 11 : i64} {
  func.func @_fused_kernel(%arg0: i32, %arg1: memref<1x4x128xf32, #tpu.memory_space<vmem>>, %arg2: memref<16x4xf32, #tpu.memory_space<vmem>>, %arg3: memref<4x16xf32, #tpu.memory_space<vmem>>, %arg4: memref<16x2xf32, #tpu.memory_space<vmem>>, %arg5: memref<16x16xf32, #tpu.memory_space<vmem>>, %arg6: memref<16x1xf32, #tpu.memory_space<vmem>>, %arg7: memref<6x32x16xf32, #tpu.memory_space<vmem>>, %arg8: memref<6x32x3xf32, #tpu.memory_space<vmem>>, %arg9: memref<6x32x32xf32, #tpu.memory_space<vmem>>, %arg10: memref<6x32x6xf32, #tpu.memory_space<vmem>>, %arg11: memref<6x32x1xf32, #tpu.memory_space<vmem>>, %arg12: memref<1x16x16xf32, #tpu.memory_space<vmem>>, %arg13: memref<1x16x1xf32, #tpu.memory_space<vmem>>, %arg14: memref<32x16xf32, #tpu.memory_space<vmem>>, %arg15: memref<32x1xf32, #tpu.memory_space<vmem>>, %arg16: memref<2x16xf32, #tpu.memory_space<vmem>>, %arg17: memref<2x1xf32, #tpu.memory_space<vmem>>, %arg18: memref<6x2xf32, #tpu.memory_space<smem>>, %arg19: memref<1xf32, #tpu.memory_space<smem>>, %arg20: memref<2x3xf32, #tpu.memory_space<smem>>, %arg21: memref<1x32x128xf32, #tpu.memory_space<vmem>>, %arg22: memref<1x8x128xf32, #tpu.memory_space<vmem>>, %arg23: memref<1x2x1xf32, #tpu.memory_space<vmem>>) attributes {dimension_semantics = [#tpu.dimension_semantics<parallel>], iteration_bounds = array<i64: 2>, scalar_prefetch = 0 : i64, scratch_operands = 0 : i64, tpu.core_type = #tpu.core_type<tc>, window_params = [{transform_indices = @transform_0, window_bounds = array<i64: 1, 4, 128>}, {pipeline_mode = #tpu.pipeline_mode<synchronous>, transform_indices = @transform_1, window_bounds = array<i64: 16, 4>}, {pipeline_mode = #tpu.pipeline_mode<synchronous>, transform_indices = @transform_2, window_bounds = array<i64: 4, 16>}, {pipeline_mode = #tpu.pipeline_mode<synchronous>, transform_indices = @transform_3, window_bounds = array<i64: 16, 2>}, {pipeline_mode = #tpu.pipeline_mode<synchronous>, transform_indices = @transform_4, window_bounds = array<i64: 16, 16>}, {pipeline_mode = #tpu.pipeline_mode<synchronous>, transform_indices = @transform_5, window_bounds = array<i64: 16, 1>}, {pipeline_mode = #tpu.pipeline_mode<synchronous>, transform_indices = @transform_6, window_bounds = array<i64: 6, 32, 16>}, {pipeline_mode = #tpu.pipeline_mode<synchronous>, transform_indices = @transform_7, window_bounds = array<i64: 6, 32, 3>}, {pipeline_mode = #tpu.pipeline_mode<synchronous>, transform_indices = @transform_8, window_bounds = array<i64: 6, 32, 32>}, {pipeline_mode = #tpu.pipeline_mode<synchronous>, transform_indices = @transform_9, window_bounds = array<i64: 6, 32, 6>}, {pipeline_mode = #tpu.pipeline_mode<synchronous>, transform_indices = @transform_10, window_bounds = array<i64: 6, 32, 1>}, {pipeline_mode = #tpu.pipeline_mode<synchronous>, transform_indices = @transform_11, window_bounds = array<i64: 1, 16, 16>}, {pipeline_mode = #tpu.pipeline_mode<synchronous>, transform_indices = @transform_12, window_bounds = array<i64: 1, 16, 1>}, {pipeline_mode = #tpu.pipeline_mode<synchronous>, transform_indices = @transform_13, window_bounds = array<i64: 32, 16>}, {pipeline_mode = #tpu.pipeline_mode<synchronous>, transform_indices = @transform_14, window_bounds = array<i64: 32, 1>}, {pipeline_mode = #tpu.pipeline_mode<synchronous>, transform_indices = @transform_15, window_bounds = array<i64: 2, 16>}, {pipeline_mode = #tpu.pipeline_mode<synchronous>, transform_indices = @transform_16, window_bounds = array<i64: 2, 1>}, {transform_indices = @transform_17, window_bounds = array<i64: 6, 2>}, {transform_indices = @transform_18, window_bounds = array<i64: 1>}, {transform_indices = @transform_19, window_bounds = array<i64: 2, 3>}, {transform_indices = @transform_20, window_bounds = array<i64: 1, 32, 128>}, {transform_indices = @transform_21, window_bounds = array<i64: 1, 8, 128>}, {transform_indices = @transform_22, window_bounds = array<i64: 1, 2, 1>}]} {
    %c0 = arith.constant 0 : index
    %c0_0 = arith.constant 0 : index
    %c0_1 = arith.constant 0 : index
    %0 = vector.load %arg1[%c0, %c0_0, %c0_1] : memref<1x4x128xf32, #tpu.memory_space<vmem>>, vector<1x4x128xf32>
    %1 = vector.shape_cast %0 : vector<1x4x128xf32> to vector<4x128xf32>
    %2 = tpu.iota {dimensions = array<i32: 1>} : vector<1x128xi32>
    %c1_i32 = arith.constant 1 : i32
    %3 = vector.broadcast %c1_i32 : i32 to vector<1x128xi32>
    %4 = arith.cmpi sge, %2, %3 : vector<1x128xi32>
    %c2_i32 = arith.constant 2 : i32
    %5 = vector.broadcast %c2_i32 : i32 to vector<1x128xi32>
    %6 = arith.cmpi sge, %2, %5 : vector<1x128xi32>
    %c4_i32 = arith.constant 4 : i32
    %7 = vector.broadcast %c4_i32 : i32 to vector<1x128xi32>
    %8 = arith.cmpi sge, %2, %7 : vector<1x128xi32>
    %c127_i32 = arith.constant 127 : i32
    %9 = vector.broadcast %c127_i32 : i32 to vector<1x128xi32>
    %10 = arith.cmpi slt, %2, %9 : vector<1x128xi32>
    %c126_i32 = arith.constant 126 : i32
    %11 = vector.broadcast %c126_i32 : i32 to vector<1x128xi32>
    %12 = arith.cmpi slt, %2, %11 : vector<1x128xi32>
    %c124_i32 = arith.constant 124 : i32
    %13 = vector.broadcast %c124_i32 : i32 to vector<1x128xi32>
    %14 = arith.cmpi slt, %2, %13 : vector<1x128xi32>
    %c0_2 = arith.constant 0 : index
    %c0_3 = arith.constant 0 : index
    %15 = vector.load %arg2[%c0_2, %c0_3] : memref<16x4xf32, #tpu.memory_space<vmem>>, vector<16x4xf32>
    %cst = arith.constant dense<0.000000e+00> : vector<16x128xf32>
    %16 = tpu.matmul %15, %1, %cst {dimension_numbers = #tpu.dot_dimension_numbers<[1], [0], [0], [1], [0, 0, 1, 1], [], []>} : vector<16x4xf32>, vector<4x128xf32>, vector<16x128xf32> -> vector<16x128xf32>
    %c0_4 = arith.constant 0 : index
    %c0_5 = arith.constant 0 : index
    %17 = vector.load %arg4[%c0_4, %c0_5] : memref<16x2xf32, #tpu.memory_space<vmem>>, vector<16x1xf32>
    %c0_6 = arith.constant 0 : index
    %c1 = arith.constant 1 : index
    %18 = vector.load %arg4[%c0_6, %c1] : memref<16x2xf32, #tpu.memory_space<vmem>>, vector<16x1xf32>
    %cst_7 = arith.constant dense<0.000000e+00> : vector<16xf32>
    %19 = vector.multi_reduction <add>, %16, %cst_7 [1] : vector<16x128xf32> to vector<16xf32>
    %20 = vector.shape_cast %19 : vector<16xf32> to vector<16x1xf32>
    %cst_8 = arith.constant 1.280000e+02 : f32
    %21 = vector.broadcast %cst_8 : f32 to vector<16x1xf32>
    %22 = arith.divf %20, %21 : vector<16x1xf32>
    %23 = vector.broadcast %22 : vector<16x1xf32> to vector<16x128xf32>
    %24 = arith.subf %16, %23 : vector<16x128xf32>
    %25 = arith.mulf %24, %24 : vector<16x128xf32>
    %cst_9 = arith.constant dense<0.000000e+00> : vector<16xf32>
    %26 = vector.multi_reduction <add>, %25, %cst_9 [1] : vector<16x128xf32> to vector<16xf32>
    %27 = vector.shape_cast %26 : vector<16xf32> to vector<16x1xf32>
    %cst_10 = arith.constant 1.280000e+02 : f32
    %28 = vector.broadcast %cst_10 : f32 to vector<16x1xf32>
    %29 = arith.divf %27, %28 : vector<16x1xf32>
    %30 = vector.broadcast %22 : vector<16x1xf32> to vector<16x128xf32>
    %31 = arith.subf %16, %30 : vector<16x128xf32>
    %cst_11 = arith.constant 9.99999993E-9 : f32
    %32 = vector.broadcast %cst_11 : f32 to vector<16x1xf32>
    %33 = arith.addf %29, %32 : vector<16x1xf32>
    %34 = math.rsqrt %33 : vector<16x1xf32>
    %35 = vector.broadcast %34 : vector<16x1xf32> to vector<16x128xf32>
    %36 = arith.mulf %31, %35 : vector<16x128xf32>
    %37 = vector.broadcast %17 : vector<16x1xf32> to vector<16x128xf32>
    %38 = arith.mulf %37, %36 : vector<16x128xf32>
    %39 = vector.broadcast %18 : vector<16x1xf32> to vector<16x128xf32>
    %40 = arith.addf %38, %39 : vector<16x128xf32>
    %c0_12 = arith.constant 0 : index
    %c0_13 = arith.constant 0 : index
    %41 = vector.load %arg5[%c0_12, %c0_13] : memref<16x16xf32, #tpu.memory_space<vmem>>, vector<16x16xf32>
    %cst_14 = arith.constant dense<0.000000e+00> : vector<16x128xf32>
    %42 = tpu.matmul %41, %40, %cst_14 {dimension_numbers = #tpu.dot_dimension_numbers<[1], [0], [0], [1], [0, 0, 1, 1], [], []>} : vector<16x16xf32>, vector<16x128xf32>, vector<16x128xf32> -> vector<16x128xf32>
    %c0_15 = arith.constant 0 : index
    %c0_16 = arith.constant 0 : index
    %43 = vector.load %arg6[%c0_15, %c0_16] : memref<16x1xf32, #tpu.memory_space<vmem>>, vector<16x1xf32>
    %44 = vector.broadcast %43 : vector<16x1xf32> to vector<16x128xf32>
    %45 = arith.addf %42, %44 : vector<16x128xf32>
    %cst_17 = arith.constant 0.000000e+00 : f32
    %46 = vector.broadcast %cst_17 : f32 to vector<16x128xf32>
    %c0_18 = arith.constant 0 : index
    %c0_19 = arith.constant 0 : index
    %c0_20 = arith.constant 0 : index
    %47 = vector.load %arg10[%c0_18, %c0_19, %c0_20] : memref<6x32x6xf32, #tpu.memory_space<vmem>>, vector<1x32x6xf32>
    %48 = vector.shape_cast %47 : vector<1x32x6xf32> to vector<32x6xf32>
    %c0_21 = arith.constant 0 : index
    %c0_22 = arith.constant 0 : index
    %c0_23 = arith.constant 0 : index
    %49 = vector.load %arg7[%c0_21, %c0_22, %c0_23] : memref<6x32x16xf32, #tpu.memory_space<vmem>>, vector<1x32x16xf32>
    %50 = vector.shape_cast %49 : vector<1x32x16xf32> to vector<32x16xf32>
    %cst_24 = arith.constant dense<0.000000e+00> : vector<32x128xf32>
    %51 = tpu.matmul %50, %45, %cst_24 {dimension_numbers = #tpu.dot_dimension_numbers<[1], [0], [0], [1], [0, 0, 1, 1], [], []>} : vector<32x16xf32>, vector<16x128xf32>, vector<32x128xf32> -> vector<32x128xf32>
    %52 = vector.extract_strided_slice %48 {offsets = [0, 0], sizes = [32, 1], strides = [1, 1]} : vector<32x6xf32> to vector<32x1xf32>
    %53 = vector.broadcast %52 : vector<32x1xf32> to vector<32x128xf32>
    %54 = arith.addf %51, %53 : vector<32x128xf32>
    %cst_25 = arith.constant 0.000000e+00 : f32
    %55 = vector.broadcast %cst_25 : f32 to vector<32x128xf32>
    %56 = arith.cmpf oge, %54, %55 : vector<32x128xf32>
    %c0_26 = arith.constant 0 : index
    %c0_27 = arith.constant 0 : index
    %57 = memref.load %arg18[%c0_26, %c0_27] : memref<6x2xf32, #tpu.memory_space<smem>>
    %58 = vector.broadcast %57 : f32 to vector<32x128xf32>
    %59 = arith.mulf %58, %54 : vector<32x128xf32>
    %60 = arith.select %56, %54, %59 : vector<32x128xi1>, vector<32x128xf32>
    %61 = vector.extract_strided_slice %48 {offsets = [0, 1], sizes = [32, 1], strides = [1, 1]} : vector<32x6xf32> to vector<32x1xf32>
    %62 = vector.extract_strided_slice %48 {offsets = [0, 2], sizes = [32, 1], strides = [1, 1]} : vector<32x6xf32> to vector<32x1xf32>
    %cst_28 = arith.constant dense<0.000000e+00> : vector<32xf32>
    %63 = vector.multi_reduction <add>, %60, %cst_28 [1] : vector<32x128xf32> to vector<32xf32>
    %64 = vector.shape_cast %63 : vector<32xf32> to vector<32x1xf32>
    %cst_29 = arith.constant 1.280000e+02 : f32
    %65 = vector.broadcast %cst_29 : f32 to vector<32x1xf32>
    %66 = arith.divf %64, %65 : vector<32x1xf32>
    %67 = vector.broadcast %66 : vector<32x1xf32> to vector<32x128xf32>
    %68 = arith.subf %60, %67 : vector<32x128xf32>
    %69 = arith.mulf %68, %68 : vector<32x128xf32>
    %cst_30 = arith.constant dense<0.000000e+00> : vector<32xf32>
    %70 = vector.multi_reduction <add>, %69, %cst_30 [1] : vector<32x128xf32> to vector<32xf32>
    %71 = vector.shape_cast %70 : vector<32xf32> to vector<32x1xf32>
    %cst_31 = arith.constant 1.280000e+02 : f32
    %72 = vector.broadcast %cst_31 : f32 to vector<32x1xf32>
    %73 = arith.divf %71, %72 : vector<32x1xf32>
    %74 = vector.broadcast %66 : vector<32x1xf32> to vector<32x128xf32>
    %75 = arith.subf %60, %74 : vector<32x128xf32>
    %cst_32 = arith.constant 9.99999993E-9 : f32
    %76 = vector.broadcast %cst_32 : f32 to vector<32x1xf32>
    %77 = arith.addf %73, %76 : vector<32x1xf32>
    %78 = math.rsqrt %77 : vector<32x1xf32>
    %79 = vector.broadcast %78 : vector<32x1xf32> to vector<32x128xf32>
    %80 = arith.mulf %75, %79 : vector<32x128xf32>
    %81 = vector.broadcast %61 : vector<32x1xf32> to vector<32x128xf32>
    %82 = arith.mulf %81, %80 : vector<32x128xf32>
    %83 = vector.broadcast %62 : vector<32x1xf32> to vector<32x128xf32>
    %84 = arith.addf %82, %83 : vector<32x128xf32>
    %c0_33 = arith.constant 0 : index
    %c0_34 = arith.constant 0 : index
    %c0_35 = arith.constant 0 : index
    %85 = vector.load %arg8[%c0_33, %c0_34, %c0_35] : memref<6x32x3xf32, #tpu.memory_space<vmem>>, vector<1x32x3xf32>
    %86 = vector.shape_cast %85 : vector<1x32x3xf32> to vector<32x3xf32>
    %c1_i32_36 = arith.constant 1 : i32
    %87 = tpu.dynamic_rotate %84 by %c1_i32_36 dim 1 : vector<32x128xf32>, i32 -> vector<32x128xf32>
    %cst_37 = arith.constant 0.000000e+00 : f32
    %88 = vector.shape_cast %4 : vector<1x128xi1> to vector<1x128xi1>
    %89 = vector.broadcast %88 : vector<1x128xi1> to vector<32x128xi1>
    %90 = vector.broadcast %cst_37 : f32 to vector<32x128xf32>
    %91 = arith.select %89, %87, %90 : vector<32x128xi1>, vector<32x128xf32>
    %c127_i32_38 = arith.constant 127 : i32
    %92 = tpu.dynamic_rotate %84 by %c127_i32_38 dim 1 : vector<32x128xf32>, i32 -> vector<32x128xf32>
    %cst_39 = arith.constant 0.000000e+00 : f32
    %93 = vector.shape_cast %10 : vector<1x128xi1> to vector<1x128xi1>
    %94 = vector.broadcast %93 : vector<1x128xi1> to vector<32x128xi1>
    %95 = vector.broadcast %cst_39 : f32 to vector<32x128xf32>
    %96 = arith.select %94, %92, %95 : vector<32x128xi1>, vector<32x128xf32>
    %97 = vector.extract_strided_slice %86 {offsets = [0, 0], sizes = [32, 1], strides = [1, 1]} : vector<32x3xf32> to vector<32x1xf32>
    %98 = vector.broadcast %97 : vector<32x1xf32> to vector<32x128xf32>
    %99 = arith.mulf %98, %91 : vector<32x128xf32>
    %100 = vector.extract_strided_slice %86 {offsets = [0, 1], sizes = [32, 1], strides = [1, 1]} : vector<32x3xf32> to vector<32x1xf32>
    %101 = vector.broadcast %100 : vector<32x1xf32> to vector<32x128xf32>
    %102 = arith.mulf %101, %84 : vector<32x128xf32>
    %103 = arith.addf %99, %102 : vector<32x128xf32>
    %104 = vector.extract_strided_slice %86 {offsets = [0, 2], sizes = [32, 1], strides = [1, 1]} : vector<32x3xf32> to vector<32x1xf32>
    %105 = vector.broadcast %104 : vector<32x1xf32> to vector<32x128xf32>
    %106 = arith.mulf %105, %96 : vector<32x128xf32>
    %107 = arith.addf %103, %106 : vector<32x128xf32>
    %108 = vector.extract_strided_slice %48 {offsets = [0, 3], sizes = [32, 1], strides = [1, 1]} : vector<32x6xf32> to vector<32x1xf32>
    %109 = vector.broadcast %108 : vector<32x1xf32> to vector<32x128xf32>
    %110 = arith.addf %107, %109 : vector<32x128xf32>
    %cst_40 = arith.constant 0.000000e+00 : f32
    %111 = vector.broadcast %cst_40 : f32 to vector<32x128xf32>
    %112 = arith.cmpf oge, %110, %111 : vector<32x128xf32>
    %c0_41 = arith.constant 0 : index
    %c1_42 = arith.constant 1 : index
    %113 = memref.load %arg18[%c0_41, %c1_42] : memref<6x2xf32, #tpu.memory_space<smem>>
    %114 = vector.broadcast %113 : f32 to vector<32x128xf32>
    %115 = arith.mulf %114, %110 : vector<32x128xf32>
    %116 = arith.select %112, %110, %115 : vector<32x128xi1>, vector<32x128xf32>
    %117 = vector.extract_strided_slice %48 {offsets = [0, 4], sizes = [32, 1], strides = [1, 1]} : vector<32x6xf32> to vector<32x1xf32>
    %118 = vector.extract_strided_slice %48 {offsets = [0, 5], sizes = [32, 1], strides = [1, 1]} : vector<32x6xf32> to vector<32x1xf32>
    %cst_43 = arith.constant dense<0.000000e+00> : vector<32xf32>
    %119 = vector.multi_reduction <add>, %116, %cst_43 [1] : vector<32x128xf32> to vector<32xf32>
    %120 = vector.shape_cast %119 : vector<32xf32> to vector<32x1xf32>
    %cst_44 = arith.constant 1.280000e+02 : f32
    %121 = vector.broadcast %cst_44 : f32 to vector<32x1xf32>
    %122 = arith.divf %120, %121 : vector<32x1xf32>
    %123 = vector.broadcast %122 : vector<32x1xf32> to vector<32x128xf32>
    %124 = arith.subf %116, %123 : vector<32x128xf32>
    %125 = arith.mulf %124, %124 : vector<32x128xf32>
    %cst_45 = arith.constant dense<0.000000e+00> : vector<32xf32>
    %126 = vector.multi_reduction <add>, %125, %cst_45 [1] : vector<32x128xf32> to vector<32xf32>
    %127 = vector.shape_cast %126 : vector<32xf32> to vector<32x1xf32>
    %cst_46 = arith.constant 1.280000e+02 : f32
    %128 = vector.broadcast %cst_46 : f32 to vector<32x1xf32>
    %129 = arith.divf %127, %128 : vector<32x1xf32>
    %130 = vector.broadcast %122 : vector<32x1xf32> to vector<32x128xf32>
    %131 = arith.subf %116, %130 : vector<32x128xf32>
    %cst_47 = arith.constant 9.99999993E-9 : f32
    %132 = vector.broadcast %cst_47 : f32 to vector<32x1xf32>
    %133 = arith.addf %129, %132 : vector<32x1xf32>
    %134 = math.rsqrt %133 : vector<32x1xf32>
    %135 = vector.broadcast %134 : vector<32x1xf32> to vector<32x128xf32>
    %136 = arith.mulf %131, %135 : vector<32x128xf32>
    %137 = vector.broadcast %117 : vector<32x1xf32> to vector<32x128xf32>
    %138 = arith.mulf %137, %136 : vector<32x128xf32>
    %139 = vector.broadcast %118 : vector<32x1xf32> to vector<32x128xf32>
    %140 = arith.addf %138, %139 : vector<32x128xf32>
    %c0_48 = arith.constant 0 : index
    %c0_49 = arith.constant 0 : index
    %c0_50 = arith.constant 0 : index
    %141 = vector.load %arg9[%c0_48, %c0_49, %c0_50] : memref<6x32x32xf32, #tpu.memory_space<vmem>>, vector<1x32x32xf32>
    %142 = vector.shape_cast %141 : vector<1x32x32xf32> to vector<32x32xf32>
    %cst_51 = arith.constant dense<0.000000e+00> : vector<32x128xf32>
    %143 = tpu.matmul %142, %140, %cst_51 {dimension_numbers = #tpu.dot_dimension_numbers<[1], [0], [0], [1], [0, 0, 1, 1], [], []>} : vector<32x32xf32>, vector<32x128xf32>, vector<32x128xf32> -> vector<32x128xf32>
    %c0_52 = arith.constant 0 : index
    %c0_53 = arith.constant 0 : index
    %c0_54 = arith.constant 0 : index
    %144 = vector.load %arg11[%c0_52, %c0_53, %c0_54] : memref<6x32x1xf32, #tpu.memory_space<vmem>>, vector<1x32x1xf32>
    %145 = vector.shape_cast %144 : vector<1x32x1xf32> to vector<32x1xf32>
    %146 = vector.broadcast %145 : vector<32x1xf32> to vector<32x128xf32>
    %147 = arith.addf %143, %146 : vector<32x128xf32>
    %148 = vector.extract_strided_slice %147 {offsets = [0, 0], sizes = [16, 128], strides = [1, 1]} : vector<32x128xf32> to vector<16x128xf32>
    %149 = vector.extract_strided_slice %147 {offsets = [16, 0], sizes = [16, 128], strides = [1, 1]} : vector<32x128xf32> to vector<16x128xf32>
    %150 = arith.addf %46, %149 : vector<16x128xf32>
    %c0_55 = arith.constant 0 : index
    %c0_56 = arith.constant 0 : index
    %151 = memref.load %arg20[%c0_55, %c0_56] : memref<2x3xf32, #tpu.memory_space<smem>>
    %152 = vector.broadcast %151 : f32 to vector<16x128xf32>
    %153 = arith.mulf %148, %152 : vector<16x128xf32>
    %154 = arith.addf %45, %153 : vector<16x128xf32>
    %c1_57 = arith.constant 1 : index
    %c0_58 = arith.constant 0 : index
    %c0_59 = arith.constant 0 : index
    %155 = vector.load %arg10[%c1_57, %c0_58, %c0_59] : memref<6x32x6xf32, #tpu.memory_space<vmem>>, vector<1x32x6xf32>
    %156 = vector.shape_cast %155 : vector<1x32x6xf32> to vector<32x6xf32>
    %c1_60 = arith.constant 1 : index
    %c0_61 = arith.constant 0 : index
    %c0_62 = arith.constant 0 : index
    %157 = vector.load %arg7[%c1_60, %c0_61, %c0_62] : memref<6x32x16xf32, #tpu.memory_space<vmem>>, vector<1x32x16xf32>
    %158 = vector.shape_cast %157 : vector<1x32x16xf32> to vector<32x16xf32>
    %cst_63 = arith.constant dense<0.000000e+00> : vector<32x128xf32>
    %159 = tpu.matmul %158, %154, %cst_63 {dimension_numbers = #tpu.dot_dimension_numbers<[1], [0], [0], [1], [0, 0, 1, 1], [], []>} : vector<32x16xf32>, vector<16x128xf32>, vector<32x128xf32> -> vector<32x128xf32>
    %160 = vector.extract_strided_slice %156 {offsets = [0, 0], sizes = [32, 1], strides = [1, 1]} : vector<32x6xf32> to vector<32x1xf32>
    %161 = vector.broadcast %160 : vector<32x1xf32> to vector<32x128xf32>
    %162 = arith.addf %159, %161 : vector<32x128xf32>
    %cst_64 = arith.constant 0.000000e+00 : f32
    %163 = vector.broadcast %cst_64 : f32 to vector<32x128xf32>
    %164 = arith.cmpf oge, %162, %163 : vector<32x128xf32>
    %c1_65 = arith.constant 1 : index
    %c0_66 = arith.constant 0 : index
    %165 = memref.load %arg18[%c1_65, %c0_66] : memref<6x2xf32, #tpu.memory_space<smem>>
    %166 = vector.broadcast %165 : f32 to vector<32x128xf32>
    %167 = arith.mulf %166, %162 : vector<32x128xf32>
    %168 = arith.select %164, %162, %167 : vector<32x128xi1>, vector<32x128xf32>
    %169 = vector.extract_strided_slice %156 {offsets = [0, 1], sizes = [32, 1], strides = [1, 1]} : vector<32x6xf32> to vector<32x1xf32>
    %170 = vector.extract_strided_slice %156 {offsets = [0, 2], sizes = [32, 1], strides = [1, 1]} : vector<32x6xf32> to vector<32x1xf32>
    %cst_67 = arith.constant dense<0.000000e+00> : vector<32xf32>
    %171 = vector.multi_reduction <add>, %168, %cst_67 [1] : vector<32x128xf32> to vector<32xf32>
    %172 = vector.shape_cast %171 : vector<32xf32> to vector<32x1xf32>
    %cst_68 = arith.constant 1.280000e+02 : f32
    %173 = vector.broadcast %cst_68 : f32 to vector<32x1xf32>
    %174 = arith.divf %172, %173 : vector<32x1xf32>
    %175 = vector.broadcast %174 : vector<32x1xf32> to vector<32x128xf32>
    %176 = arith.subf %168, %175 : vector<32x128xf32>
    %177 = arith.mulf %176, %176 : vector<32x128xf32>
    %cst_69 = arith.constant dense<0.000000e+00> : vector<32xf32>
    %178 = vector.multi_reduction <add>, %177, %cst_69 [1] : vector<32x128xf32> to vector<32xf32>
    %179 = vector.shape_cast %178 : vector<32xf32> to vector<32x1xf32>
    %cst_70 = arith.constant 1.280000e+02 : f32
    %180 = vector.broadcast %cst_70 : f32 to vector<32x1xf32>
    %181 = arith.divf %179, %180 : vector<32x1xf32>
    %182 = vector.broadcast %174 : vector<32x1xf32> to vector<32x128xf32>
    %183 = arith.subf %168, %182 : vector<32x128xf32>
    %cst_71 = arith.constant 9.99999993E-9 : f32
    %184 = vector.broadcast %cst_71 : f32 to vector<32x1xf32>
    %185 = arith.addf %181, %184 : vector<32x1xf32>
    %186 = math.rsqrt %185 : vector<32x1xf32>
    %187 = vector.broadcast %186 : vector<32x1xf32> to vector<32x128xf32>
    %188 = arith.mulf %183, %187 : vector<32x128xf32>
    %189 = vector.broadcast %169 : vector<32x1xf32> to vector<32x128xf32>
    %190 = arith.mulf %189, %188 : vector<32x128xf32>
    %191 = vector.broadcast %170 : vector<32x1xf32> to vector<32x128xf32>
    %192 = arith.addf %190, %191 : vector<32x128xf32>
    %c1_72 = arith.constant 1 : index
    %c0_73 = arith.constant 0 : index
    %c0_74 = arith.constant 0 : index
    %193 = vector.load %arg8[%c1_72, %c0_73, %c0_74] : memref<6x32x3xf32, #tpu.memory_space<vmem>>, vector<1x32x3xf32>
    %194 = vector.shape_cast %193 : vector<1x32x3xf32> to vector<32x3xf32>
    %c2_i32_75 = arith.constant 2 : i32
    %195 = tpu.dynamic_rotate %192 by %c2_i32_75 dim 1 : vector<32x128xf32>, i32 -> vector<32x128xf32>
    %cst_76 = arith.constant 0.000000e+00 : f32
    %196 = vector.shape_cast %6 : vector<1x128xi1> to vector<1x128xi1>
    %197 = vector.broadcast %196 : vector<1x128xi1> to vector<32x128xi1>
    %198 = vector.broadcast %cst_76 : f32 to vector<32x128xf32>
    %199 = arith.select %197, %195, %198 : vector<32x128xi1>, vector<32x128xf32>
    %c126_i32_77 = arith.constant 126 : i32
    %200 = tpu.dynamic_rotate %192 by %c126_i32_77 dim 1 : vector<32x128xf32>, i32 -> vector<32x128xf32>
    %cst_78 = arith.constant 0.000000e+00 : f32
    %201 = vector.shape_cast %12 : vector<1x128xi1> to vector<1x128xi1>
    %202 = vector.broadcast %201 : vector<1x128xi1> to vector<32x128xi1>
    %203 = vector.broadcast %cst_78 : f32 to vector<32x128xf32>
    %204 = arith.select %202, %200, %203 : vector<32x128xi1>, vector<32x128xf32>
    %205 = vector.extract_strided_slice %194 {offsets = [0, 0], sizes = [32, 1], strides = [1, 1]} : vector<32x3xf32> to vector<32x1xf32>
    %206 = vector.broadcast %205 : vector<32x1xf32> to vector<32x128xf32>
    %207 = arith.mulf %206, %199 : vector<32x128xf32>
    %208 = vector.extract_strided_slice %194 {offsets = [0, 1], sizes = [32, 1], strides = [1, 1]} : vector<32x3xf32> to vector<32x1xf32>
    %209 = vector.broadcast %208 : vector<32x1xf32> to vector<32x128xf32>
    %210 = arith.mulf %209, %192 : vector<32x128xf32>
    %211 = arith.addf %207, %210 : vector<32x128xf32>
    %212 = vector.extract_strided_slice %194 {offsets = [0, 2], sizes = [32, 1], strides = [1, 1]} : vector<32x3xf32> to vector<32x1xf32>
    %213 = vector.broadcast %212 : vector<32x1xf32> to vector<32x128xf32>
    %214 = arith.mulf %213, %204 : vector<32x128xf32>
    %215 = arith.addf %211, %214 : vector<32x128xf32>
    %216 = vector.extract_strided_slice %156 {offsets = [0, 3], sizes = [32, 1], strides = [1, 1]} : vector<32x6xf32> to vector<32x1xf32>
    %217 = vector.broadcast %216 : vector<32x1xf32> to vector<32x128xf32>
    %218 = arith.addf %215, %217 : vector<32x128xf32>
    %cst_79 = arith.constant 0.000000e+00 : f32
    %219 = vector.broadcast %cst_79 : f32 to vector<32x128xf32>
    %220 = arith.cmpf oge, %218, %219 : vector<32x128xf32>
    %c1_80 = arith.constant 1 : index
    %c1_81 = arith.constant 1 : index
    %221 = memref.load %arg18[%c1_80, %c1_81] : memref<6x2xf32, #tpu.memory_space<smem>>
    %222 = vector.broadcast %221 : f32 to vector<32x128xf32>
    %223 = arith.mulf %222, %218 : vector<32x128xf32>
    %224 = arith.select %220, %218, %223 : vector<32x128xi1>, vector<32x128xf32>
    %225 = vector.extract_strided_slice %156 {offsets = [0, 4], sizes = [32, 1], strides = [1, 1]} : vector<32x6xf32> to vector<32x1xf32>
    %226 = vector.extract_strided_slice %156 {offsets = [0, 5], sizes = [32, 1], strides = [1, 1]} : vector<32x6xf32> to vector<32x1xf32>
    %cst_82 = arith.constant dense<0.000000e+00> : vector<32xf32>
    %227 = vector.multi_reduction <add>, %224, %cst_82 [1] : vector<32x128xf32> to vector<32xf32>
    %228 = vector.shape_cast %227 : vector<32xf32> to vector<32x1xf32>
    %cst_83 = arith.constant 1.280000e+02 : f32
    %229 = vector.broadcast %cst_83 : f32 to vector<32x1xf32>
    %230 = arith.divf %228, %229 : vector<32x1xf32>
    %231 = vector.broadcast %230 : vector<32x1xf32> to vector<32x128xf32>
    %232 = arith.subf %224, %231 : vector<32x128xf32>
    %233 = arith.mulf %232, %232 : vector<32x128xf32>
    %cst_84 = arith.constant dense<0.000000e+00> : vector<32xf32>
    %234 = vector.multi_reduction <add>, %233, %cst_84 [1] : vector<32x128xf32> to vector<32xf32>
    %235 = vector.shape_cast %234 : vector<32xf32> to vector<32x1xf32>
    %cst_85 = arith.constant 1.280000e+02 : f32
    %236 = vector.broadcast %cst_85 : f32 to vector<32x1xf32>
    %237 = arith.divf %235, %236 : vector<32x1xf32>
    %238 = vector.broadcast %230 : vector<32x1xf32> to vector<32x128xf32>
    %239 = arith.subf %224, %238 : vector<32x128xf32>
    %cst_86 = arith.constant 9.99999993E-9 : f32
    %240 = vector.broadcast %cst_86 : f32 to vector<32x1xf32>
    %241 = arith.addf %237, %240 : vector<32x1xf32>
    %242 = math.rsqrt %241 : vector<32x1xf32>
    %243 = vector.broadcast %242 : vector<32x1xf32> to vector<32x128xf32>
    %244 = arith.mulf %239, %243 : vector<32x128xf32>
    %245 = vector.broadcast %225 : vector<32x1xf32> to vector<32x128xf32>
    %246 = arith.mulf %245, %244 : vector<32x128xf32>
    %247 = vector.broadcast %226 : vector<32x1xf32> to vector<32x128xf32>
    %248 = arith.addf %246, %247 : vector<32x128xf32>
    %c1_87 = arith.constant 1 : index
    %c0_88 = arith.constant 0 : index
    %c0_89 = arith.constant 0 : index
    %249 = vector.load %arg9[%c1_87, %c0_88, %c0_89] : memref<6x32x32xf32, #tpu.memory_space<vmem>>, vector<1x32x32xf32>
    %250 = vector.shape_cast %249 : vector<1x32x32xf32> to vector<32x32xf32>
    %cst_90 = arith.constant dense<0.000000e+00> : vector<32x128xf32>
    %251 = tpu.matmul %250, %248, %cst_90 {dimension_numbers = #tpu.dot_dimension_numbers<[1], [0], [0], [1], [0, 0, 1, 1], [], []>} : vector<32x32xf32>, vector<32x128xf32>, vector<32x128xf32> -> vector<32x128xf32>
    %c1_91 = arith.constant 1 : index
    %c0_92 = arith.constant 0 : index
    %c0_93 = arith.constant 0 : index
    %252 = vector.load %arg11[%c1_91, %c0_92, %c0_93] : memref<6x32x1xf32, #tpu.memory_space<vmem>>, vector<1x32x1xf32>
    %253 = vector.shape_cast %252 : vector<1x32x1xf32> to vector<32x1xf32>
    %254 = vector.broadcast %253 : vector<32x1xf32> to vector<32x128xf32>
    %255 = arith.addf %251, %254 : vector<32x128xf32>
    %256 = vector.extract_strided_slice %255 {offsets = [0, 0], sizes = [16, 128], strides = [1, 1]} : vector<32x128xf32> to vector<16x128xf32>
    %257 = vector.extract_strided_slice %255 {offsets = [16, 0], sizes = [16, 128], strides = [1, 1]} : vector<32x128xf32> to vector<16x128xf32>
    %258 = arith.addf %150, %257 : vector<16x128xf32>
    %c0_94 = arith.constant 0 : index
    %c1_95 = arith.constant 1 : index
    %259 = memref.load %arg20[%c0_94, %c1_95] : memref<2x3xf32, #tpu.memory_space<smem>>
    %260 = vector.broadcast %259 : f32 to vector<16x128xf32>
    %261 = arith.mulf %256, %260 : vector<16x128xf32>
    %262 = arith.addf %154, %261 : vector<16x128xf32>
    %c2 = arith.constant 2 : index
    %c0_96 = arith.constant 0 : index
    %c0_97 = arith.constant 0 : index
    %263 = vector.load %arg10[%c2, %c0_96, %c0_97] : memref<6x32x6xf32, #tpu.memory_space<vmem>>, vector<1x32x6xf32>
    %264 = vector.shape_cast %263 : vector<1x32x6xf32> to vector<32x6xf32>
    %c2_98 = arith.constant 2 : index
    %c0_99 = arith.constant 0 : index
    %c0_100 = arith.constant 0 : index
    %265 = vector.load %arg7[%c2_98, %c0_99, %c0_100] : memref<6x32x16xf32, #tpu.memory_space<vmem>>, vector<1x32x16xf32>
    %266 = vector.shape_cast %265 : vector<1x32x16xf32> to vector<32x16xf32>
    %cst_101 = arith.constant dense<0.000000e+00> : vector<32x128xf32>
    %267 = tpu.matmul %266, %262, %cst_101 {dimension_numbers = #tpu.dot_dimension_numbers<[1], [0], [0], [1], [0, 0, 1, 1], [], []>} : vector<32x16xf32>, vector<16x128xf32>, vector<32x128xf32> -> vector<32x128xf32>
    %268 = vector.extract_strided_slice %264 {offsets = [0, 0], sizes = [32, 1], strides = [1, 1]} : vector<32x6xf32> to vector<32x1xf32>
    %269 = vector.broadcast %268 : vector<32x1xf32> to vector<32x128xf32>
    %270 = arith.addf %267, %269 : vector<32x128xf32>
    %cst_102 = arith.constant 0.000000e+00 : f32
    %271 = vector.broadcast %cst_102 : f32 to vector<32x128xf32>
    %272 = arith.cmpf oge, %270, %271 : vector<32x128xf32>
    %c2_103 = arith.constant 2 : index
    %c0_104 = arith.constant 0 : index
    %273 = memref.load %arg18[%c2_103, %c0_104] : memref<6x2xf32, #tpu.memory_space<smem>>
    %274 = vector.broadcast %273 : f32 to vector<32x128xf32>
    %275 = arith.mulf %274, %270 : vector<32x128xf32>
    %276 = arith.select %272, %270, %275 : vector<32x128xi1>, vector<32x128xf32>
    %277 = vector.extract_strided_slice %264 {offsets = [0, 1], sizes = [32, 1], strides = [1, 1]} : vector<32x6xf32> to vector<32x1xf32>
    %278 = vector.extract_strided_slice %264 {offsets = [0, 2], sizes = [32, 1], strides = [1, 1]} : vector<32x6xf32> to vector<32x1xf32>
    %cst_105 = arith.constant dense<0.000000e+00> : vector<32xf32>
    %279 = vector.multi_reduction <add>, %276, %cst_105 [1] : vector<32x128xf32> to vector<32xf32>
    %280 = vector.shape_cast %279 : vector<32xf32> to vector<32x1xf32>
    %cst_106 = arith.constant 1.280000e+02 : f32
    %281 = vector.broadcast %cst_106 : f32 to vector<32x1xf32>
    %282 = arith.divf %280, %281 : vector<32x1xf32>
    %283 = vector.broadcast %282 : vector<32x1xf32> to vector<32x128xf32>
    %284 = arith.subf %276, %283 : vector<32x128xf32>
    %285 = arith.mulf %284, %284 : vector<32x128xf32>
    %cst_107 = arith.constant dense<0.000000e+00> : vector<32xf32>
    %286 = vector.multi_reduction <add>, %285, %cst_107 [1] : vector<32x128xf32> to vector<32xf32>
    %287 = vector.shape_cast %286 : vector<32xf32> to vector<32x1xf32>
    %cst_108 = arith.constant 1.280000e+02 : f32
    %288 = vector.broadcast %cst_108 : f32 to vector<32x1xf32>
    %289 = arith.divf %287, %288 : vector<32x1xf32>
    %290 = vector.broadcast %282 : vector<32x1xf32> to vector<32x128xf32>
    %291 = arith.subf %276, %290 : vector<32x128xf32>
    %cst_109 = arith.constant 9.99999993E-9 : f32
    %292 = vector.broadcast %cst_109 : f32 to vector<32x1xf32>
    %293 = arith.addf %289, %292 : vector<32x1xf32>
    %294 = math.rsqrt %293 : vector<32x1xf32>
    %295 = vector.broadcast %294 : vector<32x1xf32> to vector<32x128xf32>
    %296 = arith.mulf %291, %295 : vector<32x128xf32>
    %297 = vector.broadcast %277 : vector<32x1xf32> to vector<32x128xf32>
    %298 = arith.mulf %297, %296 : vector<32x128xf32>
    %299 = vector.broadcast %278 : vector<32x1xf32> to vector<32x128xf32>
    %300 = arith.addf %298, %299 : vector<32x128xf32>
    %c2_110 = arith.constant 2 : index
    %c0_111 = arith.constant 0 : index
    %c0_112 = arith.constant 0 : index
    %301 = vector.load %arg8[%c2_110, %c0_111, %c0_112] : memref<6x32x3xf32, #tpu.memory_space<vmem>>, vector<1x32x3xf32>
    %302 = vector.shape_cast %301 : vector<1x32x3xf32> to vector<32x3xf32>
    %c4_i32_113 = arith.constant 4 : i32
    %303 = tpu.dynamic_rotate %300 by %c4_i32_113 dim 1 : vector<32x128xf32>, i32 -> vector<32x128xf32>
    %cst_114 = arith.constant 0.000000e+00 : f32
    %304 = vector.shape_cast %8 : vector<1x128xi1> to vector<1x128xi1>
    %305 = vector.broadcast %304 : vector<1x128xi1> to vector<32x128xi1>
    %306 = vector.broadcast %cst_114 : f32 to vector<32x128xf32>
    %307 = arith.select %305, %303, %306 : vector<32x128xi1>, vector<32x128xf32>
    %c124_i32_115 = arith.constant 124 : i32
    %308 = tpu.dynamic_rotate %300 by %c124_i32_115 dim 1 : vector<32x128xf32>, i32 -> vector<32x128xf32>
    %cst_116 = arith.constant 0.000000e+00 : f32
    %309 = vector.shape_cast %14 : vector<1x128xi1> to vector<1x128xi1>
    %310 = vector.broadcast %309 : vector<1x128xi1> to vector<32x128xi1>
    %311 = vector.broadcast %cst_116 : f32 to vector<32x128xf32>
    %312 = arith.select %310, %308, %311 : vector<32x128xi1>, vector<32x128xf32>
    %313 = vector.extract_strided_slice %302 {offsets = [0, 0], sizes = [32, 1], strides = [1, 1]} : vector<32x3xf32> to vector<32x1xf32>
    %314 = vector.broadcast %313 : vector<32x1xf32> to vector<32x128xf32>
    %315 = arith.mulf %314, %307 : vector<32x128xf32>
    %316 = vector.extract_strided_slice %302 {offsets = [0, 1], sizes = [32, 1], strides = [1, 1]} : vector<32x3xf32> to vector<32x1xf32>
    %317 = vector.broadcast %316 : vector<32x1xf32> to vector<32x128xf32>
    %318 = arith.mulf %317, %300 : vector<32x128xf32>
    %319 = arith.addf %315, %318 : vector<32x128xf32>
    %320 = vector.extract_strided_slice %302 {offsets = [0, 2], sizes = [32, 1], strides = [1, 1]} : vector<32x3xf32> to vector<32x1xf32>
    %321 = vector.broadcast %320 : vector<32x1xf32> to vector<32x128xf32>
    %322 = arith.mulf %321, %312 : vector<32x128xf32>
    %323 = arith.addf %319, %322 : vector<32x128xf32>
    %324 = vector.extract_strided_slice %264 {offsets = [0, 3], sizes = [32, 1], strides = [1, 1]} : vector<32x6xf32> to vector<32x1xf32>
    %325 = vector.broadcast %324 : vector<32x1xf32> to vector<32x128xf32>
    %326 = arith.addf %323, %325 : vector<32x128xf32>
    %cst_117 = arith.constant 0.000000e+00 : f32
    %327 = vector.broadcast %cst_117 : f32 to vector<32x128xf32>
    %328 = arith.cmpf oge, %326, %327 : vector<32x128xf32>
    %c2_118 = arith.constant 2 : index
    %c1_119 = arith.constant 1 : index
    %329 = memref.load %arg18[%c2_118, %c1_119] : memref<6x2xf32, #tpu.memory_space<smem>>
    %330 = vector.broadcast %329 : f32 to vector<32x128xf32>
    %331 = arith.mulf %330, %326 : vector<32x128xf32>
    %332 = arith.select %328, %326, %331 : vector<32x128xi1>, vector<32x128xf32>
    %333 = vector.extract_strided_slice %264 {offsets = [0, 4], sizes = [32, 1], strides = [1, 1]} : vector<32x6xf32> to vector<32x1xf32>
    %334 = vector.extract_strided_slice %264 {offsets = [0, 5], sizes = [32, 1], strides = [1, 1]} : vector<32x6xf32> to vector<32x1xf32>
    %cst_120 = arith.constant dense<0.000000e+00> : vector<32xf32>
    %335 = vector.multi_reduction <add>, %332, %cst_120 [1] : vector<32x128xf32> to vector<32xf32>
    %336 = vector.shape_cast %335 : vector<32xf32> to vector<32x1xf32>
    %cst_121 = arith.constant 1.280000e+02 : f32
    %337 = vector.broadcast %cst_121 : f32 to vector<32x1xf32>
    %338 = arith.divf %336, %337 : vector<32x1xf32>
    %339 = vector.broadcast %338 : vector<32x1xf32> to vector<32x128xf32>
    %340 = arith.subf %332, %339 : vector<32x128xf32>
    %341 = arith.mulf %340, %340 : vector<32x128xf32>
    %cst_122 = arith.constant dense<0.000000e+00> : vector<32xf32>
    %342 = vector.multi_reduction <add>, %341, %cst_122 [1] : vector<32x128xf32> to vector<32xf32>
    %343 = vector.shape_cast %342 : vector<32xf32> to vector<32x1xf32>
    %cst_123 = arith.constant 1.280000e+02 : f32
    %344 = vector.broadcast %cst_123 : f32 to vector<32x1xf32>
    %345 = arith.divf %343, %344 : vector<32x1xf32>
    %346 = vector.broadcast %338 : vector<32x1xf32> to vector<32x128xf32>
    %347 = arith.subf %332, %346 : vector<32x128xf32>
    %cst_124 = arith.constant 9.99999993E-9 : f32
    %348 = vector.broadcast %cst_124 : f32 to vector<32x1xf32>
    %349 = arith.addf %345, %348 : vector<32x1xf32>
    %350 = math.rsqrt %349 : vector<32x1xf32>
    %351 = vector.broadcast %350 : vector<32x1xf32> to vector<32x128xf32>
    %352 = arith.mulf %347, %351 : vector<32x128xf32>
    %353 = vector.broadcast %333 : vector<32x1xf32> to vector<32x128xf32>
    %354 = arith.mulf %353, %352 : vector<32x128xf32>
    %355 = vector.broadcast %334 : vector<32x1xf32> to vector<32x128xf32>
    %356 = arith.addf %354, %355 : vector<32x128xf32>
    %c2_125 = arith.constant 2 : index
    %c0_126 = arith.constant 0 : index
    %c0_127 = arith.constant 0 : index
    %357 = vector.load %arg9[%c2_125, %c0_126, %c0_127] : memref<6x32x32xf32, #tpu.memory_space<vmem>>, vector<1x32x32xf32>
    %358 = vector.shape_cast %357 : vector<1x32x32xf32> to vector<32x32xf32>
    %cst_128 = arith.constant dense<0.000000e+00> : vector<32x128xf32>
    %359 = tpu.matmul %358, %356, %cst_128 {dimension_numbers = #tpu.dot_dimension_numbers<[1], [0], [0], [1], [0, 0, 1, 1], [], []>} : vector<32x32xf32>, vector<32x128xf32>, vector<32x128xf32> -> vector<32x128xf32>
    %c2_129 = arith.constant 2 : index
    %c0_130 = arith.constant 0 : index
    %c0_131 = arith.constant 0 : index
    %360 = vector.load %arg11[%c2_129, %c0_130, %c0_131] : memref<6x32x1xf32, #tpu.memory_space<vmem>>, vector<1x32x1xf32>
    %361 = vector.shape_cast %360 : vector<1x32x1xf32> to vector<32x1xf32>
    %362 = vector.broadcast %361 : vector<32x1xf32> to vector<32x128xf32>
    %363 = arith.addf %359, %362 : vector<32x128xf32>
    %364 = vector.extract_strided_slice %363 {offsets = [0, 0], sizes = [16, 128], strides = [1, 1]} : vector<32x128xf32> to vector<16x128xf32>
    %365 = vector.extract_strided_slice %363 {offsets = [16, 0], sizes = [16, 128], strides = [1, 1]} : vector<32x128xf32> to vector<16x128xf32>
    %366 = arith.addf %258, %365 : vector<16x128xf32>
    %c0_132 = arith.constant 0 : index
    %c2_133 = arith.constant 2 : index
    %367 = memref.load %arg20[%c0_132, %c2_133] : memref<2x3xf32, #tpu.memory_space<smem>>
    %368 = vector.broadcast %367 : f32 to vector<16x128xf32>
    %369 = arith.mulf %364, %368 : vector<16x128xf32>
    %370 = arith.addf %262, %369 : vector<16x128xf32>
    %c0_134 = arith.constant 0 : index
    %c0_135 = arith.constant 0 : index
    %c0_136 = arith.constant 0 : index
    %371 = vector.load %arg12[%c0_134, %c0_135, %c0_136] : memref<1x16x16xf32, #tpu.memory_space<vmem>>, vector<1x16x16xf32>
    %372 = vector.shape_cast %371 : vector<1x16x16xf32> to vector<16x16xf32>
    %cst_137 = arith.constant dense<0.000000e+00> : vector<16x128xf32>
    %373 = tpu.matmul %372, %45, %cst_137 {dimension_numbers = #tpu.dot_dimension_numbers<[1], [0], [0], [1], [0, 0, 1, 1], [], []>} : vector<16x16xf32>, vector<16x128xf32>, vector<16x128xf32> -> vector<16x128xf32>
    %c0_138 = arith.constant 0 : index
    %c0_139 = arith.constant 0 : index
    %c0_140 = arith.constant 0 : index
    %374 = vector.load %arg13[%c0_138, %c0_139, %c0_140] : memref<1x16x1xf32, #tpu.memory_space<vmem>>, vector<1x16x1xf32>
    %375 = vector.shape_cast %374 : vector<1x16x1xf32> to vector<16x1xf32>
    %376 = vector.broadcast %375 : vector<16x1xf32> to vector<16x128xf32>
    %377 = arith.addf %373, %376 : vector<16x128xf32>
    %378 = arith.addf %377, %370 : vector<16x128xf32>
    %c3 = arith.constant 3 : index
    %c0_141 = arith.constant 0 : index
    %c0_142 = arith.constant 0 : index
    %379 = vector.load %arg10[%c3, %c0_141, %c0_142] : memref<6x32x6xf32, #tpu.memory_space<vmem>>, vector<1x32x6xf32>
    %380 = vector.shape_cast %379 : vector<1x32x6xf32> to vector<32x6xf32>
    %c3_143 = arith.constant 3 : index
    %c0_144 = arith.constant 0 : index
    %c0_145 = arith.constant 0 : index
    %381 = vector.load %arg7[%c3_143, %c0_144, %c0_145] : memref<6x32x16xf32, #tpu.memory_space<vmem>>, vector<1x32x16xf32>
    %382 = vector.shape_cast %381 : vector<1x32x16xf32> to vector<32x16xf32>
    %cst_146 = arith.constant dense<0.000000e+00> : vector<32x128xf32>
    %383 = tpu.matmul %382, %378, %cst_146 {dimension_numbers = #tpu.dot_dimension_numbers<[1], [0], [0], [1], [0, 0, 1, 1], [], []>} : vector<32x16xf32>, vector<16x128xf32>, vector<32x128xf32> -> vector<32x128xf32>
    %384 = vector.extract_strided_slice %380 {offsets = [0, 0], sizes = [32, 1], strides = [1, 1]} : vector<32x6xf32> to vector<32x1xf32>
    %385 = vector.broadcast %384 : vector<32x1xf32> to vector<32x128xf32>
    %386 = arith.addf %383, %385 : vector<32x128xf32>
    %cst_147 = arith.constant 0.000000e+00 : f32
    %387 = vector.broadcast %cst_147 : f32 to vector<32x128xf32>
    %388 = arith.cmpf oge, %386, %387 : vector<32x128xf32>
    %c3_148 = arith.constant 3 : index
    %c0_149 = arith.constant 0 : index
    %389 = memref.load %arg18[%c3_148, %c0_149] : memref<6x2xf32, #tpu.memory_space<smem>>
    %390 = vector.broadcast %389 : f32 to vector<32x128xf32>
    %391 = arith.mulf %390, %386 : vector<32x128xf32>
    %392 = arith.select %388, %386, %391 : vector<32x128xi1>, vector<32x128xf32>
    %393 = vector.extract_strided_slice %380 {offsets = [0, 1], sizes = [32, 1], strides = [1, 1]} : vector<32x6xf32> to vector<32x1xf32>
    %394 = vector.extract_strided_slice %380 {offsets = [0, 2], sizes = [32, 1], strides = [1, 1]} : vector<32x6xf32> to vector<32x1xf32>
    %cst_150 = arith.constant dense<0.000000e+00> : vector<32xf32>
    %395 = vector.multi_reduction <add>, %392, %cst_150 [1] : vector<32x128xf32> to vector<32xf32>
    %396 = vector.shape_cast %395 : vector<32xf32> to vector<32x1xf32>
    %cst_151 = arith.constant 1.280000e+02 : f32
    %397 = vector.broadcast %cst_151 : f32 to vector<32x1xf32>
    %398 = arith.divf %396, %397 : vector<32x1xf32>
    %399 = vector.broadcast %398 : vector<32x1xf32> to vector<32x128xf32>
    %400 = arith.subf %392, %399 : vector<32x128xf32>
    %401 = arith.mulf %400, %400 : vector<32x128xf32>
    %cst_152 = arith.constant dense<0.000000e+00> : vector<32xf32>
    %402 = vector.multi_reduction <add>, %401, %cst_152 [1] : vector<32x128xf32> to vector<32xf32>
    %403 = vector.shape_cast %402 : vector<32xf32> to vector<32x1xf32>
    %cst_153 = arith.constant 1.280000e+02 : f32
    %404 = vector.broadcast %cst_153 : f32 to vector<32x1xf32>
    %405 = arith.divf %403, %404 : vector<32x1xf32>
    %406 = vector.broadcast %398 : vector<32x1xf32> to vector<32x128xf32>
    %407 = arith.subf %392, %406 : vector<32x128xf32>
    %cst_154 = arith.constant 9.99999993E-9 : f32
    %408 = vector.broadcast %cst_154 : f32 to vector<32x1xf32>
    %409 = arith.addf %405, %408 : vector<32x1xf32>
    %410 = math.rsqrt %409 : vector<32x1xf32>
    %411 = vector.broadcast %410 : vector<32x1xf32> to vector<32x128xf32>
    %412 = arith.mulf %407, %411 : vector<32x128xf32>
    %413 = vector.broadcast %393 : vector<32x1xf32> to vector<32x128xf32>
    %414 = arith.mulf %413, %412 : vector<32x128xf32>
    %415 = vector.broadcast %394 : vector<32x1xf32> to vector<32x128xf32>
    %416 = arith.addf %414, %415 : vector<32x128xf32>
    %c3_155 = arith.constant 3 : index
    %c0_156 = arith.constant 0 : index
    %c0_157 = arith.constant 0 : index
    %417 = vector.load %arg8[%c3_155, %c0_156, %c0_157] : memref<6x32x3xf32, #tpu.memory_space<vmem>>, vector<1x32x3xf32>
    %418 = vector.shape_cast %417 : vector<1x32x3xf32> to vector<32x3xf32>
    %c1_i32_158 = arith.constant 1 : i32
    %419 = tpu.dynamic_rotate %416 by %c1_i32_158 dim 1 : vector<32x128xf32>, i32 -> vector<32x128xf32>
    %cst_159 = arith.constant 0.000000e+00 : f32
    %420 = vector.shape_cast %4 : vector<1x128xi1> to vector<1x128xi1>
    %421 = vector.broadcast %420 : vector<1x128xi1> to vector<32x128xi1>
    %422 = vector.broadcast %cst_159 : f32 to vector<32x128xf32>
    %423 = arith.select %421, %419, %422 : vector<32x128xi1>, vector<32x128xf32>
    %c127_i32_160 = arith.constant 127 : i32
    %424 = tpu.dynamic_rotate %416 by %c127_i32_160 dim 1 : vector<32x128xf32>, i32 -> vector<32x128xf32>
    %cst_161 = arith.constant 0.000000e+00 : f32
    %425 = vector.shape_cast %10 : vector<1x128xi1> to vector<1x128xi1>
    %426 = vector.broadcast %425 : vector<1x128xi1> to vector<32x128xi1>
    %427 = vector.broadcast %cst_161 : f32 to vector<32x128xf32>
    %428 = arith.select %426, %424, %427 : vector<32x128xi1>, vector<32x128xf32>
    %429 = vector.extract_strided_slice %418 {offsets = [0, 0], sizes = [32, 1], strides = [1, 1]} : vector<32x3xf32> to vector<32x1xf32>
    %430 = vector.broadcast %429 : vector<32x1xf32> to vector<32x128xf32>
    %431 = arith.mulf %430, %423 : vector<32x128xf32>
    %432 = vector.extract_strided_slice %418 {offsets = [0, 1], sizes = [32, 1], strides = [1, 1]} : vector<32x3xf32> to vector<32x1xf32>
    %433 = vector.broadcast %432 : vector<32x1xf32> to vector<32x128xf32>
    %434 = arith.mulf %433, %416 : vector<32x128xf32>
    %435 = arith.addf %431, %434 : vector<32x128xf32>
    %436 = vector.extract_strided_slice %418 {offsets = [0, 2], sizes = [32, 1], strides = [1, 1]} : vector<32x3xf32> to vector<32x1xf32>
    %437 = vector.broadcast %436 : vector<32x1xf32> to vector<32x128xf32>
    %438 = arith.mulf %437, %428 : vector<32x128xf32>
    %439 = arith.addf %435, %438 : vector<32x128xf32>
    %440 = vector.extract_strided_slice %380 {offsets = [0, 3], sizes = [32, 1], strides = [1, 1]} : vector<32x6xf32> to vector<32x1xf32>
    %441 = vector.broadcast %440 : vector<32x1xf32> to vector<32x128xf32>
    %442 = arith.addf %439, %441 : vector<32x128xf32>
    %cst_162 = arith.constant 0.000000e+00 : f32
    %443 = vector.broadcast %cst_162 : f32 to vector<32x128xf32>
    %444 = arith.cmpf oge, %442, %443 : vector<32x128xf32>
    %c3_163 = arith.constant 3 : index
    %c1_164 = arith.constant 1 : index
    %445 = memref.load %arg18[%c3_163, %c1_164] : memref<6x2xf32, #tpu.memory_space<smem>>
    %446 = vector.broadcast %445 : f32 to vector<32x128xf32>
    %447 = arith.mulf %446, %442 : vector<32x128xf32>
    %448 = arith.select %444, %442, %447 : vector<32x128xi1>, vector<32x128xf32>
    %449 = vector.extract_strided_slice %380 {offsets = [0, 4], sizes = [32, 1], strides = [1, 1]} : vector<32x6xf32> to vector<32x1xf32>
    %450 = vector.extract_strided_slice %380 {offsets = [0, 5], sizes = [32, 1], strides = [1, 1]} : vector<32x6xf32> to vector<32x1xf32>
    %cst_165 = arith.constant dense<0.000000e+00> : vector<32xf32>
    %451 = vector.multi_reduction <add>, %448, %cst_165 [1] : vector<32x128xf32> to vector<32xf32>
    %452 = vector.shape_cast %451 : vector<32xf32> to vector<32x1xf32>
    %cst_166 = arith.constant 1.280000e+02 : f32
    %453 = vector.broadcast %cst_166 : f32 to vector<32x1xf32>
    %454 = arith.divf %452, %453 : vector<32x1xf32>
    %455 = vector.broadcast %454 : vector<32x1xf32> to vector<32x128xf32>
    %456 = arith.subf %448, %455 : vector<32x128xf32>
    %457 = arith.mulf %456, %456 : vector<32x128xf32>
    %cst_167 = arith.constant dense<0.000000e+00> : vector<32xf32>
    %458 = vector.multi_reduction <add>, %457, %cst_167 [1] : vector<32x128xf32> to vector<32xf32>
    %459 = vector.shape_cast %458 : vector<32xf32> to vector<32x1xf32>
    %cst_168 = arith.constant 1.280000e+02 : f32
    %460 = vector.broadcast %cst_168 : f32 to vector<32x1xf32>
    %461 = arith.divf %459, %460 : vector<32x1xf32>
    %462 = vector.broadcast %454 : vector<32x1xf32> to vector<32x128xf32>
    %463 = arith.subf %448, %462 : vector<32x128xf32>
    %cst_169 = arith.constant 9.99999993E-9 : f32
    %464 = vector.broadcast %cst_169 : f32 to vector<32x1xf32>
    %465 = arith.addf %461, %464 : vector<32x1xf32>
    %466 = math.rsqrt %465 : vector<32x1xf32>
    %467 = vector.broadcast %466 : vector<32x1xf32> to vector<32x128xf32>
    %468 = arith.mulf %463, %467 : vector<32x128xf32>
    %469 = vector.broadcast %449 : vector<32x1xf32> to vector<32x128xf32>
    %470 = arith.mulf %469, %468 : vector<32x128xf32>
    %471 = vector.broadcast %450 : vector<32x1xf32> to vector<32x128xf32>
    %472 = arith.addf %470, %471 : vector<32x128xf32>
    %c3_170 = arith.constant 3 : index
    %c0_171 = arith.constant 0 : index
    %c0_172 = arith.constant 0 : index
    %473 = vector.load %arg9[%c3_170, %c0_171, %c0_172] : memref<6x32x32xf32, #tpu.memory_space<vmem>>, vector<1x32x32xf32>
    %474 = vector.shape_cast %473 : vector<1x32x32xf32> to vector<32x32xf32>
    %cst_173 = arith.constant dense<0.000000e+00> : vector<32x128xf32>
    %475 = tpu.matmul %474, %472, %cst_173 {dimension_numbers = #tpu.dot_dimension_numbers<[1], [0], [0], [1], [0, 0, 1, 1], [], []>} : vector<32x32xf32>, vector<32x128xf32>, vector<32x128xf32> -> vector<32x128xf32>
    %c3_174 = arith.constant 3 : index
    %c0_175 = arith.constant 0 : index
    %c0_176 = arith.constant 0 : index
    %476 = vector.load %arg11[%c3_174, %c0_175, %c0_176] : memref<6x32x1xf32, #tpu.memory_space<vmem>>, vector<1x32x1xf32>
    %477 = vector.shape_cast %476 : vector<1x32x1xf32> to vector<32x1xf32>
    %478 = vector.broadcast %477 : vector<32x1xf32> to vector<32x128xf32>
    %479 = arith.addf %475, %478 : vector<32x128xf32>
    %480 = vector.extract_strided_slice %479 {offsets = [0, 0], sizes = [16, 128], strides = [1, 1]} : vector<32x128xf32> to vector<16x128xf32>
    %481 = vector.extract_strided_slice %479 {offsets = [16, 0], sizes = [16, 128], strides = [1, 1]} : vector<32x128xf32> to vector<16x128xf32>
    %482 = arith.addf %366, %481 : vector<16x128xf32>
    %c1_177 = arith.constant 1 : index
    %c0_178 = arith.constant 0 : index
    %483 = memref.load %arg20[%c1_177, %c0_178] : memref<2x3xf32, #tpu.memory_space<smem>>
    %484 = vector.broadcast %483 : f32 to vector<16x128xf32>
    %485 = arith.mulf %480, %484 : vector<16x128xf32>
    %486 = arith.addf %378, %485 : vector<16x128xf32>
    %c4 = arith.constant 4 : index
    %c0_179 = arith.constant 0 : index
    %c0_180 = arith.constant 0 : index
    %487 = vector.load %arg10[%c4, %c0_179, %c0_180] : memref<6x32x6xf32, #tpu.memory_space<vmem>>, vector<1x32x6xf32>
    %488 = vector.shape_cast %487 : vector<1x32x6xf32> to vector<32x6xf32>
    %c4_181 = arith.constant 4 : index
    %c0_182 = arith.constant 0 : index
    %c0_183 = arith.constant 0 : index
    %489 = vector.load %arg7[%c4_181, %c0_182, %c0_183] : memref<6x32x16xf32, #tpu.memory_space<vmem>>, vector<1x32x16xf32>
    %490 = vector.shape_cast %489 : vector<1x32x16xf32> to vector<32x16xf32>
    %cst_184 = arith.constant dense<0.000000e+00> : vector<32x128xf32>
    %491 = tpu.matmul %490, %486, %cst_184 {dimension_numbers = #tpu.dot_dimension_numbers<[1], [0], [0], [1], [0, 0, 1, 1], [], []>} : vector<32x16xf32>, vector<16x128xf32>, vector<32x128xf32> -> vector<32x128xf32>
    %492 = vector.extract_strided_slice %488 {offsets = [0, 0], sizes = [32, 1], strides = [1, 1]} : vector<32x6xf32> to vector<32x1xf32>
    %493 = vector.broadcast %492 : vector<32x1xf32> to vector<32x128xf32>
    %494 = arith.addf %491, %493 : vector<32x128xf32>
    %cst_185 = arith.constant 0.000000e+00 : f32
    %495 = vector.broadcast %cst_185 : f32 to vector<32x128xf32>
    %496 = arith.cmpf oge, %494, %495 : vector<32x128xf32>
    %c4_186 = arith.constant 4 : index
    %c0_187 = arith.constant 0 : index
    %497 = memref.load %arg18[%c4_186, %c0_187] : memref<6x2xf32, #tpu.memory_space<smem>>
    %498 = vector.broadcast %497 : f32 to vector<32x128xf32>
    %499 = arith.mulf %498, %494 : vector<32x128xf32>
    %500 = arith.select %496, %494, %499 : vector<32x128xi1>, vector<32x128xf32>
    %501 = vector.extract_strided_slice %488 {offsets = [0, 1], sizes = [32, 1], strides = [1, 1]} : vector<32x6xf32> to vector<32x1xf32>
    %502 = vector.extract_strided_slice %488 {offsets = [0, 2], sizes = [32, 1], strides = [1, 1]} : vector<32x6xf32> to vector<32x1xf32>
    %cst_188 = arith.constant dense<0.000000e+00> : vector<32xf32>
    %503 = vector.multi_reduction <add>, %500, %cst_188 [1] : vector<32x128xf32> to vector<32xf32>
    %504 = vector.shape_cast %503 : vector<32xf32> to vector<32x1xf32>
    %cst_189 = arith.constant 1.280000e+02 : f32
    %505 = vector.broadcast %cst_189 : f32 to vector<32x1xf32>
    %506 = arith.divf %504, %505 : vector<32x1xf32>
    %507 = vector.broadcast %506 : vector<32x1xf32> to vector<32x128xf32>
    %508 = arith.subf %500, %507 : vector<32x128xf32>
    %509 = arith.mulf %508, %508 : vector<32x128xf32>
    %cst_190 = arith.constant dense<0.000000e+00> : vector<32xf32>
    %510 = vector.multi_reduction <add>, %509, %cst_190 [1] : vector<32x128xf32> to vector<32xf32>
    %511 = vector.shape_cast %510 : vector<32xf32> to vector<32x1xf32>
    %cst_191 = arith.constant 1.280000e+02 : f32
    %512 = vector.broadcast %cst_191 : f32 to vector<32x1xf32>
    %513 = arith.divf %511, %512 : vector<32x1xf32>
    %514 = vector.broadcast %506 : vector<32x1xf32> to vector<32x128xf32>
    %515 = arith.subf %500, %514 : vector<32x128xf32>
    %cst_192 = arith.constant 9.99999993E-9 : f32
    %516 = vector.broadcast %cst_192 : f32 to vector<32x1xf32>
    %517 = arith.addf %513, %516 : vector<32x1xf32>
    %518 = math.rsqrt %517 : vector<32x1xf32>
    %519 = vector.broadcast %518 : vector<32x1xf32> to vector<32x128xf32>
    %520 = arith.mulf %515, %519 : vector<32x128xf32>
    %521 = vector.broadcast %501 : vector<32x1xf32> to vector<32x128xf32>
    %522 = arith.mulf %521, %520 : vector<32x128xf32>
    %523 = vector.broadcast %502 : vector<32x1xf32> to vector<32x128xf32>
    %524 = arith.addf %522, %523 : vector<32x128xf32>
    %c4_193 = arith.constant 4 : index
    %c0_194 = arith.constant 0 : index
    %c0_195 = arith.constant 0 : index
    %525 = vector.load %arg8[%c4_193, %c0_194, %c0_195] : memref<6x32x3xf32, #tpu.memory_space<vmem>>, vector<1x32x3xf32>
    %526 = vector.shape_cast %525 : vector<1x32x3xf32> to vector<32x3xf32>
    %c2_i32_196 = arith.constant 2 : i32
    %527 = tpu.dynamic_rotate %524 by %c2_i32_196 dim 1 : vector<32x128xf32>, i32 -> vector<32x128xf32>
    %cst_197 = arith.constant 0.000000e+00 : f32
    %528 = vector.shape_cast %6 : vector<1x128xi1> to vector<1x128xi1>
    %529 = vector.broadcast %528 : vector<1x128xi1> to vector<32x128xi1>
    %530 = vector.broadcast %cst_197 : f32 to vector<32x128xf32>
    %531 = arith.select %529, %527, %530 : vector<32x128xi1>, vector<32x128xf32>
    %c126_i32_198 = arith.constant 126 : i32
    %532 = tpu.dynamic_rotate %524 by %c126_i32_198 dim 1 : vector<32x128xf32>, i32 -> vector<32x128xf32>
    %cst_199 = arith.constant 0.000000e+00 : f32
    %533 = vector.shape_cast %12 : vector<1x128xi1> to vector<1x128xi1>
    %534 = vector.broadcast %533 : vector<1x128xi1> to vector<32x128xi1>
    %535 = vector.broadcast %cst_199 : f32 to vector<32x128xf32>
    %536 = arith.select %534, %532, %535 : vector<32x128xi1>, vector<32x128xf32>
    %537 = vector.extract_strided_slice %526 {offsets = [0, 0], sizes = [32, 1], strides = [1, 1]} : vector<32x3xf32> to vector<32x1xf32>
    %538 = vector.broadcast %537 : vector<32x1xf32> to vector<32x128xf32>
    %539 = arith.mulf %538, %531 : vector<32x128xf32>
    %540 = vector.extract_strided_slice %526 {offsets = [0, 1], sizes = [32, 1], strides = [1, 1]} : vector<32x3xf32> to vector<32x1xf32>
    %541 = vector.broadcast %540 : vector<32x1xf32> to vector<32x128xf32>
    %542 = arith.mulf %541, %524 : vector<32x128xf32>
    %543 = arith.addf %539, %542 : vector<32x128xf32>
    %544 = vector.extract_strided_slice %526 {offsets = [0, 2], sizes = [32, 1], strides = [1, 1]} : vector<32x3xf32> to vector<32x1xf32>
    %545 = vector.broadcast %544 : vector<32x1xf32> to vector<32x128xf32>
    %546 = arith.mulf %545, %536 : vector<32x128xf32>
    %547 = arith.addf %543, %546 : vector<32x128xf32>
    %548 = vector.extract_strided_slice %488 {offsets = [0, 3], sizes = [32, 1], strides = [1, 1]} : vector<32x6xf32> to vector<32x1xf32>
    %549 = vector.broadcast %548 : vector<32x1xf32> to vector<32x128xf32>
    %550 = arith.addf %547, %549 : vector<32x128xf32>
    %cst_200 = arith.constant 0.000000e+00 : f32
    %551 = vector.broadcast %cst_200 : f32 to vector<32x128xf32>
    %552 = arith.cmpf oge, %550, %551 : vector<32x128xf32>
    %c4_201 = arith.constant 4 : index
    %c1_202 = arith.constant 1 : index
    %553 = memref.load %arg18[%c4_201, %c1_202] : memref<6x2xf32, #tpu.memory_space<smem>>
    %554 = vector.broadcast %553 : f32 to vector<32x128xf32>
    %555 = arith.mulf %554, %550 : vector<32x128xf32>
    %556 = arith.select %552, %550, %555 : vector<32x128xi1>, vector<32x128xf32>
    %557 = vector.extract_strided_slice %488 {offsets = [0, 4], sizes = [32, 1], strides = [1, 1]} : vector<32x6xf32> to vector<32x1xf32>
    %558 = vector.extract_strided_slice %488 {offsets = [0, 5], sizes = [32, 1], strides = [1, 1]} : vector<32x6xf32> to vector<32x1xf32>
    %cst_203 = arith.constant dense<0.000000e+00> : vector<32xf32>
    %559 = vector.multi_reduction <add>, %556, %cst_203 [1] : vector<32x128xf32> to vector<32xf32>
    %560 = vector.shape_cast %559 : vector<32xf32> to vector<32x1xf32>
    %cst_204 = arith.constant 1.280000e+02 : f32
    %561 = vector.broadcast %cst_204 : f32 to vector<32x1xf32>
    %562 = arith.divf %560, %561 : vector<32x1xf32>
    %563 = vector.broadcast %562 : vector<32x1xf32> to vector<32x128xf32>
    %564 = arith.subf %556, %563 : vector<32x128xf32>
    %565 = arith.mulf %564, %564 : vector<32x128xf32>
    %cst_205 = arith.constant dense<0.000000e+00> : vector<32xf32>
    %566 = vector.multi_reduction <add>, %565, %cst_205 [1] : vector<32x128xf32> to vector<32xf32>
    %567 = vector.shape_cast %566 : vector<32xf32> to vector<32x1xf32>
    %cst_206 = arith.constant 1.280000e+02 : f32
    %568 = vector.broadcast %cst_206 : f32 to vector<32x1xf32>
    %569 = arith.divf %567, %568 : vector<32x1xf32>
    %570 = vector.broadcast %562 : vector<32x1xf32> to vector<32x128xf32>
    %571 = arith.subf %556, %570 : vector<32x128xf32>
    %cst_207 = arith.constant 9.99999993E-9 : f32
    %572 = vector.broadcast %cst_207 : f32 to vector<32x1xf32>
    %573 = arith.addf %569, %572 : vector<32x1xf32>
    %574 = math.rsqrt %573 : vector<32x1xf32>
    %575 = vector.broadcast %574 : vector<32x1xf32> to vector<32x128xf32>
    %576 = arith.mulf %571, %575 : vector<32x128xf32>
    %577 = vector.broadcast %557 : vector<32x1xf32> to vector<32x128xf32>
    %578 = arith.mulf %577, %576 : vector<32x128xf32>
    %579 = vector.broadcast %558 : vector<32x1xf32> to vector<32x128xf32>
    %580 = arith.addf %578, %579 : vector<32x128xf32>
    %c4_208 = arith.constant 4 : index
    %c0_209 = arith.constant 0 : index
    %c0_210 = arith.constant 0 : index
    %581 = vector.load %arg9[%c4_208, %c0_209, %c0_210] : memref<6x32x32xf32, #tpu.memory_space<vmem>>, vector<1x32x32xf32>
    %582 = vector.shape_cast %581 : vector<1x32x32xf32> to vector<32x32xf32>
    %cst_211 = arith.constant dense<0.000000e+00> : vector<32x128xf32>
    %583 = tpu.matmul %582, %580, %cst_211 {dimension_numbers = #tpu.dot_dimension_numbers<[1], [0], [0], [1], [0, 0, 1, 1], [], []>} : vector<32x32xf32>, vector<32x128xf32>, vector<32x128xf32> -> vector<32x128xf32>
    %c4_212 = arith.constant 4 : index
    %c0_213 = arith.constant 0 : index
    %c0_214 = arith.constant 0 : index
    %584 = vector.load %arg11[%c4_212, %c0_213, %c0_214] : memref<6x32x1xf32, #tpu.memory_space<vmem>>, vector<1x32x1xf32>
    %585 = vector.shape_cast %584 : vector<1x32x1xf32> to vector<32x1xf32>
    %586 = vector.broadcast %585 : vector<32x1xf32> to vector<32x128xf32>
    %587 = arith.addf %583, %586 : vector<32x128xf32>
    %588 = vector.extract_strided_slice %587 {offsets = [0, 0], sizes = [16, 128], strides = [1, 1]} : vector<32x128xf32> to vector<16x128xf32>
    %589 = vector.extract_strided_slice %587 {offsets = [16, 0], sizes = [16, 128], strides = [1, 1]} : vector<32x128xf32> to vector<16x128xf32>
    %590 = arith.addf %482, %589 : vector<16x128xf32>
    %c1_215 = arith.constant 1 : index
    %c1_216 = arith.constant 1 : index
    %591 = memref.load %arg20[%c1_215, %c1_216] : memref<2x3xf32, #tpu.memory_space<smem>>
    %592 = vector.broadcast %591 : f32 to vector<16x128xf32>
    %593 = arith.mulf %588, %592 : vector<16x128xf32>
    %594 = arith.addf %486, %593 : vector<16x128xf32>
    %c5 = arith.constant 5 : index
    %c0_217 = arith.constant 0 : index
    %c0_218 = arith.constant 0 : index
    %595 = vector.load %arg10[%c5, %c0_217, %c0_218] : memref<6x32x6xf32, #tpu.memory_space<vmem>>, vector<1x32x6xf32>
    %596 = vector.shape_cast %595 : vector<1x32x6xf32> to vector<32x6xf32>
    %c5_219 = arith.constant 5 : index
    %c0_220 = arith.constant 0 : index
    %c0_221 = arith.constant 0 : index
    %597 = vector.load %arg7[%c5_219, %c0_220, %c0_221] : memref<6x32x16xf32, #tpu.memory_space<vmem>>, vector<1x32x16xf32>
    %598 = vector.shape_cast %597 : vector<1x32x16xf32> to vector<32x16xf32>
    %cst_222 = arith.constant dense<0.000000e+00> : vector<32x128xf32>
    %599 = tpu.matmul %598, %594, %cst_222 {dimension_numbers = #tpu.dot_dimension_numbers<[1], [0], [0], [1], [0, 0, 1, 1], [], []>} : vector<32x16xf32>, vector<16x128xf32>, vector<32x128xf32> -> vector<32x128xf32>
    %600 = vector.extract_strided_slice %596 {offsets = [0, 0], sizes = [32, 1], strides = [1, 1]} : vector<32x6xf32> to vector<32x1xf32>
    %601 = vector.broadcast %600 : vector<32x1xf32> to vector<32x128xf32>
    %602 = arith.addf %599, %601 : vector<32x128xf32>
    %cst_223 = arith.constant 0.000000e+00 : f32
    %603 = vector.broadcast %cst_223 : f32 to vector<32x128xf32>
    %604 = arith.cmpf oge, %602, %603 : vector<32x128xf32>
    %c5_224 = arith.constant 5 : index
    %c0_225 = arith.constant 0 : index
    %605 = memref.load %arg18[%c5_224, %c0_225] : memref<6x2xf32, #tpu.memory_space<smem>>
    %606 = vector.broadcast %605 : f32 to vector<32x128xf32>
    %607 = arith.mulf %606, %602 : vector<32x128xf32>
    %608 = arith.select %604, %602, %607 : vector<32x128xi1>, vector<32x128xf32>
    %609 = vector.extract_strided_slice %596 {offsets = [0, 1], sizes = [32, 1], strides = [1, 1]} : vector<32x6xf32> to vector<32x1xf32>
    %610 = vector.extract_strided_slice %596 {offsets = [0, 2], sizes = [32, 1], strides = [1, 1]} : vector<32x6xf32> to vector<32x1xf32>
    %cst_226 = arith.constant dense<0.000000e+00> : vector<32xf32>
    %611 = vector.multi_reduction <add>, %608, %cst_226 [1] : vector<32x128xf32> to vector<32xf32>
    %612 = vector.shape_cast %611 : vector<32xf32> to vector<32x1xf32>
    %cst_227 = arith.constant 1.280000e+02 : f32
    %613 = vector.broadcast %cst_227 : f32 to vector<32x1xf32>
    %614 = arith.divf %612, %613 : vector<32x1xf32>
    %615 = vector.broadcast %614 : vector<32x1xf32> to vector<32x128xf32>
    %616 = arith.subf %608, %615 : vector<32x128xf32>
    %617 = arith.mulf %616, %616 : vector<32x128xf32>
    %cst_228 = arith.constant dense<0.000000e+00> : vector<32xf32>
    %618 = vector.multi_reduction <add>, %617, %cst_228 [1] : vector<32x128xf32> to vector<32xf32>
    %619 = vector.shape_cast %618 : vector<32xf32> to vector<32x1xf32>
    %cst_229 = arith.constant 1.280000e+02 : f32
    %620 = vector.broadcast %cst_229 : f32 to vector<32x1xf32>
    %621 = arith.divf %619, %620 : vector<32x1xf32>
    %622 = vector.broadcast %614 : vector<32x1xf32> to vector<32x128xf32>
    %623 = arith.subf %608, %622 : vector<32x128xf32>
    %cst_230 = arith.constant 9.99999993E-9 : f32
    %624 = vector.broadcast %cst_230 : f32 to vector<32x1xf32>
    %625 = arith.addf %621, %624 : vector<32x1xf32>
    %626 = math.rsqrt %625 : vector<32x1xf32>
    %627 = vector.broadcast %626 : vector<32x1xf32> to vector<32x128xf32>
    %628 = arith.mulf %623, %627 : vector<32x128xf32>
    %629 = vector.broadcast %609 : vector<32x1xf32> to vector<32x128xf32>
    %630 = arith.mulf %629, %628 : vector<32x128xf32>
    %631 = vector.broadcast %610 : vector<32x1xf32> to vector<32x128xf32>
    %632 = arith.addf %630, %631 : vector<32x128xf32>
    %c5_231 = arith.constant 5 : index
    %c0_232 = arith.constant 0 : index
    %c0_233 = arith.constant 0 : index
    %633 = vector.load %arg8[%c5_231, %c0_232, %c0_233] : memref<6x32x3xf32, #tpu.memory_space<vmem>>, vector<1x32x3xf32>
    %634 = vector.shape_cast %633 : vector<1x32x3xf32> to vector<32x3xf32>
    %c4_i32_234 = arith.constant 4 : i32
    %635 = tpu.dynamic_rotate %632 by %c4_i32_234 dim 1 : vector<32x128xf32>, i32 -> vector<32x128xf32>
    %cst_235 = arith.constant 0.000000e+00 : f32
    %636 = vector.shape_cast %8 : vector<1x128xi1> to vector<1x128xi1>
    %637 = vector.broadcast %636 : vector<1x128xi1> to vector<32x128xi1>
    %638 = vector.broadcast %cst_235 : f32 to vector<32x128xf32>
    %639 = arith.select %637, %635, %638 : vector<32x128xi1>, vector<32x128xf32>
    %c124_i32_236 = arith.constant 124 : i32
    %640 = tpu.dynamic_rotate %632 by %c124_i32_236 dim 1 : vector<32x128xf32>, i32 -> vector<32x128xf32>
    %cst_237 = arith.constant 0.000000e+00 : f32
    %641 = vector.shape_cast %14 : vector<1x128xi1> to vector<1x128xi1>
    %642 = vector.broadcast %641 : vector<1x128xi1> to vector<32x128xi1>
    %643 = vector.broadcast %cst_237 : f32 to vector<32x128xf32>
    %644 = arith.select %642, %640, %643 : vector<32x128xi1>, vector<32x128xf32>
    %645 = vector.extract_strided_slice %634 {offsets = [0, 0], sizes = [32, 1], strides = [1, 1]} : vector<32x3xf32> to vector<32x1xf32>
    %646 = vector.broadcast %645 : vector<32x1xf32> to vector<32x128xf32>
    %647 = arith.mulf %646, %639 : vector<32x128xf32>
    %648 = vector.extract_strided_slice %634 {offsets = [0, 1], sizes = [32, 1], strides = [1, 1]} : vector<32x3xf32> to vector<32x1xf32>
    %649 = vector.broadcast %648 : vector<32x1xf32> to vector<32x128xf32>
    %650 = arith.mulf %649, %632 : vector<32x128xf32>
    %651 = arith.addf %647, %650 : vector<32x128xf32>
    %652 = vector.extract_strided_slice %634 {offsets = [0, 2], sizes = [32, 1], strides = [1, 1]} : vector<32x3xf32> to vector<32x1xf32>
    %653 = vector.broadcast %652 : vector<32x1xf32> to vector<32x128xf32>
    %654 = arith.mulf %653, %644 : vector<32x128xf32>
    %655 = arith.addf %651, %654 : vector<32x128xf32>
    %656 = vector.extract_strided_slice %596 {offsets = [0, 3], sizes = [32, 1], strides = [1, 1]} : vector<32x6xf32> to vector<32x1xf32>
    %657 = vector.broadcast %656 : vector<32x1xf32> to vector<32x128xf32>
    %658 = arith.addf %655, %657 : vector<32x128xf32>
    %cst_238 = arith.constant 0.000000e+00 : f32
    %659 = vector.broadcast %cst_238 : f32 to vector<32x128xf32>
    %660 = arith.cmpf oge, %658, %659 : vector<32x128xf32>
    %c5_239 = arith.constant 5 : index
    %c1_240 = arith.constant 1 : index
    %661 = memref.load %arg18[%c5_239, %c1_240] : memref<6x2xf32, #tpu.memory_space<smem>>
    %662 = vector.broadcast %661 : f32 to vector<32x128xf32>
    %663 = arith.mulf %662, %658 : vector<32x128xf32>
    %664 = arith.select %660, %658, %663 : vector<32x128xi1>, vector<32x128xf32>
    %665 = vector.extract_strided_slice %596 {offsets = [0, 4], sizes = [32, 1], strides = [1, 1]} : vector<32x6xf32> to vector<32x1xf32>
    %666 = vector.extract_strided_slice %596 {offsets = [0, 5], sizes = [32, 1], strides = [1, 1]} : vector<32x6xf32> to vector<32x1xf32>
    %cst_241 = arith.constant dense<0.000000e+00> : vector<32xf32>
    %667 = vector.multi_reduction <add>, %664, %cst_241 [1] : vector<32x128xf32> to vector<32xf32>
    %668 = vector.shape_cast %667 : vector<32xf32> to vector<32x1xf32>
    %cst_242 = arith.constant 1.280000e+02 : f32
    %669 = vector.broadcast %cst_242 : f32 to vector<32x1xf32>
    %670 = arith.divf %668, %669 : vector<32x1xf32>
    %671 = vector.broadcast %670 : vector<32x1xf32> to vector<32x128xf32>
    %672 = arith.subf %664, %671 : vector<32x128xf32>
    %673 = arith.mulf %672, %672 : vector<32x128xf32>
    %cst_243 = arith.constant dense<0.000000e+00> : vector<32xf32>
    %674 = vector.multi_reduction <add>, %673, %cst_243 [1] : vector<32x128xf32> to vector<32xf32>
    %675 = vector.shape_cast %674 : vector<32xf32> to vector<32x1xf32>
    %cst_244 = arith.constant 1.280000e+02 : f32
    %676 = vector.broadcast %cst_244 : f32 to vector<32x1xf32>
    %677 = arith.divf %675, %676 : vector<32x1xf32>
    %678 = vector.broadcast %670 : vector<32x1xf32> to vector<32x128xf32>
    %679 = arith.subf %664, %678 : vector<32x128xf32>
    %cst_245 = arith.constant 9.99999993E-9 : f32
    %680 = vector.broadcast %cst_245 : f32 to vector<32x1xf32>
    %681 = arith.addf %677, %680 : vector<32x1xf32>
    %682 = math.rsqrt %681 : vector<32x1xf32>
    %683 = vector.broadcast %682 : vector<32x1xf32> to vector<32x128xf32>
    %684 = arith.mulf %679, %683 : vector<32x128xf32>
    %685 = vector.broadcast %665 : vector<32x1xf32> to vector<32x128xf32>
    %686 = arith.mulf %685, %684 : vector<32x128xf32>
    %687 = vector.broadcast %666 : vector<32x1xf32> to vector<32x128xf32>
    %688 = arith.addf %686, %687 : vector<32x128xf32>
    %c5_246 = arith.constant 5 : index
    %c0_247 = arith.constant 0 : index
    %c0_248 = arith.constant 0 : index
    %689 = vector.load %arg9[%c5_246, %c0_247, %c0_248] : memref<6x32x32xf32, #tpu.memory_space<vmem>>, vector<1x32x32xf32>
    %690 = vector.shape_cast %689 : vector<1x32x32xf32> to vector<32x32xf32>
    %cst_249 = arith.constant dense<0.000000e+00> : vector<32x128xf32>
    %691 = tpu.matmul %690, %688, %cst_249 {dimension_numbers = #tpu.dot_dimension_numbers<[1], [0], [0], [1], [0, 0, 1, 1], [], []>} : vector<32x32xf32>, vector<32x128xf32>, vector<32x128xf32> -> vector<32x128xf32>
    %c5_250 = arith.constant 5 : index
    %c0_251 = arith.constant 0 : index
    %c0_252 = arith.constant 0 : index
    %692 = vector.load %arg11[%c5_250, %c0_251, %c0_252] : memref<6x32x1xf32, #tpu.memory_space<vmem>>, vector<1x32x1xf32>
    %693 = vector.shape_cast %692 : vector<1x32x1xf32> to vector<32x1xf32>
    %694 = vector.broadcast %693 : vector<32x1xf32> to vector<32x128xf32>
    %695 = arith.addf %691, %694 : vector<32x128xf32>
    %696 = vector.extract_strided_slice %695 {offsets = [16, 0], sizes = [16, 128], strides = [1, 1]} : vector<32x128xf32> to vector<16x128xf32>
    %697 = arith.addf %590, %696 : vector<16x128xf32>
    %cst_253 = arith.constant 0.000000e+00 : f32
    %698 = vector.broadcast %cst_253 : f32 to vector<16x128xf32>
    %699 = arith.cmpf oge, %697, %698 : vector<16x128xf32>
    %c0_254 = arith.constant 0 : index
    %700 = memref.load %arg19[%c0_254] : memref<1xf32, #tpu.memory_space<smem>>
    %701 = vector.broadcast %700 : f32 to vector<16x128xf32>
    %702 = arith.mulf %701, %697 : vector<16x128xf32>
    %703 = arith.select %699, %697, %702 : vector<16x128xi1>, vector<16x128xf32>
    %c0_255 = arith.constant 0 : index
    %c0_256 = arith.constant 0 : index
    %704 = vector.load %arg14[%c0_255, %c0_256] : memref<32x16xf32, #tpu.memory_space<vmem>>, vector<32x16xf32>
    %cst_257 = arith.constant dense<0.000000e+00> : vector<32x128xf32>
    %705 = tpu.matmul %704, %703, %cst_257 {dimension_numbers = #tpu.dot_dimension_numbers<[1], [0], [0], [1], [0, 0, 1, 1], [], []>} : vector<32x16xf32>, vector<16x128xf32>, vector<32x128xf32> -> vector<32x128xf32>
    %c0_258 = arith.constant 0 : index
    %c0_259 = arith.constant 0 : index
    %706 = vector.load %arg15[%c0_258, %c0_259] : memref<32x1xf32, #tpu.memory_space<vmem>>, vector<32x1xf32>
    %707 = vector.broadcast %706 : vector<32x1xf32> to vector<32x128xf32>
    %708 = arith.addf %705, %707 : vector<32x128xf32>
    %cst_260 = arith.constant 0.000000e+00 : f32
    %709 = vector.broadcast %cst_260 : f32 to vector<32x128xf32>
    %710 = arith.maximumf %708, %709 : vector<32x128xf32>
    %c0_261 = arith.constant 0 : index
    %c0_262 = arith.constant 0 : index
    %c0_263 = arith.constant 0 : index
    %711 = vector.load %arg21[%c0_261, %c0_262, %c0_263] : memref<1x32x128xf32, #tpu.memory_space<vmem>>, vector<1x32x128xf32>
    %712 = vector.shape_cast %711 : vector<1x32x128xf32> to vector<32x128xf32>
    %713 = vector.shape_cast %710 : vector<32x128xf32> to vector<1x32x128xf32>
    tpu.vector_store %arg21[%c0_261, %c0_262, %c0_263], %713 {strides = array<i32>} : memref<1x32x128xf32, #tpu.memory_space<vmem>>, vector<1x32x128xf32>,
    %c0_264 = arith.constant 0 : index
    %c0_265 = arith.constant 0 : index
    %714 = vector.load %arg16[%c0_264, %c0_265] : memref<2x16xf32, #tpu.memory_space<vmem>>, vector<2x16xf32>
    %cst_266 = arith.constant dense<0.000000e+00> : vector<2x128xf32>
    %715 = tpu.matmul %714, %697, %cst_266 {dimension_numbers = #tpu.dot_dimension_numbers<[1], [0], [0], [1], [0, 0, 1, 1], [], []>} : vector<2x16xf32>, vector<16x128xf32>, vector<2x128xf32> -> vector<2x128xf32>
    %cst_267 = arith.constant dense<0.000000e+00> : vector<2xf32>
    %716 = vector.multi_reduction <add>, %715, %cst_267 [1] : vector<2x128xf32> to vector<2xf32>
    %717 = vector.shape_cast %716 : vector<2xf32> to vector<2x1xf32>
    %cst_268 = arith.constant 1.280000e+02 : f32
    %718 = vector.broadcast %cst_268 : f32 to vector<2x1xf32>
    %719 = arith.divf %717, %718 : vector<2x1xf32>
    %c0_269 = arith.constant 0 : index
    %c0_270 = arith.constant 0 : index
    %720 = vector.load %arg17[%c0_269, %c0_270] : memref<2x1xf32, #tpu.memory_space<vmem>>, vector<2x1xf32>
    %721 = arith.addf %719, %720 : vector<2x1xf32>
    %cst_271 = arith.constant dense<0xFF800000> : vector<1xf32>
    %722 = vector.multi_reduction <maximumf>, %721, %cst_271 [0] : vector<2x1xf32> to vector<1xf32>
    %723 = vector.shape_cast %722 : vector<1xf32> to vector<1x1xf32>
    %724 = vector.broadcast %723 : vector<1x1xf32> to vector<2x1xf32>
    %725 = arith.subf %721, %724 : vector<2x1xf32>
    %726 = math.exp %725 : vector<2x1xf32>
    %cst_272 = arith.constant dense<0.000000e+00> : vector<1xf32>
    %727 = vector.multi_reduction <add>, %726, %cst_272 [0] : vector<2x1xf32> to vector<1xf32>
    %728 = vector.shape_cast %727 : vector<1xf32> to vector<1x1xf32>
    %729 = vector.broadcast %728 : vector<1x1xf32> to vector<2x1xf32>
    %730 = arith.divf %726, %729 : vector<2x1xf32>
    %c0_273 = arith.constant 0 : index
    %c0_274 = arith.constant 0 : index
    %c0_275 = arith.constant 0 : index
    %731 = vector.load %arg23[%c0_273, %c0_274, %c0_275] : memref<1x2x1xf32, #tpu.memory_space<vmem>>, vector<1x2x1xf32>
    %732 = vector.shape_cast %731 : vector<1x2x1xf32> to vector<2x1xf32>
    %733 = vector.shape_cast %730 : vector<2x1xf32> to vector<1x2x1xf32>
    tpu.vector_store %arg23[%c0_273, %c0_274, %c0_275], %733 {strides = array<i32>} : memref<1x2x1xf32, #tpu.memory_space<vmem>>, vector<1x2x1xf32>,
    %cst_276 = arith.constant dense<0.000000e+00> : vector<1xf32>
    %734 = vector.multi_reduction <add>, %730, %cst_276 [0] : vector<2x1xf32> to vector<1xf32>
    %735 = vector.shape_cast %734 : vector<1xf32> to vector<1x1xf32>
    %cst_277 = arith.constant 9.99999993E-9 : f32
    %736 = vector.broadcast %cst_277 : f32 to vector<1x1xf32>
    %737 = arith.addf %735, %736 : vector<1x1xf32>
    %738 = vector.broadcast %737 : vector<1x1xf32> to vector<2x1xf32>
    %739 = arith.divf %730, %738 : vector<2x1xf32>
    %740 = vector.extract_strided_slice %710 {offsets = [0, 0], sizes = [16, 128], strides = [1, 1]} : vector<32x128xf32> to vector<16x128xf32>
    %741 = arith.mulf %740, %16 : vector<16x128xf32>
    %c0_278 = arith.constant 0 : index
    %c0_279 = arith.constant 0 : index
    %742 = vector.load %arg3[%c0_278, %c0_279] : memref<4x16xf32, #tpu.memory_space<vmem>>, vector<4x16xf32>
    %cst_280 = arith.constant dense<0.000000e+00> : vector<4x128xf32>
    %743 = tpu.matmul %742, %741, %cst_280 {dimension_numbers = #tpu.dot_dimension_numbers<[1], [0], [0], [1], [0, 0, 1, 1], [], []>} : vector<4x16xf32>, vector<16x128xf32>, vector<4x128xf32> -> vector<4x128xf32>
    %744 = vector.extract_strided_slice %710 {offsets = [16, 0], sizes = [16, 128], strides = [1, 1]} : vector<32x128xf32> to vector<16x128xf32>
    %745 = arith.mulf %744, %16 : vector<16x128xf32>
    %c0_281 = arith.constant 0 : index
    %c0_282 = arith.constant 0 : index
    %746 = vector.load %arg3[%c0_281, %c0_282] : memref<4x16xf32, #tpu.memory_space<vmem>>, vector<4x16xf32>
    %cst_283 = arith.constant dense<0.000000e+00> : vector<4x128xf32>
    %747 = tpu.matmul %746, %745, %cst_283 {dimension_numbers = #tpu.dot_dimension_numbers<[1], [0], [0], [1], [0, 0, 1, 1], [], []>} : vector<4x16xf32>, vector<16x128xf32>, vector<4x128xf32> -> vector<4x128xf32>
    %cst_284 = arith.constant 0.000000e+00 : f32
    %748 = vector.broadcast %cst_284 : f32 to vector<4x128xf32>
    %749 = arith.addf %748, %743 : vector<4x128xf32>
    %750 = arith.addf %749, %747 : vector<4x128xf32>
    %751 = arith.subf %1, %750 : vector<4x128xf32>
    %752 = vector.extract_strided_slice %739 {offsets = [0, 0], sizes = [1, 1], strides = [1, 1]} : vector<2x1xf32> to vector<1x1xf32>
    %753 = vector.broadcast %752 : vector<1x1xf32> to vector<4x128xf32>
    %754 = arith.mulf %753, %751 : vector<4x128xf32>
    %755 = arith.addf %743, %754 : vector<4x128xf32>
    %756 = vector.extract_strided_slice %739 {offsets = [1, 0], sizes = [1, 1], strides = [1, 1]} : vector<2x1xf32> to vector<1x1xf32>
    %757 = vector.broadcast %756 : vector<1x1xf32> to vector<4x128xf32>
    %758 = arith.mulf %757, %751 : vector<4x128xf32>
    %759 = arith.addf %747, %758 : vector<4x128xf32>
    %760 = tpu.concatenate %755, %759 in 0 : vector<4x128xf32>, vector<4x128xf32> -> vector<8x128xf32>
    %c0_285 = arith.constant 0 : index
    %c0_286 = arith.constant 0 : index
    %c0_287 = arith.constant 0 : index
    %761 = vector.load %arg22[%c0_285, %c0_286, %c0_287] : memref<1x8x128xf32, #tpu.memory_space<vmem>>, vector<1x8x128xf32>
    %762 = vector.shape_cast %761 : vector<1x8x128xf32> to vector<8x128xf32>
    %763 = vector.shape_cast %760 : vector<8x128xf32> to vector<1x8x128xf32>
    tpu.vector_store %arg22[%c0_285, %c0_286, %c0_287], %763 {strides = array<i32>} : memref<1x8x128xf32, #tpu.memory_space<vmem>>, vector<1x8x128xf32>,
    return
  }
  func.func @transform_0(%arg0: i32) -> (i32, i32, i32) {
    %c0_i32 = arith.constant 0 : i32
    %c0_i32_0 = arith.constant 0 : i32
    %c0_i32_1 = arith.constant 0 : i32
    return %arg0, %c0_i32, %c0_i32_0 : i32, i32, i32
  }
  func.func @transform_1(%arg0: i32) -> (i32, i32) {
    %c0_i32 = arith.constant 0 : i32
    %c0_i32_0 = arith.constant 0 : i32
    %c0_i32_1 = arith.constant 0 : i32
    return %c0_i32, %c0_i32_0 : i32, i32
  }
  func.func @transform_2(%arg0: i32) -> (i32, i32) {
    %c0_i32 = arith.constant 0 : i32
    %c0_i32_0 = arith.constant 0 : i32
    %c0_i32_1 = arith.constant 0 : i32
    return %c0_i32, %c0_i32_0 : i32, i32
  }
  func.func @transform_3(%arg0: i32) -> (i32, i32) {
    %c0_i32 = arith.constant 0 : i32
    %c0_i32_0 = arith.constant 0 : i32
    %c0_i32_1 = arith.constant 0 : i32
    return %c0_i32, %c0_i32_0 : i32, i32
  }
  func.func @transform_4(%arg0: i32) -> (i32, i32) {
    %c0_i32 = arith.constant 0 : i32
    %c0_i32_0 = arith.constant 0 : i32
    %c0_i32_1 = arith.constant 0 : i32
    return %c0_i32, %c0_i32_0 : i32, i32
  }
  func.func @transform_5(%arg0: i32) -> (i32, i32) {
    %c0_i32 = arith.constant 0 : i32
    %c0_i32_0 = arith.constant 0 : i32
    %c0_i32_1 = arith.constant 0 : i32
    return %c0_i32, %c0_i32_0 : i32, i32
  }
  func.func @transform_6(%arg0: i32) -> (i32, i32, i32) {
    %c0_i32 = arith.constant 0 : i32
    %c0_i32_0 = arith.constant 0 : i32
    %c0_i32_1 = arith.constant 0 : i32
    %c0_i32_2 = arith.constant 0 : i32
    return %c0_i32, %c0_i32_0, %c0_i32_1 : i32, i32, i32
  }
  func.func @transform_7(%arg0: i32) -> (i32, i32, i32) {
    %c0_i32 = arith.constant 0 : i32
    %c0_i32_0 = arith.constant 0 : i32
    %c0_i32_1 = arith.constant 0 : i32
    %c0_i32_2 = arith.constant 0 : i32
    return %c0_i32, %c0_i32_0, %c0_i32_1 : i32, i32, i32
  }
  func.func @transform_8(%arg0: i32) -> (i32, i32, i32) {
    %c0_i32 = arith.constant 0 : i32
    %c0_i32_0 = arith.constant 0 : i32
    %c0_i32_1 = arith.constant 0 : i32
    %c0_i32_2 = arith.constant 0 : i32
    return %c0_i32, %c0_i32_0, %c0_i32_1 : i32, i32, i32
  }
  func.func @transform_9(%arg0: i32) -> (i32, i32, i32) {
    %c0_i32 = arith.constant 0 : i32
    %c0_i32_0 = arith.constant 0 : i32
    %c0_i32_1 = arith.constant 0 : i32
    %c0_i32_2 = arith.constant 0 : i32
    return %c0_i32, %c0_i32_0, %c0_i32_1 : i32, i32, i32
  }
  func.func @transform_10(%arg0: i32) -> (i32, i32, i32) {
    %c0_i32 = arith.constant 0 : i32
    %c0_i32_0 = arith.constant 0 : i32
    %c0_i32_1 = arith.constant 0 : i32
    %c0_i32_2 = arith.constant 0 : i32
    return %c0_i32, %c0_i32_0, %c0_i32_1 : i32, i32, i32
  }
  func.func @transform_11(%arg0: i32) -> (i32, i32, i32) {
    %c0_i32 = arith.constant 0 : i32
    %c0_i32_0 = arith.constant 0 : i32
    %c0_i32_1 = arith.constant 0 : i32
    %c0_i32_2 = arith.constant 0 : i32
    return %c0_i32, %c0_i32_0, %c0_i32_1 : i32, i32, i32
  }
  func.func @transform_12(%arg0: i32) -> (i32, i32, i32) {
    %c0_i32 = arith.constant 0 : i32
    %c0_i32_0 = arith.constant 0 : i32
    %c0_i32_1 = arith.constant 0 : i32
    %c0_i32_2 = arith.constant 0 : i32
    return %c0_i32, %c0_i32_0, %c0_i32_1 : i32, i32, i32
  }
  func.func @transform_13(%arg0: i32) -> (i32, i32) {
    %c0_i32 = arith.constant 0 : i32
    %c0_i32_0 = arith.constant 0 : i32
    %c0_i32_1 = arith.constant 0 : i32
    return %c0_i32, %c0_i32_0 : i32, i32
  }
  func.func @transform_14(%arg0: i32) -> (i32, i32) {
    %c0_i32 = arith.constant 0 : i32
    %c0_i32_0 = arith.constant 0 : i32
    %c0_i32_1 = arith.constant 0 : i32
    return %c0_i32, %c0_i32_0 : i32, i32
  }
  func.func @transform_15(%arg0: i32) -> (i32, i32) {
    %c0_i32 = arith.constant 0 : i32
    %c0_i32_0 = arith.constant 0 : i32
    %c0_i32_1 = arith.constant 0 : i32
    return %c0_i32, %c0_i32_0 : i32, i32
  }
  func.func @transform_16(%arg0: i32) -> (i32, i32) {
    %c0_i32 = arith.constant 0 : i32
    %c0_i32_0 = arith.constant 0 : i32
    %c0_i32_1 = arith.constant 0 : i32
    return %c0_i32, %c0_i32_0 : i32, i32
  }
  func.func @transform_17(%arg0: i32) -> (i32, i32) {
    %c0_i32 = arith.constant 0 : i32
    %c0_i32_0 = arith.constant 0 : i32
    %c0_i32_1 = arith.constant 0 : i32
    return %c0_i32, %c0_i32_0 : i32, i32
  }
  func.func @transform_18(%arg0: i32) -> i32 {
    %c0_i32 = arith.constant 0 : i32
    %c0_i32_0 = arith.constant 0 : i32
    return %c0_i32 : i32
  }
  func.func @transform_19(%arg0: i32) -> (i32, i32) {
    %c0_i32 = arith.constant 0 : i32
    %c0_i32_0 = arith.constant 0 : i32
    %c0_i32_1 = arith.constant 0 : i32
    return %c0_i32, %c0_i32_0 : i32, i32
  }
  func.func @transform_20(%arg0: i32) -> (i32, i32, i32) {
    %c0_i32 = arith.constant 0 : i32
    %c0_i32_0 = arith.constant 0 : i32
    %c0_i32_1 = arith.constant 0 : i32
    return %arg0, %c0_i32, %c0_i32_0 : i32, i32, i32
  }
  func.func @transform_21(%arg0: i32) -> (i32, i32, i32) {
    %c0_i32 = arith.constant 0 : i32
    %c0_i32_0 = arith.constant 0 : i32
    %c0_i32_1 = arith.constant 0 : i32
    return %arg0, %c0_i32, %c0_i32_0 : i32, i32, i32
  }
  func.func @transform_22(%arg0: i32) -> (i32, i32, i32) {
    %c0_i32 = arith.constant 0 : i32
    %c0_i32_0 = arith.constant 0 : i32
    %c0_i32_1 = arith.constant 0 : i32
    return %arg0, %c0_i32, %c0_i32_0 : i32, i32, i32
  }
}

</mosaic_0001>

<bundles_post_ra>
// kernel: tdconvnetpp_forward.1
= control target key start
LH: loop header
LB: loop body
LE: loop exit
PB: predicated region body
PF: predicated region fallthrough
CT: control target
= control target key end

     0   :  { %s7740_s0 = inlined_call_operand.vmem [shape: f32[2,4,128], index: 0, kind: input, shape index: {}]   ;;  %s7741_s1 = inlined_call_operand.vmem [shape: f32[16,4], index: 1, kind: input, shape index: {}]   ;;  %s7742_s2 = inlined_call_operand.vmem [shape: f32[4,16], index: 2, kind: input, shape index: {}]   ;;  %s7743_s3 = inlined_call_operand.vmem [shape: f32[16,2], index: 3, kind: input, shape index: {}]   ;;  %s7744_s4 = inlined_call_operand.vmem [shape: f32[16,16], index: 4, kind: input, shape index: {}]   ;;  %s7745_s5 = inlined_call_operand.vmem [shape: f32[16,1], index: 5, kind: input, shape index: {}]   ;;  %s7746_s6 = inlined_call_operand.vmem [shape: f32[6,32,16], index: 6, kind: input, shape index: {}]   ;;  %s7747_s7 = inlined_call_operand.vmem [shape: f32[6,32,3], index: 7, kind: input, shape index: {}]   ;;  %s7748_s8 = inlined_call_operand.vmem [shape: f32[6,32,32], index: 8, kind: input, shape index: {}]   ;;  %s7749_s9 = inlined_call_operand.vmem [shape: f32[6,32,6], index: 9, kind: input, shape index: {}]   ;;  %s7750_s10 = inlined_call_operand.vmem [shape: f32[6,32,1], index: 10, kind: input, shape index: {}]   ;;  %s7751_s11 = inlined_call_operand.vmem [shape: f32[1,16,16], index: 11, kind: input, shape index: {}]   ;;  %s7752_s12 = inlined_call_operand.vmem [shape: f32[1,16,1], index: 12, kind: input, shape index: {}]   ;;  %s7753_s13 = inlined_call_operand.vmem [shape: f32[32,16], index: 13, kind: input, shape index: {}]   ;;  %s7754_s14 = inlined_call_operand.vmem [shape: f32[32,1], index: 14, kind: input, shape index: {}]   ;;  %s7755_s15 = inlined_call_operand.vmem [shape: f32[2,16], index: 15, kind: input, shape index: {}]   ;;  %s7756_s16 = inlined_call_operand.vmem [shape: f32[2,1], index: 16, kind: input, shape index: {}]   ;;  %s7757_s17 = inlined_call_operand.vmem [shape: f32[6,2], index: 17, kind: input, shape index: {}]   ;;  %s7758_s18 = inlined_call_operand.<no memory space> [shape: f32[1], index: 18, kind: input, shape index: {}]   ;;  %s7759_s19 = inlined_call_operand.vmem [shape: f32[2,3], index: 19, kind: input, shape index: {}]   ;;  %s7760_s20 = inlined_call_operand.hbm [shape: f32[2,32,128], index: 20, kind: output, shape index: {0}]   ;;  %s7761_s21 = inlined_call_operand.vmem [shape: f32[2,8,128], index: 21, kind: output, shape index: {1}]   ;;  %s7762_s22 = inlined_call_operand.vmem [shape: f32[2,2,1], index: 22, kind: output, shape index: {2}]  }
   0x1   :  { %7790 = sst [smem:[#allocation16_spill]] %s7740_s0 }
   0x2   :  { %7791 = sst [smem:[#allocation17_spill]] %s7741_s1 }
   0x3   :  { %7792 = sst [smem:[#allocation18_spill]] %s7742_s2 }
   0x4   :  { %7793 = sst [smem:[#allocation19_spill]] %s7743_s3 }
   0x5   :  { %7794 = sst [smem:[#allocation20_spill]] %s7744_s4 }
   0x6   :  { %7795 = sst [smem:[#allocation21_spill]] %s7745_s5 }
   0x7   :  { %7796 = sst [smem:[#allocation22_spill]] %s7746_s6 }
   0x8   :  { %7797 = sst [smem:[#allocation23_spill]] %s7747_s7 }
   0x9   :  { %7798 = sst [smem:[#allocation24_spill]] %s7751_s11 }
   0xa   :  { %7799 = sst [smem:[#allocation25_spill]] %s7757_s17 }
   0xb   :  { %7800 = sst [smem:[#allocation26_spill]] %s7759_s19 }
   0xc   :  { %28 = sst [smem:[#allocation2]] %s7758_s18 }
   0xd   :  { %29 = vsyncpa [#allocation5], 0 }
   0xe   :  { %30 = vsyncpa [#allocation7], 0 }
   0xf   :  { %31 = vsyncpa [#allocation4], 0 }
  0x10   :  { %33 = vsyncpa [#allocation4 + $0x1], 0  ;;  %s6296_s29 = smov 0   ;;  %s6298_s30 = smov 0  }
  0x11   :  { %s6300_s4 = smov 0   ;;  %s6302_s0 = smov 0  }
  0x12 LB: > { %7801 = sst [smem:[#allocation12_spill]] %s6152_s4  ;;  %s6317_s18 = sadd.s32 4294967295, %s6156_s0   ;;  %s6156_s0 = sphi %s6302_s0, %s7835_s0   ;;  %s6152_s4 = sphi %s6300_s4, %s7837_s4   ;;  %s6148_s30 = sphi %s6298_s30, %s7839_s30   ;;  %s6144_s29 = sphi %s6296_s29, %s7838_s29  }
  0x13   : > { %s5118_s23 = sadd.s32 4294967294, %s6156_s0   ;;  %s6321_s1 = sadd.s32 1, %s6156_s0  }
  0x14   : > { %7802 = sst [smem:[#allocation13_spill]] %s6321_s1  ;;  %s471_s5 = sadd.s32 1, %s6152_s4 }
  0x15   : > { %s468_s24 = ssub.s32 %s6156_s0, %s6321_s1  ;;  %p481_p0 = scmp.ne.s32.totalorder %s6152_s4, %s6148_s30 }
  0x16   : > { %p469_p1 = scmp.eq.s32.totalorder %s468_s24, 0  ;;  %p482_p2 = scmp.eq.s32.totalorder %s6317_s18, 1 }
  0x17   : > { %p487_p3 = scmp.ne.s32.totalorder %s6148_s30, %s6144_s29  ;;  %p488_p4 = scmp.eq.s32.totalorder %s5118_s23, 1 }
  0x18   : > { %s6332_s6 = scalar_select %p469_p1, %s6152_s4, %s471_s5  }
  0x19   : > { %p6334_p5 = por %p482_p2, %p481_p0  ;;  %p6338_p6 = por %p488_p4, %p487_p3 }
  0x1a   : > { %7803 = sst [smem:[#allocation14_spill]] %s6332_s6  ;;  %p5119_p7 = scmp.ge.s32.totalorder %s6156_s0, 1 }
  0x1b   : > { %s7804_s25 = scalar_select %p6334_p5, 1, 0 }
  0x1c   : > { %s7805_s26 = scalar_select %p6338_p6, 1, 0 }
  0x1d   : > { %p547_p8 = scmp.lt.s32.totalorder %s6156_s0, 3  ;;  %p7769_p9 = scmp.eq.s32.totalorder %s6317_s18, 0 }
  0x1e   : > { %7806 = sst [smem:[#allocation15_spill]] %s7805_s26  ;;  %s7808_s17 = sld [smem:[#allocation25_spill]] }
  0x1f   : > { %p6345_p10 = pnand %p5119_p7, %p547_p8  ;;  %s7809_s19 = sld [smem:[#allocation26_spill]] }
  0x21   : > { %s7807_s2 = scalar_select %p6345_p10, 1, 0 }
  0x22   : > { %p5746_p11 = pneg %p6345_p10 }
  0x24   : > { %s608_s28 = sshll.u32 %s7808_s17, 4  ;;  %p6359_p12 = pnand %p7769_p9, %p5746_p11  ;;  %s609_s28 = int_to_ptr.vmem [resolvable:$true] %s608_s28 }
  0x25   : > { %s622_s24 = sshll.u32 %s7809_s19, 4  ;;  %s6056_s4 = scalar_lea.vmem %s609_s28, 128  ;;  %s623_s24 = int_to_ptr.vmem [resolvable:$true] %s622_s24 }
  0x26   : > { %p6057_p13 = scmp.ne.s32.totalorder %s609_s28, %s6056_s4  ;;  %p6058_p0 = pneg %p6359_p12 }
  0x27   : > { %p6064_p3 = scmp.lt.s32.totalorder %s609_s28, %s609_s28  ;;  %p6065_p4 = scmp.lt.s32.totalorder %s6056_s4, %s6056_s4 }
  0x28   : > { %p6059_p1 = pnand %p6058_p0, %p6057_p13 }
  0x29   : > { %p6066_p7 = por %p6065_p4, %p6064_p3 }
  0x2a   : > { %p6060_p2 = pneg %p6059_p1 }
  0x2c   : > { %p6067_p8 = pnand %p6066_p7, %p6060_p2 }
  0x2e   : > { %6070 = shalt.err (!%p6067_p8)
}
  0x2f   : > { %s6158_s27 = smov [#allocation3]   ;;  %s6071_s3 = scalar_lea.vmem %s623_s24, 32 }
  0x30   : > { %5749 = dma.vmem_to_smem (!%p6359_p12), %s609_s28, 128, %s6158_s27, [#allocation5]  }
  0x31   : > { %p6072_p11 = scmp.ne.s32.totalorder %s623_s24, %s6071_s3  ;;  %p6079_p5 = scmp.lt.s32.totalorder %s623_s24, %s623_s24 }
  0x32   : > { %p6080_p10 = scmp.lt.s32.totalorder %s6071_s3, %s6071_s3 }
  0x33   : > { %p6074_p9 = pnand %p6072_p11, %p6058_p0 }
  0x34   : > { %p6081_p13 = por %p6080_p10, %p6079_p5 }
  0x35   : > { %p6075_p6 = pneg %p6074_p9 }
  0x37   : > { %p6082_p1 = pnand %p6081_p13, %p6075_p6 }
  0x39   : > { %6085 = shalt.err (!%p6082_p1)
}
  0x3a   : > { %s6159_s23 = smov [#allocation6]   ;;  %p7811_p2 = scmp.ne.s32.totalorder %s7807_s2, 0 }
  0x3b   : > { %5752 = dma.vmem_to_smem (!%p6359_p12), %s623_s24, 32, %s6159_s23, [#allocation7]  }
  0x3c   : > { %642 = sbr.rel (%p7811_p2) target bundleno = 9014 (0x2336), region = 100  ;;  %p7812_p3 = scmp.eq.s32.totalorder (!%p7811_p2), %s6317_s18, 0 }
  0x43   : > { %6131 = dma.done.wait (%p7812_p3), [#allocation5], 128   ;;  %p7813_p4 = pmov %p7812_p3 }
  0x44   : > { %p7814_p9 = pmov %p7812_p3 }
  0x45   : > { %6133 = vsyncadd (%p7813_p4), [#allocation5], 4294967168 }
  0x46   : > { %6135 = dma.done.wait (%p7814_p9), [#allocation7], 32   ;;  %p7815_p5 = pmov %p7812_p3 }
  0x48   : > { %6137 = vsyncadd (%p7815_p5), [#allocation7], 4294967264 }
  0x49   : > { %652 = sfence }
  0x4a   : > { %p716_p6 = scmp.lt.s32.totalorder %s6317_s18, 1  ;;  %s7816_s2 = sld [smem:[#allocation17_spill]]  ;;  %vm739_vm0 = vcmask 31744   ;;  %vm746_vm1 = vcmask 1043456   ;;  %v6160_v4 = vmov 0   ;;  %v6161_v6 = vmov 1  }
  0x4b   : > { %s7817_s3 = sld [smem:[#allocation16_spill]]  ;;  %s7818_s1 = sld [smem:[#allocation19_spill]]  ;;  %5814 = vset.pattern.permute.xlu1 %v6160_v4  ;;  %5813 = vset.pattern.permute.xlu0 %v6160_v4  ;;  %v6416_v9 = vld [vmem:[%s7749_s9 + $0x18] sm:$0xff]  ;;  %vm886_vm2 = vcmask 130048   ;;  %v6436_v21 = vld [vmem:[%s7749_s9] sm:$0xff]  ;;  %v6442_v22 = vld [vmem:[%s7749_s9 + $0x8] sm:$0xff] }
  0x4c   : > { %s6384_s28 = scalar_select %p716_p6, %s6317_s18, 1  ;;  %v6448_v23 = vld [vmem:[%s7749_s9 + $0x10] sm:$0xff]  ;;  %vm1441_vm13 = vcmask 261120  }
  0x4d   : > { %s7819_s4 = sld [smem:[#allocation20_spill]]  ;;  %s7821_s17 = sld [smem:[#allocation21_spill]] }
  0x4e   : > { %s5127_s5 = sshll.u32 %s6384_s28, 2  ;;  %s7822_s19 = sld [smem:[#allocation22_spill]] }
  0x4f   : > { %s7823_s7 = sld [smem:[#allocation23_spill]]  ;;  %s7779_s24 = smov 1  }
  0x50   : > { %v737_v0 = vld [vmem:[%s7816_s2] sm:$0xff]  ;;  %v738_v2 = vld [vmem:[%s7816_s2 + $0x8] sm:$0xff]  ;;  %s1097_s2 = sld [smem:[#allocation3]]  ;;  %s7777_s27 = smov 127  }
  0x51   : > { %5425 = vmatprep.mubr.msk.f32.mxu0 %vm739_vm0, %v737_v0  ;;  %s6390_s23 = scalar_lea.vmem %s7817_s3, %s5127_s5  ;;  %v826_v3 = vld [vmem:[%s7818_s1 + $0x8] sm:$0xff]  ;;  %v825_v5 = vld [vmem:[%s7818_s1] sm:$0xff]  ;;  %s5139_s3 = sld [smem:[#allocation3 + $0x1]] }
  0x52   : > { %v728_v1 = vld [vmem:[%s6390_s23] sm:$0xf]  ;;  %857 = vperm.xlu1 %5814, %v826_v3   ;;  %s1541_s1 = sld [smem:[#allocation6]]  ;;  %s7781_s26 = smov 126  }
  0x53   : > { %5423 = vmatprep.subr.msk.mxu0 %vm746_vm1, %v728_v1  ;;  %s7820_s6 = smov %s7819_s4  ;;  %v872_v18 = vld [vmem:[%s7819_s4] sm:$0xff]  ;;  %v875_v20 = vld [vmem:[%s7821_s17 + $0x8] sm:$0xff]  ;;  %s5156_s5 = sld [smem:[#allocation3 + $0x80]] }
  0x54   : > { %5424 = vmatpush3.msk.msra.mxu0 %vm746_vm1, %v728_v1  ;;  %5432 = vmatprep.mubr.msk.f32.mxu1 %vm886_vm2, %v872_v18  ;;  %v874_v19 = vld [vmem:[%s7821_s17] sm:$0xff]  ;;  %v873_v43 = vld [vmem:[%s7820_s6 + $0x8] sm:$0xff]  ;;  %v974_v53 = vld [vmem:[%s7822_s19 + $0x10] sm:$0xff]  ;;  %s7786_s4 = smov 124   ;;  %s7824_s11 = sld [smem:[#allocation24_spill]] }
  0x55   : > { %5426 = vmatmul.mubr.msk.f32.vlgmr.msra.gmra.mrb[0].mxu0 %vm739_vm0, %v738_v2  ;;  %v972_v44 = vld [vmem:[%s7822_s19] sm:$0xff]  ;;  %v973_v52 = vld [vmem:[%s7822_s19 + $0x8] sm:$0xff]  ;;  %v975_v54 = vld [vmem:[%s7822_s19 + $0x18] sm:$0xff]  ;;  %s5269_s6 = sld [smem:[#allocation6 + $0x81]]  ;;  %p7832_p12 = scmp.ne.s32.totalorder %s7804_s25, 0 }
  0x56   : > { %5815 = vset.pattern.permute.xlu1 %v6161_v6  ;;  %5439 = vmatprep.mubr.msk.f32.mxu0 %vm886_vm2, %v972_v44  ;;  %v1098_v58 = vstv %s1097_s2 }
  0x57   : > { %863 = vperm.xlu1 %5815, %v825_v5  }
  0xd1   : > { %v858_v24 = vpop.permute.xlu1 %857 }
  0xd6   : > { %v864_v25 = vpop.permute.xlu1 %863 }
 0x128   : > { %v6407_v7 = vpop.f32.mrb[0].mxu0 }
 0x129   : > { %v6409_v8 = vpop.f32.mrb[1].mxu0 }
 0x12a   : > { %827 = vadd.xlane.f32.xlu0 %v6409_v8 }
 0x12e   : > { %829 = vadd.xlane.f32.xlu0 %v6407_v7 }
 0x144   : > { %852 = vperm.xlu0 %5813, %v825_v5  }
 0x148   : > { %993 = vperm.xlu0 %5813, %v6416_v9  }
 0x14c   : > { %5817 = vset.pattern.permute.xlu0 %v6161_v6 }
 0x1b7   : > { %v828_v10 = vpop.xlane.xlu0 %827 }
 0x1b8   : > { %v832_v12 = vmul.f32 0.0078125, %v828_v10 }
 0x1ba   : > { %v834_v16 = vsub.f32 %v6409_v8, %v832_v12 }
 0x1bb   : > { %v830_v11 = vpop.xlane.xlu0 %829 }
 0x1bc   : > { %v833_v13 = vmul.f32 0.0078125, %v830_v11  ;;  %v836_v17 = vmul.f32 %v834_v16, %v834_v16 }
 0x1be   : > { %v835_v14 = vsub.f32 %v6407_v7, %v833_v13 }
 0x1c0   : > { %v837_v15 = vmul.f32 %v835_v14, %v835_v14 }
 0x1c2   : > { %840 = vadd.xlane.f32.xlu1 %v837_v15 }
 0x1c3   : > { %v853_v37 = vpop.permute.xlu0 %852 }
 0x1c6   : > { %838 = vadd.xlane.f32.xlu1 %v836_v17 }
 0x1c7   : > { %v994_v63 = vpop.permute.xlu0 %993 }
 0x1d7   : > { %867 = vperm.xlu1 %5815, %v826_v3  }
 0x1db   : > { %5816 = vset.pattern.permute.xlu1 %v6160_v4 }
 0x1dc   : > { %878 = vperm.xlu1 %5816, %v874_v19  }
 0x1e0   : > { %883 = vperm.xlu1 %5816, %v875_v20  }
 0x1e4   : > { %978 = vperm.xlu1 %5816, %v6436_v21  }
 0x1e8   : > { %983 = vperm.xlu1 %5816, %v6442_v22  }
 0x1ec   : > { %988 = vperm.xlu1 %5816, %v6448_v23  }
 0x1f0   : > { %5818 = vset.pattern.permute.xlu1 %v6161_v6 }
 0x24f   : > { %v841_v26 = vpop.xlane.xlu1 %840 }
 0x250   : > { %v843_v27 = vmul.f32 0.0078125, %v841_v26 }
 0x252   : > { %v845_v28 = vadd.f32 1e-08, %v843_v27 }
 0x253   : > { %v839_v29 = vpop.xlane.xlu1 %838 }
 0x254   : > { %5949 = vrsqrt.f32 %v845_v28  ;;  %v842_v30 = vmul.f32 0.0078125, %v839_v29 }
 0x256   : > { %v844_v31 = vadd.f32 1e-08, %v842_v30 }
 0x257   : > { %v868_v39 = vpop.permute.xlu1 %867 }
 0x258   : > { %5951 = vrsqrt.f32 %v844_v31 }
 0x25b   : > { %v879_v45 = vpop.permute.xlu1 %878 }
 0x25e   : > { %v5950_v32 = vpop.eup %5949 }
 0x25f   : > { %v849_v33 = vmul.f32 %v5950_v32, %v835_v14  ;;  %v884_v46 = vpop.permute.xlu1 %883 }
 0x261   : > { %v861_v35 = vmul.f32 %v858_v24, %v849_v33 }
 0x262   : > { %v5952_v34 = vpop.eup %5951 }
 0x263   : > { %v848_v36 = vmul.f32 %v5952_v34, %v834_v16  ;;  %v871_v40 = vadd.f32 %v868_v39, %v861_v35  ;;  %v979_v55 = vpop.permute.xlu1 %978  ;;  %v1191_v39 = vld [vmem:[%s7823_s7] sm:$0xff] }
 0x265   : > { %v860_v38 = vmul.f32 %v853_v37, %v848_v36  ;;  %v6162_v36 = vmov 2   ;;  %v1192_v37 = vld [vmem:[%s7823_s7 + $0x8] sm:$0xff] }
 0x267   : > { %v870_v41 = vadd.f32 %v864_v25, %v860_v38  ;;  %v984_v56 = vpop.permute.xlu1 %983  ;;  %v1194_v38 = vld [vmem:[%s7823_s7 + $0x18] sm:$0xff] }
 0x269   : > { %v5617_v42 = vpack.c.bf16 %v871_v40, %v870_v41  ;;  %v1193_v40 = vld [vmem:[%s7823_s7 + $0x10] sm:$0xff]  ;;  %v6163_v41 = vmov 3  }
 0x26b   : > { %5618 = vmatprep.subr.bf16.mxu1 %v5617_v42  ;;  %v989_v2 = vpop.permute.xlu1 %988 }
 0x26c   : > { %5620 = vmatpush3.bf16.msra.mxu1 %v5617_v42 }
 0x26f   : > { %5433 = vmatmul.mubr.msk.f32.vlgmr.msra.gmra.mrb[0].mxu1 %vm886_vm2, %v873_v43 }
 0x342   : > { %v5434_v47 = vpop.f32.mrb[0].mxu1 }
 0x343   : > { %v6460_v48 = vadd.f32 %v5434_v47, %v884_v46  ;;  %v959_v49 = vpop.f32.mrb[1].mxu1 }
 0x344   : > { %v6462_v50 = vadd.f32 %v959_v49, %v879_v45 }
 0x346   : > { %v6466_v51 = vpack.c.bf16 %v6460_v48, %v6462_v50 }
 0x348   : > { %5622 = vmatprep.subr.bf16.mxu0 %v6466_v51 }
 0x349   : > { %5624 = vmatpush3.bf16.msra.mxu0 %v6466_v51 }
 0x34c   : > { %5440 = vmatmul.mubr.msk.f32.vlgmr.msra.gmra.mrb[2].mxu0 %vm886_vm2, %v973_v52 }
 0x34d   : > { %5442 = vmatprep.mubr.msk.f32.mxu0 %vm886_vm2, %v974_v53 }
 0x350   : > { %5443 = vmatmul.mubr.msk.f32.gmra.mrb[4].mxu0 %vm886_vm2, %v975_v54 }
 0x41f   : > { %v5441_v57 = vpop.f32.mrb[2].mxu0 }
 0x420   : > { %v1080_v59 = vadd.f32 %v5441_v57, %v984_v56  ;;  %v1074_v60 = vpop.f32.mrb[3].mxu0 }
 0x421   : > { %v1075_v61 = vadd.f32 %v1074_v60, %v979_v55 }
 0x422   : > { %vm1094_vm3 = vcmp.ge.f32.partialorder %v1080_v59, 0.0  ;;  %v1100_v62 = vmul.f32 %v1098_v58, %v1080_v59 }
 0x423   : > { %v5444_v0 = vpop.f32.mrb[4].mxu0  ;;  %vm1093_vm4 = vcmp.ge.f32.partialorder %v1075_v61, 0.0  ;;  %v1099_v1 = vmul.f32 %v1098_v58, %v1075_v61 }
 0x424   : > { %v1090_v3 = vadd.f32 %v5444_v0, %v994_v63  ;;  %v1084_v5 = vpop.f32.mrb[5].mxu0  ;;  %v1104_v10 = vsel %vm1094_vm3, %v1080_v59, %v1100_v62 }
 0x425   : > { %v1085_v11 = vadd.f32 %v1084_v5, %v989_v2  ;;  %1109 = vadd.xlane.f32.xlu0 %v1104_v10  ;;  %v1103_v12 = vsel %vm1093_vm4, %v1075_v61, %v1099_v1 }
 0x426   : > { %1107 = vadd.xlane.f32.xlu1 %v1103_v12  ;;  %vm1096_vm5 = vcmp.ge.f32.partialorder %v1090_v3, 0.0  ;;  %v1102_v13 = vmul.f32 %v1098_v58, %v1090_v3 }
 0x427   : > { %vm1095_vm6 = vcmp.ge.f32.partialorder %v1085_v11, 0.0  ;;  %v1101_v14 = vmul.f32 %v1098_v58, %v1085_v11 }
 0x428   : > { %v1106_v15 = vsel %vm1096_vm5, %v1090_v3, %v1102_v13 }
 0x429   : > { %v1105_v16 = vsel %vm1095_vm6, %v1085_v11, %v1101_v14 }
 0x42a   : > { %1111 = vadd.xlane.f32.xlu0 %v1105_v16  ;;  %1113 = vadd.xlane.f32.xlu1 %v1106_v15 }
 0x4b2   : > { %v1110_v17 = vpop.xlane.xlu0 %1109 }
 0x4b3   : > { %v1116_v18 = vmul.f32 0.0078125, %v1110_v17  ;;  %v1108_v19 = vpop.xlane.xlu1 %1107 }
 0x4b4   : > { %v1115_v20 = vmul.f32 0.0078125, %v1108_v19 }
 0x4b5   : > { %v6482_v24 = vsub.f32 %v1104_v10, %v1116_v18 }
 0x4b6   : > { %v6484_v25 = vsub.f32 %v1103_v12, %v1115_v20 }
 0x4b7   : > { %v1114_v26 = vpop.xlane.xlu1 %1113  ;;  %v1112_v27 = vpop.xlane.xlu0 %1111  ;;  %v1124_v28 = vmul.f32 %v6482_v24, %v6482_v24 }
 0x4b8   : > { %v1118_v29 = vmul.f32 0.0078125, %v1114_v26  ;;  %v1117_v30 = vmul.f32 0.0078125, %v1112_v27  ;;  %v1123_v31 = vmul.f32 %v6484_v25, %v6484_v25 }
 0x4b9   : > { %1129 = vadd.xlane.f32.xlu1 %v1124_v28 }
 0x4ba   : > { %1127 = vadd.xlane.f32.xlu0 %v1123_v31  ;;  %v6490_v32 = vsub.f32 %v1106_v15, %v1118_v29  ;;  %v6492_v33 = vsub.f32 %v1105_v16, %v1117_v30 }
 0x4bc   : > { %v1126_v34 = vmul.f32 %v6490_v32, %v6490_v32  ;;  %v1125_v35 = vmul.f32 %v6492_v33, %v6492_v33 }
 0x4be   : > { %1133 = vadd.xlane.f32.xlu1 %v1126_v34  ;;  %1131 = vadd.xlane.f32.xlu0 %v1125_v35 }
 0x4cf   : > { %1156 = vperm.xlu1 %5818, %v6442_v22  }
 0x4d3   : > { %5819 = vset.pattern.permute.xlu1 %v6162_v36 }
 0x4d4   : > { %1172 = vperm.xlu1 %5819, %v6436_v21   ;;  %1152 = vperm.xlu0 %5817, %v6436_v21  }
 0x4d8   : > { %1176 = vperm.xlu1 %5819, %v6442_v22   ;;  %5823 = vset.pattern.permute.xlu0 %v6160_v4 }
 0x4d9   : > { %1230 = vperm.xlu0 %5823, %v1192_v37  }
 0x4dc   : > { %5820 = vset.pattern.permute.xlu1 %v6161_v6 }
 0x4dd   : > { %1160 = vperm.xlu1 %5820, %v6448_v23   ;;  %1240 = vperm.xlu0 %5823, %v1194_v38  }
 0x4e1   : > { %1164 = vperm.xlu1 %5820, %v6416_v9   ;;  %5827 = vset.pattern.permute.xlu0 %v6162_v36 }
 0x4e2   : > { %1272 = vperm.xlu0 %5827, %v1191_v39  }
 0x4e5   : > { %5821 = vset.pattern.permute.xlu1 %v6162_v36 }
 0x4e6   : > { %1180 = vperm.xlu1 %5821, %v6448_v23   ;;  %1280 = vperm.xlu0 %5827, %v1193_v40  }
 0x4ea   : > { %1184 = vperm.xlu1 %5821, %v6416_v9   ;;  %5831 = vset.pattern.permute.xlu0 %v6163_v41 }
 0x4eb   : > { %1300 = vperm.xlu0 %5831, %v6442_v22  }
 0x4ee   : > { %5822 = vset.pattern.permute.xlu1 %v6160_v4 }
 0x4ef   : > { %1225 = vperm.xlu1 %5822, %v1191_v39   ;;  %1304 = vperm.xlu0 %5831, %v6448_v23  }
 0x4f3   : > { %5824 = vset.pattern.permute.xlu1 %v6161_v6 }
 0x4f4   : > { %1248 = vperm.xlu1 %5824, %v1191_v39  }
 0x4f8   : > { %1252 = vperm.xlu1 %5824, %v1192_v37  }
 0x4fc   : > { %5825 = vset.pattern.permute.xlu1 %v6162_v36 }
 0x4fd   : > { %1276 = vperm.xlu1 %5825, %v1192_v37  }
 0x501   : > { %5826 = vset.pattern.permute.xlu1 %v6160_v4 }
 0x502   : > { %1235 = vperm.xlu1 %5826, %v1193_v40  }
 0x506   : > { %5828 = vset.pattern.permute.xlu1 %v6161_v6 }
 0x507   : > { %1256 = vperm.xlu1 %5828, %v1193_v40   ;;  %v729_v40 = vlaneseq }
 0x50b   : > { %1260 = vperm.xlu1 %5828, %v1194_v38  }
 0x50f   : > { %5829 = vset.pattern.permute.xlu1 %v6162_v36 }
 0x510   : > { %1284 = vperm.xlu1 %5829, %v1194_v38  }
 0x514   : > { %5830 = vset.pattern.permute.xlu1 %v6163_v41 }
 0x515   : > { %1296 = vperm.xlu1 %5830, %v6436_v21  }
 0x519   : > { %1308 = vperm.xlu1 %5830, %v6416_v9  }
 0x546   : > { %v1130_v42 = vpop.xlane.xlu1 %1129 }
 0x547   : > { %v1136_v43 = vmul.f32 0.0078125, %v1130_v42  ;;  %v1128_v44 = vpop.xlane.xlu0 %1127 }
 0x548   : > { %v1135_v45 = vmul.f32 0.0078125, %v1128_v44 }
 0x549   : > { %v1140_v46 = vadd.f32 1e-08, %v1136_v43  ;;  %v6551_v43 = vand.u32 127, %v729_v40 }
 0x54a   : > { %v1139_v47 = vadd.f32 1e-08, %v1135_v45 }
 0x54b   : > { %5953 = vrsqrt.f32 %v1140_v46  ;;  %v1134_v49 = vpop.xlane.xlu1 %1133  ;;  %v1132_v52 = vpop.xlane.xlu0 %1131  ;;  %vm731_vm7 = vcmp.ge.s32.totalorder %v6551_v43, 1  ;;  %vm734_vm8 = vcmp.lt.s32.totalorder %v6551_v43, 127  ;;  %vm732_vm4 = vcmp.ge.s32.totalorder %v6551_v43, 2 }
 0x54c   : > { %5955 = vrsqrt.f32 %v1139_v47  ;;  %v1137_v53 = vmul.f32 0.0078125, %v1132_v52  ;;  %v1138_v56 = vmul.f32 0.0078125, %v1134_v49  ;;  %vm735_vm5 = vcmp.lt.s32.totalorder %v6551_v43, 126 }
 0x54e   : > { %v1141_v54 = vadd.f32 1e-08, %v1137_v53  ;;  %v1142_v59 = vadd.f32 1e-08, %v1138_v56 }
 0x54f   : > { %v1157_v55 = vpop.permute.xlu1 %1156 }
 0x550   : > { %5957 = vrsqrt.f32 %v1141_v54 }
 0x551   : > { %5959 = vrsqrt.f32 %v1142_v59 }
 0x553   : > { %v1173_v57 = vpop.permute.xlu1 %1172  ;;  %v1153_v62 = vpop.permute.xlu0 %1152 }
 0x555   : > { %v5954_v58 = vpop.eup %5953 }
 0x556   : > { %v5956_v60 = vpop.eup %5955  ;;  %v1148_v61 = vmul.f32 %v5954_v58, %v6482_v24 }
 0x557   : > { %v1177_v63 = vpop.permute.xlu1 %1176  ;;  %v1147_v0 = vmul.f32 %v5956_v60, %v6484_v25 }
 0x558   : > { %v1168_v1 = vmul.f32 %v1157_v55, %v1148_v61  ;;  %v1231_v29 = vpop.permute.xlu0 %1230 }
 0x559   : > { %v1167_v2 = vmul.f32 %v1153_v62, %v1147_v0 }
 0x55a   : > { %v1188_v3 = vadd.f32 %v1177_v63, %v1168_v1  ;;  %v5958_v11 = vpop.eup %5957  ;;  %v1320_v63 = vstv %s5139_s3  ;;  %s5187_s3 = sld [smem:[#allocation3 + $0x100]] }
 0x55b   : > { %v1187_v5 = vadd.f32 %v1173_v57, %v1167_v2  ;;  %v1149_v12 = vmul.f32 %v5958_v11, %v6492_v33  ;;  %v5960_v14 = vpop.eup %5959 }
 0x55c   : > { %1197 = vrot.lane.b32.xlu1 %v1188_v3, %s7779_s24  ;;  %v1161_v10 = vpop.permute.xlu1 %1160  ;;  %v1150_v17 = vmul.f32 %v5960_v14, %v6490_v32  ;;  %v1241_v31 = vpop.permute.xlu0 %1240 }
 0x55d   : > { %1195 = vrot.lane.b32.xlu0 %v1187_v5, %s7779_s24  ;;  %v1169_v15 = vmul.f32 %v1161_v10, %v1149_v12 }
 0x560   : > { %1211 = vrot.lane.b32.xlu1 %v1188_v3, %s7777_s27  ;;  %v1165_v13 = vpop.permute.xlu1 %1164 }
 0x561   : > { %v1170_v19 = vmul.f32 %v1165_v13, %v1150_v17  ;;  %v1273_v33 = vpop.permute.xlu0 %1272 }
 0x564   : > { %1209 = vrot.lane.b32.xlu1 %v1187_v5, %s7777_s27 }
 0x565   : > { %v1181_v16 = vpop.permute.xlu1 %1180  ;;  %v1281_v37 = vpop.permute.xlu0 %1280 }
 0x566   : > { %v1189_v18 = vadd.f32 %v1181_v16, %v1169_v15 }
 0x568   : > { %1199 = vrot.lane.b32.xlu0 %v1189_v18, %s7779_s24 }
 0x569   : > { %v1185_v20 = vpop.permute.xlu1 %1184 }
 0x56a   : > { %v6544_v24 = vadd.f32 %v1185_v20, %v1170_v19  ;;  %v1301_v39 = vpop.permute.xlu0 %1300 }
 0x56c   : > { %1201 = vrot.lane.b32.xlu1 %v6544_v24, %s7779_s24  ;;  %1213 = vrot.lane.b32.xlu0 %v1189_v18, %s7777_s27  ;;  %s5161_s24 = sld [smem:[#allocation3 + $0x81]] }
 0x56e   : > { %v1226_v25 = vpop.permute.xlu1 %1225  ;;  %v1305_v44 = vpop.permute.xlu0 %1304 }
 0x570   : > { %1215 = vrot.lane.b32.xlu1 %v6544_v24, %s7777_s27  ;;  %s5238_s27 = sld [smem:[#allocation6 + $0x80]] }
 0x573   : > { %v1249_v26 = vpop.permute.xlu1 %1248 }
 0x574   : > { %v1263_v59 = vmul.f32 %v1249_v26, %v1187_v5 }
 0x577   : > { %v1253_v27 = vpop.permute.xlu1 %1252 }
 0x578   : > { %v1264_v53 = vmul.f32 %v1253_v27, %v1188_v3 }
 0x57c   : > { %v1277_v28 = vpop.permute.xlu1 %1276 }
 0x581   : > { %v1236_v30 = vpop.permute.xlu1 %1235 }
 0x586   : > { %v1257_v32 = vpop.permute.xlu1 %1256 }
 0x587   : > { %v1265_v5 = vmul.f32 %v1257_v32, %v1189_v18 }
 0x58a   : > { %v1261_v34 = vpop.permute.xlu1 %1260 }
 0x58f   : > { %v1285_v35 = vpop.permute.xlu1 %1284 }
 0x594   : > { %v1297_v38 = vpop.permute.xlu1 %1296 }
 0x598   : > { %v1309_v42 = vpop.permute.xlu1 %1308 }
 0x5ce   : > { %v1198_v45 = vpop.permute.xlu1 %1197 }
 0x5cf   : > { %v1206_v46 = vsel %vm731_vm7, %v1198_v45, 0.0  ;;  %v1196_v47 = vpop.permute.xlu0 %1195 }
 0x5d0   : > { %v1244_v49 = vmul.f32 %v1231_v29, %v1206_v46  ;;  %v1205_v52 = vsel %vm731_vm7, %v1196_v47, 0.0 }
 0x5d1   : > { %v1243_v57 = vmul.f32 %v1226_v25, %v1205_v52  ;;  %v6166_v52 = vmov 4  }
 0x5d2   : > { %v1212_v54 = vpop.permute.xlu1 %1211  ;;  %v1268_v56 = vadd.f32 %v1264_v53, %v1244_v49  ;;  %5833 = vset.pattern.permute.xlu1 %v6166_v52  ;;  %5832 = vset.pattern.permute.xlu0 %v6166_v52 }
 0x5d3   : > { %v1220_v55 = vsel %vm734_vm8, %v1212_v54, 0.0  ;;  %v1267_v0 = vadd.f32 %v1263_v59, %v1243_v57 }
 0x5d4   : > { %v1288_v58 = vmul.f32 %v1277_v28, %v1220_v55 }
 0x5d6   : > { %v1292_v60 = vadd.f32 %v1288_v58, %v1268_v56  ;;  %v1210_v61 = vpop.permute.xlu1 %1209 }
 0x5d7   : > { %v1219_v62 = vsel %vm734_vm8, %v1210_v61, 0.0 }
 0x5d8   : > { %v1287_v1 = vmul.f32 %v1273_v33, %v1219_v62  ;;  %v1312_v2 = vadd.f32 %v1301_v39, %v1292_v60 }
 0x5da   : > { %v1291_v10 = vadd.f32 %v1287_v1, %v1267_v0  ;;  %v1200_v11 = vpop.permute.xlu0 %1199  ;;  %vm1316_vm9 = vcmp.ge.f32.partialorder %v1312_v2, 0.0  ;;  %v1322_v3 = vmul.f32 %v1320_v63, %v1312_v2  ;;  %v6167_v0 = vmov 5   ;;  %v1418_v1 = vld [vmem:[%s7750_s10 + $0x8] sm:$0xff] }
 0x5db   : > { %v1207_v12 = vsel %vm731_vm7, %v1200_v11, 0.0 }
 0x5dc   : > { %v1245_v13 = vmul.f32 %v1236_v30, %v1207_v12  ;;  %v1326_v14 = vsel %vm1316_vm9, %v1312_v2, %v1322_v3  ;;  %v1311_v15 = vadd.f32 %v1297_v38, %v1291_v10  ;;  %v1266_v30 = vmul.f32 %v1261_v34, %v6544_v24  ;;  %v6624_v2 = vld [vmem:[%s7749_s9 + $0x28] sm:$0xff]  ;;  %v6631_v10 = vld [vmem:[%s7749_s9 + $0x38] sm:$0xff] }
 0x5dd   : > { %1331 = vadd.xlane.f32.xlu1 %v1326_v14 }
 0x5de   : > { %v1202_v16 = vpop.permute.xlu1 %1201  ;;  %v1214_v17 = vpop.permute.xlu0 %1213  ;;  %vm1315_vm10 = vcmp.ge.f32.partialorder %v1311_v15, 0.0  ;;  %v1321_v19 = vmul.f32 %v1320_v63, %v1311_v15  ;;  %v1269_v26 = vadd.f32 %v1265_v5, %v1245_v13 }
 0x5df   : > { %v1208_v20 = vsel %vm731_vm7, %v1202_v16, 0.0  ;;  %v1221_v25 = vsel %vm734_vm8, %v1214_v17, 0.0 }
 0x5e0   : > { %v1246_v27 = vmul.f32 %v1241_v31, %v1208_v20  ;;  %v1289_v28 = vmul.f32 %v1281_v37, %v1221_v25  ;;  %v1325_v29 = vsel %vm1315_vm10, %v1311_v15, %v1321_v19 }
 0x5e1   : > { %1329 = vadd.xlane.f32.xlu0 %v1325_v29 }
 0x5e2   : > { %v1293_v33 = vadd.f32 %v1289_v28, %v1269_v26  ;;  %v1216_v38 = vpop.permute.xlu1 %1215  ;;  %v1270_v32 = vadd.f32 %v1266_v30, %v1246_v27 }
 0x5e3   : > { %v1222_v18 = vsel %vm734_vm8, %v1216_v38, 0.0 }
 0x5e4   : > { %v1290_v39 = vmul.f32 %v1285_v35, %v1222_v18  ;;  %v1313_v40 = vadd.f32 %v1305_v44, %v1293_v33 }
 0x5e6   : > { %v1294_v45 = vadd.f32 %v1290_v39, %v1270_v32  ;;  %vm1317_vm11 = vcmp.ge.f32.partialorder %v1313_v40, 0.0  ;;  %v1323_v46 = vmul.f32 %v1320_v63, %v1313_v40 }
 0x5e8   : > { %v1327_v47 = vsel %vm1317_vm11, %v1313_v40, %v1323_v46  ;;  %v1314_v49 = vadd.f32 %v1309_v42, %v1294_v45 }
 0x5e9   : > { %1333 = vadd.xlane.f32.xlu0 %v1327_v47 }
 0x5ea   : > { %vm1318_vm12 = vcmp.ge.f32.partialorder %v1314_v49, 0.0  ;;  %v1324_v31 = vmul.f32 %v1320_v63, %v1314_v49 }
 0x5ec   : > { %v1328_v37 = vsel %vm1318_vm12, %v1314_v49, %v1324_v31 }
 0x5ed   : > { %1335 = vadd.xlane.f32.xlu0 %v1328_v37 }
 0x66a   : > { %v1332_v24 = vpop.xlane.xlu1 %1331 }
 0x66b   : > { %v1338_v34 = vmul.f32 0.0078125, %v1332_v24 }
 0x66d   : > { %v6574_v53 = vsub.f32 %v1326_v14, %v1338_v34 }
 0x66e   : > { %v1330_v35 = vpop.xlane.xlu0 %1329 }
 0x66f   : > { %v1337_v44 = vmul.f32 0.0078125, %v1330_v35  ;;  %v1346_v54 = vmul.f32 %v6574_v53, %v6574_v53 }
 0x671   : > { %1351 = vadd.xlane.f32.xlu1 %v1346_v54  ;;  %v1341_v42 = vsub.f32 %v1325_v29, %v1337_v44 }
 0x673   : > { %v1345_v55 = vmul.f32 %v1341_v42, %v1341_v42 }
 0x675   : > { %1349 = vadd.xlane.f32.xlu0 %v1345_v55 }
 0x676   : > { %v1334_v56 = vpop.xlane.xlu0 %1333 }
 0x677   : > { %v1339_v57 = vmul.f32 0.0078125, %v1334_v56 }
 0x679   : > { %v6578_v58 = vsub.f32 %v1327_v47, %v1339_v57  ;;  %v1414_v57 = vld [vmem:[%s7748_s8 + $0x8] sm:$0xff] }
 0x67a   : > { %v1336_v59 = vpop.xlane.xlu0 %1335 }
 0x67b   : > { %v1340_v60 = vmul.f32 0.0078125, %v1336_v59  ;;  %v1347_v61 = vmul.f32 %v6578_v58, %v6578_v58 }
 0x67d   : > { %1353 = vadd.xlane.f32.xlu0 %v1347_v61  ;;  %v6582_v62 = vsub.f32 %v1328_v37, %v1340_v60  ;;  %v1542_v61 = vstv %s1541_s1  ;;  %s7783_s1 = smov 2  }
 0x67f   : > { %v1348_v63 = vmul.f32 %v6582_v62, %v6582_v62 }
 0x681   : > { %1355 = vadd.xlane.f32.xlu1 %v1348_v63 }
 0x692   : > { %1378 = vperm.xlu1 %5833, %v6442_v22  }
 0x693   : > { %1374 = vperm.xlu0 %5832, %v6436_v21  }
 0x696   : > { %5834 = vset.pattern.permute.xlu1 %v6167_v0 }
 0x697   : > { %1394 = vperm.xlu1 %5834, %v6436_v21   ;;  %5838 = vset.pattern.permute.xlu0 %v6160_v4  ;;  %v1413_v21 = vld [vmem:[%s7748_s8] sm:$0xff] }
 0x698   : > { %5453 = vmatprep.mubr.msk.f32.mxu1 %vm1441_vm13, %v1413_v21  ;;  %1428 = vperm.xlu0 %5838, %v1418_v1  }
 0x69b   : > { %1398 = vperm.xlu1 %5834, %v6442_v22   ;;  %v1417_v22 = vld [vmem:[%s7750_s10] sm:$0xff] }
 0x69f   : > { %5835 = vset.pattern.permute.xlu1 %v6166_v52 }
 0x6a0   : > { %1382 = vperm.xlu1 %5835, %v6448_v23  }
 0x6a4   : > { %1386 = vperm.xlu1 %5835, %v6416_v9  }
 0x6a8   : > { %5836 = vset.pattern.permute.xlu1 %v6167_v0 }
 0x6a9   : > { %1402 = vperm.xlu1 %5836, %v6448_v23   ;;  %v6617_v23 = vld [vmem:[%s7749_s9 + $0x30] sm:$0xff] }
 0x6aa   : > { %1569 = vperm.xlu0 %5838, %v6617_v23  }
 0x6ad   : > { %1406 = vperm.xlu1 %5836, %v6416_v9   ;;  %v6612_v9 = vld [vmem:[%s7749_s9 + $0x20] sm:$0xff] }
 0x6ae   : > { %5840 = vset.pattern.permute.xlu0 %v6161_v6 }
 0x6b1   : > { %5837 = vset.pattern.permute.xlu1 %v6160_v4 }
 0x6b2   : > { %1423 = vperm.xlu1 %5837, %v1417_v22  }
 0x6b6   : > { %1559 = vperm.xlu1 %5837, %v6612_v9  }
 0x6ba   : > { %1564 = vperm.xlu1 %5837, %v6624_v2  }
 0x6be   : > { %1574 = vperm.xlu1 %5837, %v6631_v10  }
 0x6c2   : > { %5839 = vset.pattern.permute.xlu1 %v6161_v6 }
 0x6fe   : > { %v1352_v11 = vpop.xlane.xlu1 %1351 }
 0x6ff   : > { %v1358_v3 = vmul.f32 0.0078125, %v1352_v11 }
 0x701   : > { %v1362_v15 = vadd.f32 1e-08, %v1358_v3 }
 0x702   : > { %v1350_v12 = vpop.xlane.xlu0 %1349 }
 0x703   : > { %v1357_v13 = vmul.f32 0.0078125, %v1350_v12 }
 0x705   : > { %v1361_v14 = vadd.f32 1e-08, %v1357_v13 }
 0x707   : > { %5961 = vrsqrt.f32 %v1361_v14  ;;  %v5149_v14 = vld [vmem:[%s7822_s19 + $0x28] sm:$0xff] }
 0x708   : > { %5963 = vrsqrt.f32 %v1362_v15  ;;  %v5150_v15 = vld [vmem:[%s7822_s19 + $0x30] sm:$0xff] }
 0x70a   : > { %v1354_v16 = vpop.xlane.xlu0 %1353 }
 0x70b   : > { %v1359_v20 = vmul.f32 0.0078125, %v1354_v16 }
 0x70d   : > { %v1363_v30 = vadd.f32 1e-08, %v1359_v20 }
 0x70e   : > { %v1356_v5 = vpop.xlane.xlu1 %1355 }
 0x70f   : > { %v1360_v27 = vmul.f32 0.0078125, %v1356_v5  ;;  %5965 = vrsqrt.f32 %v1363_v30 }
 0x711   : > { %v5962_v17 = vpop.eup %5961  ;;  %v1364_v18 = vadd.f32 1e-08, %v1360_v27 }
 0x712   : > { %v1379_v19 = vpop.permute.xlu1 %1378  ;;  %v1369_v25 = vmul.f32 %v5962_v17, %v1341_v42  ;;  %v5964_v26 = vpop.eup %5963  ;;  %v1679_v17 = vstv %s5156_s5  ;;  %s5174_s5 = sld [smem:[#allocation6 + $0x1]] }
 0x713   : > { %v1375_v28 = vpop.permute.xlu0 %1374  ;;  %v1370_v33 = vmul.f32 %v5964_v26, %v6574_v53  ;;  %5967 = vrsqrt.f32 %v1364_v18 }
 0x714   : > { %v1389_v38 = vmul.f32 %v1375_v28, %v1369_v25 }
 0x715   : > { %v1390_v32 = vmul.f32 %v1379_v19, %v1370_v33 }
 0x716   : > { %v1395_v29 = vpop.permute.xlu1 %1394 }
 0x717   : > { %v1409_v40 = vadd.f32 %v1395_v29, %v1389_v38  ;;  %v1429_v59 = vpop.permute.xlu0 %1428 }
 0x719   : > { %v5966_v31 = vpop.eup %5965 }
 0x71a   : > { %v1399_v39 = vpop.permute.xlu1 %1398  ;;  %v1371_v34 = vmul.f32 %v5966_v31, %v6578_v58  ;;  %v5148_v58 = vld [vmem:[%s7822_s19 + $0x20] sm:$0xff] }
 0x71b   : > { %v1410_v45 = vadd.f32 %v1399_v39, %v1390_v32  ;;  %5463 = vmatprep.mubr.msk.f32.mxu0 %vm886_vm2, %v5148_v58  ;;  %v5157_v58 = vld [vmem:[%s7823_s7 + $0x20] sm:$0xff] }
 0x71d   : > { %v5625_v46 = vpack.c.bf16 %v1410_v45, %v1409_v40  ;;  %v5968_v37 = vpop.eup %5967 }
 0x71e   : > { %v1372_v53 = vmul.f32 %v5968_v37, %v6582_v62 }
 0x71f   : > { %v1383_v47 = vpop.permute.xlu1 %1382  ;;  %5626 = vmatprep.subr.bf16.mxu1 %v5625_v46 }
 0x720   : > { %5628 = vmatpush3.bf16.msra.mxu1 %v5625_v46  ;;  %v1391_v35 = vmul.f32 %v1383_v47, %v1371_v34 }
 0x723   : > { %v1387_v49 = vpop.permute.xlu1 %1386 }
 0x724   : > { %v1392_v44 = vmul.f32 %v1387_v49, %v1372_v53 }
 0x728   : > { %v1403_v24 = vpop.permute.xlu1 %1402 }
 0x729   : > { %v1411_v42 = vadd.f32 %v1403_v24, %v1391_v35  ;;  %v1570_v30 = vpop.permute.xlu0 %1569 }
 0x72c   : > { %v1407_v54 = vpop.permute.xlu1 %1406 }
 0x72d   : > { %v1412_v55 = vadd.f32 %v1407_v54, %v1392_v44 }
 0x72f   : > { %v5629_v56 = vpack.c.bf16 %v1412_v55, %v1411_v42 }
 0x731   : > { %5630 = vmatprep.subr.bf16.mxu1 %v5629_v56  ;;  %v1424_v62 = vpop.permute.xlu1 %1423 }
 0x732   : > { %5632 = vmatpush3.bf16.msra.mxu1 %v5629_v56 }
 0x735   : > { %5454 = vmatmul.mubr.msk.f32.vlgmr.msra.gmra.mrb[2].mxu1 %vm1441_vm13, %v1414_v57 }
 0x808   : > { %v5455_v60 = vpop.f32.mrb[2].mxu1 }
 0x809   : > { %v1526_v63 = vadd.f32 %v5455_v60, %v1429_v59  ;;  %v1520_v21 = vpop.f32.mrb[3].mxu1  ;;  %v5160_v59 = vld [vmem:[%s7823_s7 + $0x38] sm:$0xff]  ;;  %v5159_v60 = vld [vmem:[%s7823_s7 + $0x30] sm:$0xff] }
 0x80a   : > { %v1521_v22 = vadd.f32 %v1520_v21, %v1424_v62  ;;  %v5158_v21 = vld [vmem:[%s7823_s7 + $0x28] sm:$0xff] }
 0x80b   : > { %v1544_v1 = vmul.f32 %v1542_v61, %v1526_v63 }
 0x80c   : > { %v1543_v11 = vmul.f32 %v1542_v61, %v1521_v22 }
 0x80d   : > { %v6647_v3 = vadd.f32 %v1544_v1, %v6460_v48  ;;  %v5151_v48 = vld [vmem:[%s7822_s19 + $0x38] sm:$0xff] }
 0x80e   : > { %v6650_v12 = vadd.f32 %v1543_v11, %v6462_v50  ;;  %v1560_v50 = vpop.permute.xlu1 %1559 }
 0x810   : > { %v5633_v13 = vpack.c.bf16 %v6647_v3, %v6650_v12 }
 0x812   : > { %5634 = vmatprep.subr.bf16.mxu0 %v5633_v13  ;;  %v1565_v5 = vpop.permute.xlu1 %1564 }
 0x813   : > { %5636 = vmatpush3.bf16.msra.mxu0 %v5633_v13 }
 0x816   : > { %5464 = vmatmul.mubr.msk.f32.vlgmr.msra.gmra.mrb[6].mxu0 %vm886_vm2, %v5149_v14  ;;  %v1575_v27 = vpop.permute.xlu1 %1574 }
 0x817   : > { %5466 = vmatprep.mubr.msk.f32.mxu0 %vm886_vm2, %v5150_v15 }
 0x81a   : > { %5467 = vmatmul.mubr.msk.f32.gmra.mrb[8].mxu0 %vm886_vm2, %v5151_v48 }
 0x8e9   : > { %v5465_v16 = vpop.f32.mrb[6].mxu0 }
 0x8ea   : > { %v1661_v19 = vadd.f32 %v5465_v16, %v1565_v5  ;;  %v1655_v20 = vpop.f32.mrb[7].mxu0 }
 0x8eb   : > { %v1656_v25 = vadd.f32 %v1655_v20, %v1560_v50 }
 0x8ec   : > { %v1681_v26 = vmul.f32 %v1679_v17, %v1661_v19  ;;  %vm1675_vm14 = vcmp.ge.f32.partialorder %v1661_v19, 0.0 }
 0x8ed   : > { %v5468_v28 = vpop.f32.mrb[8].mxu0  ;;  %vm1674_vm15 = vcmp.ge.f32.partialorder %v1656_v25, 0.0  ;;  %v1680_v29 = vmul.f32 %v1679_v17, %v1656_v25 }
 0x8ee   : > { %v1665_v33 = vpop.f32.mrb[9].mxu0  ;;  %v1685_v38 = vsel %vm1675_vm14, %v1661_v19, %v1681_v26  ;;  %v1671_v18 = vadd.f32 %v5468_v28, %v1575_v27 }
 0x8ef   : > { %v1666_v32 = vadd.f32 %v1665_v33, %v1570_v30  ;;  %1690 = vadd.xlane.f32.xlu1 %v1685_v38  ;;  %v1684_v39 = vsel %vm1674_vm15, %v1656_v25, %v1680_v29 }
 0x8f0   : > { %1688 = vadd.xlane.f32.xlu0 %v1684_v39  ;;  %v1683_v46 = vmul.f32 %v1679_v17, %v1671_v18  ;;  %vm1677_vm3 = vcmp.ge.f32.partialorder %v1671_v18, 0.0 }
 0x8f1   : > { %vm1676_vm0 = vcmp.ge.f32.partialorder %v1666_v32, 0.0  ;;  %v1682_v40 = vmul.f32 %v1679_v17, %v1666_v32 }
 0x8f2   : > { %v1687_v47 = vsel %vm1677_vm3, %v1671_v18, %v1683_v46  ;;  %vm733_vm3 = vcmp.ge.s32.totalorder %v6551_v43, 4 }
 0x8f3   : > { %v1686_v45 = vsel %vm1676_vm0, %v1666_v32, %v1682_v40 }
 0x8f4   : > { %1692 = vadd.xlane.f32.xlu0 %v1686_v45 }
 0x8f8   : > { %1694 = vadd.xlane.f32.xlu0 %v1687_v47 }
 0x900   : > { %1733 = vperm.xlu1 %5839, %v6612_v9  }
 0x904   : > { %5841 = vset.pattern.permute.xlu1 %v6162_v36 }
 0x97c   : > { %v1691_v49 = vpop.xlane.xlu1 %1690 }
 0x97d   : > { %v1697_v31 = vmul.f32 0.0078125, %v1691_v49  ;;  %v1689_v37 = vpop.xlane.xlu0 %1688 }
 0x97e   : > { %v1696_v24 = vmul.f32 0.0078125, %v1689_v37 }
 0x97f   : > { %v6668_v34 = vsub.f32 %v1685_v38, %v1697_v31 }
 0x980   : > { %v6670_v53 = vsub.f32 %v1684_v39, %v1696_v24  ;;  %v1734_v22 = vpop.permute.xlu1 %1733 }
 0x981   : > { %v1693_v35 = vpop.xlane.xlu0 %1692  ;;  %v1705_v44 = vmul.f32 %v6668_v34, %v6668_v34 }
 0x982   : > { %v1704_v54 = vmul.f32 %v6670_v53, %v6670_v53  ;;  %v1698_v61 = vmul.f32 0.0078125, %v1693_v35 }
 0x983   : > { %1710 = vadd.xlane.f32.xlu0 %v1705_v44 }
 0x984   : > { %1708 = vadd.xlane.f32.xlu1 %v1704_v54  ;;  %v6703_v62 = vsub.f32 %v1686_v45, %v1698_v61 }
 0x985   : > { %v1695_v42 = vpop.xlane.xlu0 %1694 }
 0x986   : > { %v1699_v55 = vmul.f32 0.0078125, %v1695_v42  ;;  %v1706_v63 = vmul.f32 %v6703_v62, %v6703_v62 }
 0x988   : > { %v6676_v56 = vsub.f32 %v1687_v47, %v1699_v55 }
 0x98a   : > { %v1707_v57 = vmul.f32 %v6676_v56, %v6676_v56 }
 0x98c   : > { %1714 = vadd.xlane.f32.xlu0 %v1707_v57 }
 0x995   : > { %1753 = vperm.xlu1 %5841, %v6612_v9  }
 0x999   : > { %1757 = vperm.xlu1 %5841, %v6624_v2  }
 0x99d   : > { %5842 = vset.pattern.permute.xlu1 %v6161_v6 }
 0x99e   : > { %1741 = vperm.xlu1 %5842, %v6617_v23  }
 0x9a2   : > { %1745 = vperm.xlu1 %5842, %v6631_v10   ;;  %1737 = vperm.xlu0 %5840, %v6624_v2  }
 0x9a6   : > { %5843 = vset.pattern.permute.xlu1 %v6162_v36  ;;  %1830 = vperm.xlu0 %5840, %v5157_v58  }
 0x9a7   : > { %1761 = vperm.xlu1 %5843, %v6617_v23  }
 0x9aa   : > { %5848 = vset.pattern.permute.xlu0 %v6160_v4 }
 0x9ab   : > { %1822 = vperm.xlu0 %5848, %v5160_v59  }
 0x9af   : > { %5849 = vset.pattern.permute.xlu0 %v6162_v36 }
 0x9b0   : > { %1854 = vperm.xlu0 %5849, %v5157_v58  }
 0x9b4   : > { %1862 = vperm.xlu0 %5849, %v5159_v60  }
 0x9b8   : > { %5853 = vset.pattern.permute.xlu0 %v6163_v41 }
 0x9b9   : > { %1882 = vperm.xlu0 %5853, %v6624_v2  }
 0x9bd   : > { %1886 = vperm.xlu0 %5853, %v6617_v23  }
 0x9c1   : > { %5854 = vset.pattern.permute.xlu0 %v6166_v52 }
 0x9cb   : > { %1712 = vadd.xlane.f32.xlu1 %v1706_v63 }
 0x9dc   : > { %1765 = vperm.xlu1 %5843, %v6631_v10  }
 0x9e0   : > { %5844 = vset.pattern.permute.xlu1 %v6160_v4 }
 0x9e1   : > { %1807 = vperm.xlu1 %5844, %v5157_v58  }
 0x9e5   : > { %1812 = vperm.xlu1 %5844, %v5158_v21  }
 0x9e9   : > { %5845 = vset.pattern.permute.xlu1 %v6161_v6 }
 0x9ea   : > { %1834 = vperm.xlu1 %5845, %v5158_v21  }
 0x9ee   : > { %5846 = vset.pattern.permute.xlu1 %v6162_v36 }
 0x9ef   : > { %1858 = vperm.xlu1 %5846, %v5158_v21  }
 0x9f3   : > { %5847 = vset.pattern.permute.xlu1 %v6160_v4 }
 0x9f4   : > { %1817 = vperm.xlu1 %5847, %v5159_v60  }
 0x9f8   : > { %5850 = vset.pattern.permute.xlu1 %v6161_v6 }
 0x9f9   : > { %1838 = vperm.xlu1 %5850, %v5159_v60  }
 0x9fd   : > { %1842 = vperm.xlu1 %5850, %v5160_v59  }
 0xa01   : > { %5851 = vset.pattern.permute.xlu1 %v6162_v36 }
 0xa02   : > { %1866 = vperm.xlu1 %5851, %v5160_v59  }
 0xa06   : > { %5852 = vset.pattern.permute.xlu1 %v6163_v41 }
 0xa07   : > { %1878 = vperm.xlu1 %5852, %v6612_v9  }
 0xa0b   : > { %1890 = vperm.xlu1 %5852, %v6631_v10  }
 0xa0f   : > { %5855 = vset.pattern.permute.xlu1 %v6166_v52 }
 0xa10   : > { %v1711_v1 = vpop.xlane.xlu0 %1710 }
 0xa11   : > { %v1717_v11 = vmul.f32 0.0078125, %v1711_v1  ;;  %v1709_v13 = vpop.xlane.xlu1 %1708 }
 0xa12   : > { %v1716_v14 = vmul.f32 0.0078125, %v1709_v13 }
 0xa13   : > { %v1721_v15 = vadd.f32 1e-08, %v1717_v11 }
 0xa14   : > { %v1720_v48 = vadd.f32 1e-08, %v1716_v14 }
 0xa15   : > { %5969 = vrsqrt.f32 %v1721_v15  ;;  %v1754_v50 = vpop.permute.xlu1 %1753 }
 0xa16   : > { %5971 = vrsqrt.f32 %v1720_v48 }
 0xa19   : > { %v1715_v5 = vpop.xlane.xlu0 %1714  ;;  %v1758_v28 = vpop.permute.xlu1 %1757 }
 0xa1a   : > { %v1719_v33 = vmul.f32 0.0078125, %v1715_v5 }
 0xa1c   : > { %v1723_v38 = vadd.f32 1e-08, %v1719_v33 }
 0xa1d   : > { %v1742_v18 = vpop.permute.xlu1 %1741 }
 0xa1e   : > { %5973 = vrsqrt.f32 %v1723_v38 }
 0xa1f   : > { %v5970_v16 = vpop.eup %5969 }
 0xa20   : > { %v5972_v17 = vpop.eup %5971  ;;  %v1729_v19 = vmul.f32 %v5970_v16, %v6668_v34 }
 0xa21   : > { %v1728_v20 = vmul.f32 %v5972_v17, %v6670_v53  ;;  %v1738_v25 = vpop.permute.xlu0 %1737  ;;  %v1746_v32 = vpop.permute.xlu1 %1745 }
 0xa22   : > { %v1749_v26 = vmul.f32 %v1738_v25, %v1729_v19 }
 0xa23   : > { %v1748_v27 = vmul.f32 %v1734_v22, %v1728_v20 }
 0xa24   : > { %v1769_v29 = vadd.f32 %v1758_v28, %v1749_v26 }
 0xa25   : > { %v1768_v30 = vadd.f32 %v1754_v50, %v1748_v27  ;;  %v1831_v58 = vpop.permute.xlu0 %1830 }
 0xa26   : > { %1779 = vrot.lane.b32.xlu1 %v1769_v29, %s7783_s1  ;;  %v1762_v40 = vpop.permute.xlu1 %1761 }
 0xa27   : > { %1777 = vrot.lane.b32.xlu0 %v1768_v30, %s7783_s1  ;;  %v1845_v27 = vmul.f32 %v1831_v58, %v1768_v30 }
 0xa28   : > { %v5974_v39 = vpop.eup %5973 }
 0xa29   : > { %v1731_v45 = vmul.f32 %v5974_v39, %v6676_v56 }
 0xa2a   : > { %1793 = vrot.lane.b32.xlu1 %v1769_v29, %s7781_s26  ;;  %v1823_v59 = vpop.permute.xlu0 %1822 }
 0xa2b   : > { %v1751_v49 = vmul.f32 %v1746_v32, %v1731_v45 }
 0xa2e   : > { %1791 = vrot.lane.b32.xlu1 %v1768_v30, %s7781_s26 }
 0xa2f   : > { %v1855_v61 = vpop.permute.xlu0 %1854 }
 0xa33   : > { %v1863_v22 = vpop.permute.xlu0 %1862 }
 0xa38   : > { %v1883_v11 = vpop.permute.xlu0 %1882 }
 0xa58   : > { %v1713_v46 = vpop.xlane.xlu1 %1712 }
 0xa59   : > { %v1718_v47 = vmul.f32 0.0078125, %v1713_v46 }
 0xa5b   : > { %v1722_v31 = vadd.f32 1e-08, %v1718_v47 }
 0xa5c   : > { %v1766_v37 = vpop.permute.xlu1 %1765 }
 0xa5d   : > { %5975 = vrsqrt.f32 %v1722_v31  ;;  %v6728_v24 = vadd.f32 %v1766_v37, %v1751_v49 }
 0xa5f   : > { %1783 = vrot.lane.b32.xlu1 %v6728_v24, %s7783_s1 }
 0xa60   : > { %v1808_v34 = vpop.permute.xlu1 %1807 }
 0xa63   : > { %1797 = vrot.lane.b32.xlu1 %v6728_v24, %s7781_s26 }
 0xa64   : > { %v1813_v53 = vpop.permute.xlu1 %1812 }
 0xa67   : > { %v5976_v35 = vpop.eup %5975 }
 0xa68   : > { %v1730_v44 = vmul.f32 %v5976_v35, %v6703_v62  ;;  %v1887_v62 = vpop.permute.xlu0 %1886 }
 0xa69   : > { %v1835_v42 = vpop.permute.xlu1 %1834 }
 0xa6a   : > { %v1750_v54 = vmul.f32 %v1742_v18, %v1730_v44  ;;  %v1846_v16 = vmul.f32 %v1835_v42, %v1769_v29  ;;  %v1902_v18 = vstv %s5161_s24  ;;  %s5205_s24 = sld [smem:[#allocation6 + $0x2]] }
 0xa6c   : > { %v1770_v55 = vadd.f32 %v1762_v40, %v1750_v54 }
 0xa6e   : > { %1781 = vrot.lane.b32.xlu0 %v1770_v55, %s7783_s1  ;;  %v1859_v56 = vpop.permute.xlu1 %1858  ;;  %s5225_s1 = sld [smem:[#allocation3 + $0x181]] }
 0xa72   : > { %1795 = vrot.lane.b32.xlu0 %v1770_v55, %s7781_s26  ;;  %s5256_s26 = sld [smem:[#allocation3 + $0x201]] }
 0xa73   : > { %v1818_v57 = vpop.permute.xlu1 %1817 }
 0xa78   : > { %v1839_v60 = vpop.permute.xlu1 %1838 }
 0xa7c   : > { %v1843_v63 = vpop.permute.xlu1 %1842 }
 0xa7d   : > { %v1848_v42 = vmul.f32 %v1843_v63, %v6728_v24 }
 0xa81   : > { %v1867_v21 = vpop.permute.xlu1 %1866 }
 0xa86   : > { %v1879_v1 = vpop.permute.xlu1 %1878 }
 0xa8a   : > { %v1891_v13 = vpop.permute.xlu1 %1890 }
 0xa98   : > { %v1780_v14 = vpop.permute.xlu1 %1779 }
 0xa99   : > { %v1788_v15 = vsel %vm732_vm4, %v1780_v14, 0.0  ;;  %v1778_v48 = vpop.permute.xlu0 %1777 }
 0xa9a   : > { %v1826_v50 = vmul.f32 %v1813_v53, %v1788_v15  ;;  %v1787_v5 = vsel %vm732_vm4, %v1778_v48, 0.0 }
 0xa9b   : > { %v1825_v25 = vmul.f32 %v1808_v34, %v1787_v5 }
 0xa9c   : > { %v1794_v17 = vpop.permute.xlu1 %1793  ;;  %v1850_v20 = vadd.f32 %v1846_v16, %v1826_v50 }
 0xa9d   : > { %v1802_v19 = vsel %vm735_vm5, %v1794_v17, 0.0  ;;  %v1849_v32 = vadd.f32 %v1845_v27, %v1825_v25 }
 0xa9e   : > { %v1870_v26 = vmul.f32 %v1859_v56, %v1802_v19 }
 0xaa0   : > { %v1874_v28 = vadd.f32 %v1870_v26, %v1850_v20  ;;  %v1792_v33 = vpop.permute.xlu1 %1791 }
 0xaa1   : > { %v1801_v38 = vsel %vm735_vm5, %v1792_v33, 0.0 }
 0xaa2   : > { %v1869_v39 = vmul.f32 %v1855_v61, %v1801_v38  ;;  %v1894_v40 = vadd.f32 %v1883_v11, %v1874_v28  ;;  %v1847_v61 = vmul.f32 %v1839_v60, %v1770_v55 }
 0xaa4   : > { %v1873_v45 = vadd.f32 %v1869_v39, %v1849_v32  ;;  %vm1898_vm6 = vcmp.ge.f32.partialorder %v1894_v40, 0.0  ;;  %v1904_v29 = vmul.f32 %v1902_v18, %v1894_v40  ;;  %v5167_v39 = vld [vmem:[%s7750_s10 + $0x28] sm:$0xff] }
 0xaa6   : > { %v1908_v46 = vsel %vm1898_vm6, %v1894_v40, %v1904_v29  ;;  %v1893_v47 = vadd.f32 %v1879_v1, %v1873_v45  ;;  %v6806_v40 = vld [vmem:[%s7749_s9 + $0x40] sm:$0xff]  ;;  %v6811_v45 = vld [vmem:[%s7749_s9 + $0x50] sm:$0xff]  ;;  %v6818_v29 = vld [vmem:[%s7749_s9 + $0x48] sm:$0xff]  ;;  %vm736_vm6 = vcmp.lt.s32.totalorder %v6551_v43, 124 }
 0xaa7   : > { %1913 = vadd.xlane.f32.xlu1 %v1908_v46 }
 0xaa8   : > { %vm1897_vm9 = vcmp.ge.f32.partialorder %v1893_v47, 0.0  ;;  %v1903_v49 = vmul.f32 %v1902_v18, %v1893_v47 }
 0xaaa   : > { %v1907_v31 = vsel %vm1897_vm9, %v1893_v47, %v1903_v49 }
 0xaab   : > { %1911 = vadd.xlane.f32.xlu0 %v1907_v31 }
 0xad1   : > { %v1784_v30 = vpop.permute.xlu1 %1783 }
 0xad2   : > { %v1790_v34 = vsel %vm732_vm4, %v1784_v30, 0.0 }
 0xad3   : > { %v1828_v35 = vmul.f32 %v1823_v59, %v1790_v34 }
 0xad5   : > { %v1798_v37 = vpop.permute.xlu1 %1797  ;;  %v1852_v1 = vadd.f32 %v1848_v42, %v1828_v35 }
 0xad6   : > { %v1804_v53 = vsel %vm735_vm5, %v1798_v37, 0.0 }
 0xad7   : > { %v1872_v56 = vmul.f32 %v1867_v21, %v1804_v53 }
 0xad9   : > { %v1876_v15 = vadd.f32 %v1872_v56, %v1852_v1 }
 0xadb   : > { %v1896_v59 = vadd.f32 %v1891_v13, %v1876_v15 }
 0xadd   : > { %v1906_v20 = vmul.f32 %v1902_v18, %v1896_v59  ;;  %vm1900_vm11 = vcmp.ge.f32.partialorder %v1896_v59, 0.0 }
 0xadf   : > { %v1910_v24 = vsel %vm1900_vm11, %v1896_v59, %v1906_v20 }
 0xae0   : > { %v1782_v44 = vpop.permute.xlu0 %1781 }
 0xae1   : > { %v1789_v54 = vsel %vm732_vm4, %v1782_v44, 0.0 }
 0xae2   : > { %v1827_v58 = vmul.f32 %v1818_v57, %v1789_v54 }
 0xae4   : > { %v1796_v11 = vpop.permute.xlu0 %1795  ;;  %v1851_v48 = vadd.f32 %v1847_v61, %v1827_v58 }
 0xae5   : > { %v1803_v14 = vsel %vm735_vm5, %v1796_v11, 0.0 }
 0xae6   : > { %v1871_v50 = vmul.f32 %v1863_v22, %v1803_v14 }
 0xae8   : > { %v1875_v5 = vadd.f32 %v1871_v50, %v1851_v48 }
 0xaea   : > { %v1895_v16 = vadd.f32 %v1887_v62, %v1875_v5 }
 0xaec   : > { %vm1899_vm10 = vcmp.ge.f32.partialorder %v1895_v16, 0.0  ;;  %v1905_v17 = vmul.f32 %v1902_v18, %v1895_v16 }
 0xaee   : > { %v1909_v19 = vsel %vm1899_vm10, %v1895_v16, %v1905_v17 }
 0xaef   : > { %1915 = vadd.xlane.f32.xlu0 %v1909_v19 }
 0xaf3   : > { %1917 = vadd.xlane.f32.xlu0 %v1910_v24 }
 0xb34   : > { %v1914_v55 = vpop.xlane.xlu1 %1913 }
 0xb35   : > { %v1920_v57 = vmul.f32 0.0078125, %v1914_v55 }
 0xb37   : > { %v6756_v60 = vsub.f32 %v1908_v46, %v1920_v57  ;;  %v6825_v46 = vld [vmem:[%s7749_s9 + $0x58] sm:$0xff] }
 0xb38   : > { %v1912_v63 = vpop.xlane.xlu0 %1911 }
 0xb39   : > { %v1919_v21 = vmul.f32 0.0078125, %v1912_v63  ;;  %v1928_v22 = vmul.f32 %v6756_v60, %v6756_v60 }
 0xb3b   : > { %1933 = vadd.xlane.f32.xlu1 %v1928_v22  ;;  %v6760_v62 = vsub.f32 %v1907_v31, %v1919_v21 }
 0xb3d   : > { %v1927_v13 = vmul.f32 %v6760_v62, %v6760_v62 }
 0xb3f   : > { %1931 = vadd.xlane.f32.xlu0 %v1927_v13 }
 0xb7c   : > { %v1916_v25 = vpop.xlane.xlu0 %1915 }
 0xb7d   : > { %v1921_v26 = vmul.f32 0.0078125, %v1916_v25 }
 0xb7f   : > { %v6764_v27 = vsub.f32 %v1909_v19, %v1921_v26 }
 0xb80   : > { %v1918_v28 = vpop.xlane.xlu0 %1917 }
 0xb81   : > { %v1922_v33 = vmul.f32 0.0078125, %v1918_v28  ;;  %v1929_v38 = vmul.f32 %v6764_v27, %v6764_v27 }
 0xb83   : > { %v6768_v18 = vsub.f32 %v1910_v24, %v1922_v33  ;;  %1935 = vadd.xlane.f32.xlu0 %v1929_v38  ;;  %v5163_v33 = vld [vmem:[%s7748_s8 + $0x28] sm:$0xff] }
 0xb85   : > { %v1930_v32 = vmul.f32 %v6768_v18, %v6768_v18 }
 0xb87   : > { %1937 = vadd.xlane.f32.xlu1 %v1930_v32  ;;  %v2125_v32 = vstv %s5174_s5  ;;  %s5192_s5 = sld [smem:[#allocation3 + $0x101]] }
 0xb98   : > { %1960 = vperm.xlu1 %5855, %v6624_v2  }
 0xb99   : > { %1956 = vperm.xlu0 %5854, %v6612_v9  }
 0xb9c   : > { %5856 = vset.pattern.permute.xlu1 %v6167_v0 }
 0xb9d   : > { %1976 = vperm.xlu1 %5856, %v6612_v9   ;;  %5860 = vset.pattern.permute.xlu0 %v6160_v4  ;;  %v1415_v9 = vld [vmem:[%s7748_s8 + $0x10] sm:$0xff] }
 0xb9e   : > { %5456 = vmatprep.mubr.msk.f32.mxu1 %vm1441_vm13, %v1415_v9  ;;  %2012 = vperm.xlu0 %5860, %v5167_v39  }
 0xba1   : > { %1980 = vperm.xlu1 %5856, %v6624_v2   ;;  %v1416_v2 = vld [vmem:[%s7748_s8 + $0x18] sm:$0xff] }
 0xba2   : > { %5457 = vmatmul.mubr.msk.f32.gmra.mrb[4].mxu1 %vm1441_vm13, %v1416_v2  ;;  %2152 = vperm.xlu0 %5860, %v6811_v45  }
 0xba5   : > { %5857 = vset.pattern.permute.xlu1 %v6166_v52 }
 0xba6   : > { %1964 = vperm.xlu1 %5857, %v6617_v23   ;;  %5862 = vset.pattern.permute.xlu0 %v6161_v6 }
 0xbaa   : > { %1968 = vperm.xlu1 %5857, %v6631_v10  }
 0xbae   : > { %5858 = vset.pattern.permute.xlu1 %v6167_v0 }
 0xbaf   : > { %1984 = vperm.xlu1 %5858, %v6617_v23   ;;  %v5162_v23 = vld [vmem:[%s7748_s8 + $0x20] sm:$0xff] }
 0xbb0   : > { %5477 = vmatprep.mubr.msk.f32.mxu1 %vm1441_vm13, %v5162_v23 }
 0xbb3   : > { %1988 = vperm.xlu1 %5858, %v6631_v10   ;;  %v5166_v10 = vld [vmem:[%s7750_s10 + $0x20] sm:$0xff] }
 0xbb7   : > { %5859 = vset.pattern.permute.xlu1 %v6160_v4 }
 0xbb8   : > { %2007 = vperm.xlu1 %5859, %v5166_v10  }
 0xbbc   : > { %2142 = vperm.xlu1 %5859, %v6806_v40  }
 0xbc0   : > { %2147 = vperm.xlu1 %5859, %v6818_v29  }
 0xbc4   : > { %2157 = vperm.xlu1 %5859, %v6825_v46  }
 0xbc8   : > { %5861 = vset.pattern.permute.xlu1 %v6161_v6  ;;  %v1934_v47 = vpop.xlane.xlu1 %1933 }
 0xbc9   : > { %v1940_v31 = vmul.f32 0.0078125, %v1934_v47 }
 0xbcb   : > { %v1944_v37 = vadd.f32 1e-08, %v1940_v31 }
 0xbcc   : > { %v1932_v49 = vpop.xlane.xlu0 %1931 }
 0xbcd   : > { %v1939_v30 = vmul.f32 0.0078125, %v1932_v49  ;;  %5977 = vrsqrt.f32 %v1944_v37  ;;  %v5180_v37 = vld [vmem:[%s7822_s19 + $0x48] sm:$0xff] }
 0xbcf   : > { %v1943_v34 = vadd.f32 1e-08, %v1939_v30 }
 0xbd1   : > { %5979 = vrsqrt.f32 %v1943_v34  ;;  %v5181_v34 = vld [vmem:[%s7822_s19 + $0x50] sm:$0xff] }
 0xbd7   : > { %v5978_v54 = vpop.eup %5977 }
 0xbd8   : > { %v1952_v14 = vmul.f32 %v5978_v54, %v6756_v60 }
 0xbdb   : > { %v5980_v56 = vpop.eup %5979 }
 0xbdc   : > { %v1951_v15 = vmul.f32 %v5980_v56, %v6760_v62 }
 0xc10   : > { %v1936_v35 = vpop.xlane.xlu0 %1935 }
 0xc11   : > { %v1941_v42 = vmul.f32 0.0078125, %v1936_v35 }
 0xc13   : > { %v1945_v11 = vadd.f32 1e-08, %v1941_v42 }
 0xc14   : > { %v1938_v53 = vpop.xlane.xlu1 %1937 }
 0xc15   : > { %v1942_v58 = vmul.f32 0.0078125, %v1938_v53  ;;  %5981 = vrsqrt.f32 %v1945_v11 }
 0xc17   : > { %v1946_v48 = vadd.f32 1e-08, %v1942_v58 }
 0xc18   : > { %v1961_v44 = vpop.permute.xlu1 %1960  ;;  %v1957_v61 = vpop.permute.xlu0 %1956 }
 0xc19   : > { %v1972_v50 = vmul.f32 %v1961_v44, %v1952_v14  ;;  %v1971_v5 = vmul.f32 %v1957_v61, %v1951_v15  ;;  %5983 = vrsqrt.f32 %v1946_v48  ;;  %v2262_v44 = vstv %s5187_s3  ;;  %s7788_s3 = smov 4  }
 0xc1c   : > { %v1977_v1 = vpop.permute.xlu1 %1976 }
 0xc1d   : > { %v1991_v59 = vadd.f32 %v1977_v1, %v1971_v5  ;;  %v2013_v38 = vpop.permute.xlu0 %2012 }
 0xc1f   : > { %v5982_v55 = vpop.eup %5981 }
 0xc20   : > { %v1981_v16 = vpop.permute.xlu1 %1980  ;;  %v1953_v60 = vmul.f32 %v5982_v55, %v6764_v27  ;;  %v5179_v27 = vld [vmem:[%s7822_s19 + $0x40] sm:$0xff] }
 0xc21   : > { %v1992_v17 = vadd.f32 %v1981_v16, %v1972_v50  ;;  %5487 = vmatprep.mubr.msk.f32.mxu0 %vm886_vm2, %v5179_v27  ;;  %v2153_v11 = vpop.permute.xlu0 %2152  ;;  %v5191_v27 = vld [vmem:[%s7823_s7 + $0x58] sm:$0xff] }
 0xc23   : > { %v5637_v19 = vpack.c.bf16 %v1992_v17, %v1991_v59  ;;  %v5984_v57 = vpop.eup %5983 }
 0xc24   : > { %v1954_v21 = vmul.f32 %v5984_v57, %v6768_v18 }
 0xc25   : > { %v1965_v20 = vpop.permute.xlu1 %1964  ;;  %5638 = vmatprep.subr.bf16.mxu1 %v5637_v19 }
 0xc26   : > { %5640 = vmatpush3.bf16.msra.mxu1 %v5637_v19  ;;  %v1973_v22 = vmul.f32 %v1965_v20, %v1953_v60 }
 0xc29   : > { %v1969_v24 = vpop.permute.xlu1 %1968 }
 0xc2a   : > { %v1974_v62 = vmul.f32 %v1969_v24, %v1954_v21 }
 0xc2e   : > { %v1985_v63 = vpop.permute.xlu1 %1984 }
 0xc2f   : > { %v1993_v25 = vadd.f32 %v1985_v63, %v1973_v22 }
 0xc32   : > { %v1989_v13 = vpop.permute.xlu1 %1988 }
 0xc33   : > { %v1994_v26 = vadd.f32 %v1989_v13, %v1974_v62 }
 0xc35   : > { %v5641_v28 = vpack.c.bf16 %v1994_v26, %v1993_v25 }
 0xc37   : > { %5642 = vmatprep.subr.bf16.mxu1 %v5641_v28  ;;  %v2008_v9 = vpop.permute.xlu1 %2007 }
 0xc38   : > { %5644 = vmatpush3.bf16.msra.mxu1 %v5641_v28 }
 0xc3b   : > { %5478 = vmatmul.mubr.msk.f32.vlgmr.msra.gmra.mrb[6].mxu1 %vm1441_vm13, %v5163_v33  ;;  %v5188_v33 = vld [vmem:[%s7823_s7 + $0x40] sm:$0xff] }
 0xd0e   : > { %v5479_v18 = vpop.f32.mrb[6].mxu1 }
 0xd0f   : > { %v2109_v2 = vadd.f32 %v5479_v18, %v2013_v38  ;;  %v2103_v23 = vpop.f32.mrb[7].mxu1  ;;  %v5190_v38 = vld [vmem:[%s7823_s7 + $0x50] sm:$0xff] }
 0xd10   : > { %v2104_v10 = vadd.f32 %v2103_v23, %v2008_v9 }
 0xd11   : > { %v2127_v39 = vmul.f32 %v2125_v32, %v2109_v2  ;;  %v5189_v2 = vld [vmem:[%s7823_s7 + $0x48] sm:$0xff] }
 0xd12   : > { %v2126_v47 = vmul.f32 %v2125_v32, %v2104_v10 }
 0xd13   : > { %v6842_v49 = vadd.f32 %v2127_v39, %v6647_v3  ;;  %v5182_v3 = vld [vmem:[%s7822_s19 + $0x58] sm:$0xff] }
 0xd14   : > { %v6845_v31 = vadd.f32 %v2126_v47, %v6650_v12  ;;  %v2143_v12 = vpop.permute.xlu1 %2142 }
 0xd16   : > { %v5645_v30 = vpack.c.bf16 %v6842_v49, %v6845_v31 }
 0xd18   : > { %5646 = vmatprep.subr.bf16.mxu0 %v5645_v30  ;;  %v2148_v53 = vpop.permute.xlu1 %2147 }
 0xd19   : > { %5648 = vmatpush3.bf16.msra.mxu0 %v5645_v30 }
 0xd1a   : > { %5658 = vmatprep.subr.bf16.mxu0 %v6466_v51 }
 0xd1c   : > { %5488 = vmatmul.mubr.msk.f32.vlgmr.msra.gmra.mrb[10].mxu0 %vm886_vm2, %v5180_v37  ;;  %v2158_v61 = vpop.permute.xlu1 %2157 }
 0xd1d   : > { %5660 = vmatpush3.bf16.msra.mxu0 %v6466_v51  ;;  %5490 = vmatprep.mubr.msk.f32.mxu0 %vm886_vm2, %v5181_v34 }
 0xd20   : > { %5491 = vmatmul.mubr.msk.f32.gmra.mrb[12].mxu0 %vm886_vm2, %v5182_v3 }
 0xdef   : > { %v5489_v35 = vpop.f32.mrb[10].mxu0 }
 0xdf0   : > { %v2244_v54 = vadd.f32 %v5489_v35, %v2148_v53  ;;  %v2238_v42 = vpop.f32.mrb[11].mxu0 }
 0xdf1   : > { %v2239_v56 = vadd.f32 %v2238_v42, %v2143_v12 }
 0xdf2   : > { %v2264_v58 = vmul.f32 %v2262_v44, %v2244_v54  ;;  %vm2258_vm12 = vcmp.ge.f32.partialorder %v2244_v54, 0.0 }
 0xdf3   : > { %v2263_v51 = vmul.f32 %v2262_v44, %v2239_v56  ;;  %v5492_v1 = vpop.f32.mrb[12].mxu0  ;;  %vm2257_vm14 = vcmp.ge.f32.partialorder %v2239_v56, 0.0 }
 0xdf4   : > { %v2248_v14 = vpop.f32.mrb[13].mxu0  ;;  %v2268_v15 = vsel %vm2258_vm12, %v2244_v54, %v2264_v58  ;;  %v2254_v48 = vadd.f32 %v5492_v1, %v2158_v61 }
 0xdf5   : > { %v2249_v50 = vadd.f32 %v2248_v14, %v2153_v11  ;;  %2273 = vadd.xlane.f32.xlu1 %v2268_v15  ;;  %v2267_v5 = vsel %vm2257_vm14, %v2239_v56, %v2263_v51 }
 0xdf6   : > { %2271 = vadd.xlane.f32.xlu0 %v2267_v5  ;;  %v2266_v59 = vmul.f32 %v2262_v44, %v2254_v48  ;;  %vm2260_vm0 = vcmp.ge.f32.partialorder %v2254_v48, 0.0 }
 0xdf7   : > { %v2265_v16 = vmul.f32 %v2262_v44, %v2249_v50  ;;  %vm2259_vm15 = vcmp.ge.f32.partialorder %v2249_v50, 0.0 }
 0xdf8   : > { %v2270_v19 = vsel %vm2260_vm0, %v2254_v48, %v2266_v59 }
 0xdf9   : > { %v2269_v17 = vsel %vm2259_vm15, %v2249_v50, %v2265_v16 }
 0xdfa   : > { %2275 = vadd.xlane.f32.xlu0 %v2269_v17 }
 0xdfe   : > { %2277 = vadd.xlane.f32.xlu0 %v2270_v19 }
 0xe06   : > { %2316 = vperm.xlu1 %5861, %v6806_v40  }
 0xe0a   : > { %5863 = vset.pattern.permute.xlu1 %v6162_v36 }
 0xe82   : > { %v2274_v20 = vpop.xlane.xlu1 %2273 }
 0xe83   : > { %v2280_v24 = vmul.f32 0.0078125, %v2274_v20  ;;  %v2272_v55 = vpop.xlane.xlu0 %2271 }
 0xe84   : > { %v2279_v57 = vmul.f32 0.0078125, %v2272_v55 }
 0xe85   : > { %v6865_v63 = vsub.f32 %v2268_v15, %v2280_v24 }
 0xe86   : > { %v6867_v60 = vsub.f32 %v2267_v5, %v2279_v57  ;;  %v2317_v23 = vpop.permute.xlu1 %2316 }
 0xe87   : > { %v2276_v21 = vpop.xlane.xlu0 %2275  ;;  %v2288_v22 = vmul.f32 %v6865_v63, %v6865_v63 }
 0xe88   : > { %v2287_v62 = vmul.f32 %v6867_v60, %v6867_v60  ;;  %v2281_v18 = vmul.f32 0.0078125, %v2276_v21 }
 0xe89   : > { %2293 = vadd.xlane.f32.xlu0 %v2288_v22 }
 0xe8a   : > { %2291 = vadd.xlane.f32.xlu1 %v2287_v62  ;;  %v6900_v32 = vsub.f32 %v2269_v17, %v2281_v18 }
 0xe8b   : > { %v2278_v13 = vpop.xlane.xlu0 %2277 }
 0xe8c   : > { %v2282_v25 = vmul.f32 0.0078125, %v2278_v13  ;;  %v2289_v9 = vmul.f32 %v6900_v32, %v6900_v32 }
 0xe8e   : > { %v6873_v26 = vsub.f32 %v2270_v19, %v2282_v25 }
 0xe90   : > { %v2290_v28 = vmul.f32 %v6873_v26, %v6873_v26 }
 0xe92   : > { %2297 = vadd.xlane.f32.xlu0 %v2290_v28 }
 0xe9b   : > { %2336 = vperm.xlu1 %5863, %v6806_v40  }
 0xe9f   : > { %2340 = vperm.xlu1 %5863, %v6818_v29  }
 0xea3   : > { %5864 = vset.pattern.permute.xlu1 %v6161_v6 }
 0xea4   : > { %2324 = vperm.xlu1 %5864, %v6811_v45  }
 0xea8   : > { %2328 = vperm.xlu1 %5864, %v6825_v46   ;;  %2320 = vperm.xlu0 %5862, %v6818_v29  }
 0xeac   : > { %5865 = vset.pattern.permute.xlu1 %v6162_v36  ;;  %2413 = vperm.xlu0 %5862, %v5188_v33  }
 0xead   : > { %2344 = vperm.xlu1 %5865, %v6811_v45  }
 0xeb0   : > { %5870 = vset.pattern.permute.xlu0 %v6160_v4 }
 0xeb1   : > { %2405 = vperm.xlu0 %5870, %v5191_v27  }
 0xeb5   : > { %5871 = vset.pattern.permute.xlu0 %v6162_v36 }
 0xeb6   : > { %2437 = vperm.xlu0 %5871, %v5188_v33  }
 0xeba   : > { %2445 = vperm.xlu0 %5871, %v5190_v38  }
 0xebe   : > { %5875 = vset.pattern.permute.xlu0 %v6163_v41 }
 0xebf   : > { %2465 = vperm.xlu0 %5875, %v6818_v29  }
 0xec3   : > { %2469 = vperm.xlu0 %5875, %v6811_v45  }
 0xec7   : > { %5876 = vset.pattern.permute.xlu0 %v6166_v52 }
 0xed1   : > { %2295 = vadd.xlane.f32.xlu1 %v2289_v9 }
 0xee2   : > { %2348 = vperm.xlu1 %5865, %v6825_v46  }
 0xee6   : > { %5866 = vset.pattern.permute.xlu1 %v6160_v4 }
 0xee7   : > { %2390 = vperm.xlu1 %5866, %v5188_v33  }
 0xeeb   : > { %2395 = vperm.xlu1 %5866, %v5189_v2  }
 0xeef   : > { %5867 = vset.pattern.permute.xlu1 %v6161_v6 }
 0xef0   : > { %2417 = vperm.xlu1 %5867, %v5189_v2  }
 0xef4   : > { %5868 = vset.pattern.permute.xlu1 %v6162_v36 }
 0xef5   : > { %2441 = vperm.xlu1 %5868, %v5189_v2  }
 0xef9   : > { %5869 = vset.pattern.permute.xlu1 %v6160_v4 }
 0xefa   : > { %2400 = vperm.xlu1 %5869, %v5190_v38  }
 0xefe   : > { %5872 = vset.pattern.permute.xlu1 %v6161_v6 }
 0xeff   : > { %2421 = vperm.xlu1 %5872, %v5190_v38  }
 0xf03   : > { %2425 = vperm.xlu1 %5872, %v5191_v27  }
 0xf07   : > { %5873 = vset.pattern.permute.xlu1 %v6162_v36 }
 0xf08   : > { %2449 = vperm.xlu1 %5873, %v5191_v27  }
 0xf0c   : > { %5874 = vset.pattern.permute.xlu1 %v6163_v41 }
 0xf0d   : > { %2461 = vperm.xlu1 %5874, %v6806_v40  }
 0xf11   : > { %2473 = vperm.xlu1 %5874, %v6825_v46  }
 0xf15   : > { %5877 = vset.pattern.permute.xlu1 %v6166_v52 }
 0xf16   : > { %v2294_v10 = vpop.xlane.xlu0 %2293 }
 0xf17   : > { %v2300_v39 = vmul.f32 0.0078125, %v2294_v10  ;;  %v2292_v47 = vpop.xlane.xlu1 %2291 }
 0xf18   : > { %v2299_v30 = vmul.f32 0.0078125, %v2292_v47 }
 0xf19   : > { %v2304_v37 = vadd.f32 1e-08, %v2300_v39 }
 0xf1a   : > { %v2303_v34 = vadd.f32 1e-08, %v2299_v30 }
 0xf1b   : > { %5985 = vrsqrt.f32 %v2304_v37  ;;  %v2337_v3 = vpop.permute.xlu1 %2336 }
 0xf1c   : > { %5987 = vrsqrt.f32 %v2303_v34 }
 0xf1f   : > { %v2298_v12 = vpop.xlane.xlu0 %2297  ;;  %v2341_v61 = vpop.permute.xlu1 %2340 }
 0xf20   : > { %v2302_v11 = vmul.f32 0.0078125, %v2298_v12 }
 0xf22   : > { %v2306_v14 = vadd.f32 1e-08, %v2302_v11 }
 0xf23   : > { %v2325_v15 = vpop.permute.xlu1 %2324 }
 0xf24   : > { %5989 = vrsqrt.f32 %v2306_v14  ;;  %v2485_v14 = vstv %s5192_s5  ;;  %s5220_s5 = sld [smem:[#allocation3 + $0x180]] }
 0xf25   : > { %v5986_v53 = vpop.eup %5985 }
 0xf26   : > { %v5988_v35 = vpop.eup %5987  ;;  %v2312_v44 = vmul.f32 %v5986_v53, %v6865_v63 }
 0xf27   : > { %v2311_v54 = vmul.f32 %v5988_v35, %v6867_v60  ;;  %v2321_v42 = vpop.permute.xlu0 %2320  ;;  %v2329_v48 = vpop.permute.xlu1 %2328 }
 0xf28   : > { %v2332_v56 = vmul.f32 %v2321_v42, %v2312_v44 }
 0xf29   : > { %v2331_v58 = vmul.f32 %v2317_v23, %v2311_v54 }
 0xf2a   : > { %v2352_v51 = vadd.f32 %v2341_v61, %v2332_v56 }
 0xf2b   : > { %v2351_v1 = vadd.f32 %v2337_v3, %v2331_v58  ;;  %v2414_v28 = vpop.permute.xlu0 %2413 }
 0xf2c   : > { %2362 = vrot.lane.b32.xlu1 %v2352_v51, %s7788_s3  ;;  %v2345_v5 = vpop.permute.xlu1 %2344 }
 0xf2d   : > { %2360 = vrot.lane.b32.xlu0 %v2351_v1, %s7788_s3  ;;  %v2428_v56 = vmul.f32 %v2414_v28, %v2351_v1 }
 0xf2e   : > { %v5990_v50 = vpop.eup %5989 }
 0xf2f   : > { %v2314_v16 = vmul.f32 %v5990_v50, %v6873_v26 }
 0xf30   : > { %2376 = vrot.lane.b32.xlu1 %v2352_v51, %s7786_s4  ;;  %v2406_v33 = vpop.permute.xlu0 %2405 }
 0xf31   : > { %v2334_v19 = vmul.f32 %v2329_v48, %v2314_v16 }
 0xf34   : > { %2374 = vrot.lane.b32.xlu1 %v2351_v1, %s7786_s4 }
 0xf35   : > { %v2438_v38 = vpop.permute.xlu0 %2437 }
 0xf39   : > { %v2446_v2 = vpop.permute.xlu0 %2445 }
 0xf3e   : > { %v2466_v10 = vpop.permute.xlu0 %2465 }
 0xf5e   : > { %v2296_v59 = vpop.xlane.xlu1 %2295 }
 0xf5f   : > { %v2301_v17 = vmul.f32 0.0078125, %v2296_v59 }
 0xf61   : > { %v2305_v20 = vadd.f32 1e-08, %v2301_v17 }
 0xf62   : > { %v2349_v24 = vpop.permute.xlu1 %2348 }
 0xf63   : > { %5991 = vrsqrt.f32 %v2305_v20  ;;  %v6925_v55 = vadd.f32 %v2349_v24, %v2334_v19 }
 0xf65   : > { %2366 = vrot.lane.b32.xlu1 %v6925_v55, %s7788_s3 }
 0xf66   : > { %v2391_v57 = vpop.permute.xlu1 %2390 }
 0xf69   : > { %2380 = vrot.lane.b32.xlu1 %v6925_v55, %s7786_s4 }
 0xf6a   : > { %v2396_v63 = vpop.permute.xlu1 %2395 }
 0xf6d   : > { %v5992_v60 = vpop.eup %5991 }
 0xf6e   : > { %v2313_v21 = vmul.f32 %v5992_v60, %v6900_v32  ;;  %v2470_v32 = vpop.permute.xlu0 %2469 }
 0xf6f   : > { %v2418_v62 = vpop.permute.xlu1 %2417 }
 0xf70   : > { %v2333_v22 = vmul.f32 %v2325_v15, %v2313_v21  ;;  %v2429_v12 = vmul.f32 %v2418_v62, %v2352_v51 }
 0xf72   : > { %v2353_v13 = vadd.f32 %v2345_v5, %v2333_v22 }
 0xf74   : > { %2364 = vrot.lane.b32.xlu0 %v2353_v13, %s7788_s3  ;;  %v2442_v25 = vpop.permute.xlu1 %2441  ;;  %s5312_s3 = sshll.u32 %s6317_s18, 9 }
 0xf78   : > { %2378 = vrot.lane.b32.xlu0 %v2353_v13, %s7786_s4  ;;  %s7825_s4 = smov 1  }
 0xf79   : > { %v2401_v26 = vpop.permute.xlu1 %2400 }
 0xf7e   : > { %v2422_v27 = vpop.permute.xlu1 %2421 }
 0xf7f   : > { %v2430_v28 = vmul.f32 %v2422_v27, %v2353_v13 }
 0xf82   : > { %v2426_v18 = vpop.permute.xlu1 %2425 }
 0xf83   : > { %v2431_v22 = vmul.f32 %v2426_v18, %v6925_v55 }
 0xf87   : > { %v2450_v9 = vpop.permute.xlu1 %2449 }
 0xf8c   : > { %v2462_v23 = vpop.permute.xlu1 %2461 }
 0xf90   : > { %v2474_v39 = vpop.permute.xlu1 %2473 }
 0xf9e   : > { %v2363_v47 = vpop.permute.xlu1 %2362 }
 0xf9f   : > { %v2371_v30 = vsel %vm733_vm3, %v2363_v47, 0.0  ;;  %v2361_v37 = vpop.permute.xlu0 %2360 }
 0xfa0   : > { %v2409_v34 = vmul.f32 %v2396_v63, %v2371_v30  ;;  %v2370_v3 = vsel %vm733_vm3, %v2361_v37, 0.0 }
 0xfa1   : > { %v2408_v54 = vmul.f32 %v2391_v57, %v2370_v3 }
 0xfa2   : > { %v2377_v53 = vpop.permute.xlu1 %2376  ;;  %v2433_v44 = vadd.f32 %v2429_v12, %v2409_v34 }
 0xfa3   : > { %v2385_v35 = vsel %vm736_vm6, %v2377_v53, 0.0  ;;  %v2432_v15 = vadd.f32 %v2428_v56, %v2408_v54 }
 0xfa4   : > { %v2453_v42 = vmul.f32 %v2442_v25, %v2385_v35 }
 0xfa6   : > { %v2457_v58 = vadd.f32 %v2453_v42, %v2433_v44  ;;  %v2375_v61 = vpop.permute.xlu1 %2374 }
 0xfa7   : > { %v2384_v11 = vsel %vm736_vm6, %v2375_v61, 0.0 }
 0xfa8   : > { %v2452_v48 = vmul.f32 %v2438_v38, %v2384_v11  ;;  %v2477_v50 = vadd.f32 %v2466_v10, %v2457_v58 }
 0xfaa   : > { %v2456_v5 = vadd.f32 %v2452_v48, %v2432_v15  ;;  %vm2481_vm9 = vcmp.ge.f32.partialorder %v2477_v50, 0.0  ;;  %v2487_v51 = vmul.f32 %v2485_v14, %v2477_v50  ;;  %v5165_v15 = vld [vmem:[%s7748_s8 + $0x38] sm:$0xff]  ;;  %v5197_v48 = vld [vmem:[%s7750_s10 + $0x40] sm:$0xff] }
 0xfac   : > { %v2491_v16 = vsel %vm2481_vm9, %v2477_v50, %v2487_v51  ;;  %v2476_v59 = vadd.f32 %v2462_v23, %v2456_v5  ;;  %v5198_v50 = vld [vmem:[%s7750_s10 + $0x48] sm:$0xff]  ;;  %v2715_v5 = vld [vmem:[%s7752_s12] sm:$0xff] }
 0xfad   : > { %2496 = vadd.xlane.f32.xlu1 %v2491_v16  ;;  %v7014_v51 = vld [vmem:[%s7749_s9 + $0x60] sm:$0xff] }
 0xfae   : > { %vm2480_vm10 = vcmp.ge.f32.partialorder %v2476_v59, 0.0  ;;  %v2486_v17 = vmul.f32 %v2485_v14, %v2476_v59 }
 0xfb0   : > { %v2490_v19 = vsel %vm2480_vm10, %v2476_v59, %v2486_v17  ;;  %v7023_v59 = vld [vmem:[%s7749_s9 + $0x70] sm:$0xff]  ;;  %v7028_v17 = vld [vmem:[%s7749_s9 + $0x68] sm:$0xff] }
 0xfb1   : > { %2494 = vadd.xlane.f32.xlu0 %v2490_v19 }
 0xfd7   : > { %v2367_v1 = vpop.permute.xlu1 %2366 }
 0xfd8   : > { %v2373_v24 = vsel %vm733_vm3, %v2367_v1, 0.0 }
 0xfd9   : > { %v2411_v63 = vmul.f32 %v2406_v33, %v2373_v24 }
 0xfdb   : > { %v2381_v20 = vpop.permute.xlu1 %2380  ;;  %v2435_v38 = vadd.f32 %v2431_v22, %v2411_v63 }
 0xfdc   : > { %v2387_v57 = vsel %vm736_vm6, %v2381_v20, 0.0 }
 0xfdd   : > { %v2455_v62 = vmul.f32 %v2450_v9, %v2387_v57 }
 0xfdf   : > { %v2459_v47 = vadd.f32 %v2455_v62, %v2435_v38 }
 0xfe1   : > { %v2479_v33 = vadd.f32 %v2474_v39, %v2459_v47 }
 0xfe3   : > { %v2489_v35 = vmul.f32 %v2485_v14, %v2479_v33  ;;  %vm2483_vm12 = vcmp.ge.f32.partialorder %v2479_v33, 0.0 }
 0xfe5   : > { %v2493_v55 = vsel %vm2483_vm12, %v2479_v33, %v2489_v35 }
 0xfe6   : > { %v2365_v60 = vpop.permute.xlu0 %2364 }
 0xfe7   : > { %v2372_v21 = vsel %vm733_vm3, %v2365_v60, 0.0 }
 0xfe8   : > { %v2410_v25 = vmul.f32 %v2401_v26, %v2372_v21 }
 0xfea   : > { %v2379_v23 = vpop.permute.xlu0 %2378  ;;  %v2434_v30 = vadd.f32 %v2430_v28, %v2410_v25 }
 0xfeb   : > { %v2386_v10 = vsel %vm736_vm6, %v2379_v23, 0.0 }
 0xfec   : > { %v2454_v37 = vmul.f32 %v2446_v2, %v2386_v10 }
 0xfee   : > { %v2458_v34 = vadd.f32 %v2454_v37, %v2434_v30 }
 0xff0   : > { %v2478_v3 = vadd.f32 %v2470_v32, %v2458_v34 }
 0xff2   : > { %vm2482_vm11 = vcmp.ge.f32.partialorder %v2478_v3, 0.0  ;;  %v2488_v12 = vmul.f32 %v2485_v14, %v2478_v3 }
 0xff4   : > { %v2492_v53 = vsel %vm2482_vm11, %v2478_v3, %v2488_v12 }
 0xff5   : > { %2498 = vadd.xlane.f32.xlu0 %v2492_v53 }
 0xff9   : > { %2500 = vadd.xlane.f32.xlu0 %v2493_v55 }
0x103a   : > { %v2497_v13 = vpop.xlane.xlu1 %2496 }
0x103b   : > { %v2503_v26 = vmul.f32 0.0078125, %v2497_v13 }
0x103d   : > { %v6953_v27 = vsub.f32 %v2491_v16, %v2503_v26  ;;  %v2716_v16 = vld [vmem:[%s7752_s12 + $0x8] sm:$0xff] }
0x103e   : > { %v2495_v18 = vpop.xlane.xlu0 %2494 }
0x103f   : > { %v2502_v9 = vmul.f32 0.0078125, %v2495_v18  ;;  %v2511_v2 = vmul.f32 %v6953_v27, %v6953_v27 }
0x1041   : > { %v6957_v44 = vsub.f32 %v2490_v19, %v2502_v9  ;;  %2516 = vadd.xlane.f32.xlu1 %v2511_v2  ;;  %v7035_v19 = vld [vmem:[%s7749_s9 + $0x78] sm:$0xff] }
0x1043   : > { %v2510_v39 = vmul.f32 %v6957_v44, %v6957_v44 }
0x1045   : > { %2514 = vadd.xlane.f32.xlu0 %v2510_v39 }
0x1082   : > { %v2499_v32 = vpop.xlane.xlu0 %2498 }
0x1083   : > { %v2504_v54 = vmul.f32 0.0078125, %v2499_v32 }
0x1085   : > { %v6961_v42 = vsub.f32 %v2492_v53, %v2504_v54 }
0x1086   : > { %v2501_v56 = vpop.xlane.xlu0 %2500 }
0x1087   : > { %v2505_v58 = vmul.f32 0.0078125, %v2501_v56  ;;  %v2512_v61 = vmul.f32 %v6961_v42, %v6961_v42 }
0x1089   : > { %v6965_v11 = vsub.f32 %v2493_v55, %v2505_v58  ;;  %2518 = vadd.xlane.f32.xlu0 %v2512_v61 }
0x108b   : > { %v2513_v14 = vmul.f32 %v6965_v11, %v6965_v11 }
0x108d   : > { %2520 = vadd.xlane.f32.xlu1 %v2513_v14 }
0x109e   : > { %2543 = vperm.xlu1 %5877, %v6818_v29  }
0x109f   : > { %2539 = vperm.xlu0 %5876, %v6806_v40  }
0x10a2   : > { %5878 = vset.pattern.permute.xlu1 %v6167_v0 }
0x10a3   : > { %2559 = vperm.xlu1 %5878, %v6806_v40   ;;  %5882 = vset.pattern.permute.xlu0 %v6160_v4  ;;  %v5164_v40 = vld [vmem:[%s7748_s8 + $0x30] sm:$0xff] }
0x10a4   : > { %5480 = vmatprep.mubr.msk.f32.mxu1 %vm1441_vm13, %v5164_v40  ;;  %2595 = vperm.xlu0 %5882, %v5198_v50   ;;  %v5194_v40 = vld [vmem:[%s7748_s8 + $0x48] sm:$0xff]  ;;  %v2708_v50 = vstv %s5205_s24  ;;  %s5287_s24 = sld [smem:[#allocation3 + $0x281]] }
0x10a5   : > { %5481 = vmatmul.mubr.msk.f32.gmra.mrb[4].mxu1 %vm1441_vm13, %v5165_v15 }
0x10a7   : > { %2563 = vperm.xlu1 %5878, %v6818_v29   ;;  %v2713_v29 = vld [vmem:[%s7824_s11] sm:$0xff] }
0x10a8   : > { %5511 = vmatprep.mubr.msk.f32.mxu0 %vm886_vm2, %v2713_v29  ;;  %2822 = vperm.xlu0 %5882, %v7014_v51  }
0x10ab   : > { %5879 = vset.pattern.permute.xlu1 %v6166_v52 }
0x10ac   : > { %2547 = vperm.xlu1 %5879, %v6811_v45   ;;  %2832 = vperm.xlu0 %5882, %v7023_v59  }
0x10b0   : > { %2551 = vperm.xlu1 %5879, %v6825_v46   ;;  %5884 = vset.pattern.permute.xlu0 %v6161_v6 }
0x10b4   : > { %5880 = vset.pattern.permute.xlu1 %v6167_v0 }
0x10b5   : > { %2567 = vperm.xlu1 %5880, %v6811_v45   ;;  %v2714_v45 = vld [vmem:[%s7824_s11 + $0x8] sm:$0xff] }
0x10b6   : > { %5512 = vmatmul.mubr.msk.f32.vlgmr.msra.gmra.mrb[14].mxu0 %vm886_vm2, %v2714_v45 }
0x10b9   : > { %2571 = vperm.xlu1 %5880, %v6825_v46   ;;  %v5193_v46 = vld [vmem:[%s7748_s8 + $0x40] sm:$0xff] }
0x10ba   : > { %5501 = vmatprep.mubr.msk.f32.mxu1 %vm1441_vm13, %v5193_v46 }
0x10bd   : > { %5881 = vset.pattern.permute.xlu1 %v6160_v4 }
0x10be   : > { %2590 = vperm.xlu1 %5881, %v5197_v48  }
0x10c2   : > { %2719 = vperm.xlu1 %5881, %v2715_v5  }
0x10c6   : > { %2724 = vperm.xlu1 %5881, %v2716_v16  }
0x10ca   : > { %2827 = vperm.xlu1 %5881, %v7028_v17  }
0x10ce   : > { %2837 = vperm.xlu1 %5881, %v7035_v19   ;;  %v2517_v1 = vpop.xlane.xlu1 %2516 }
0x10cf   : > { %v2523_v24 = vmul.f32 0.0078125, %v2517_v1 }
0x10d1   : > { %v2527_v63 = vadd.f32 1e-08, %v2523_v24 }
0x10d2   : > { %5883 = vset.pattern.permute.xlu1 %v6161_v6  ;;  %v2515_v20 = vpop.xlane.xlu0 %2514 }
0x10d3   : > { %v2522_v57 = vmul.f32 0.0078125, %v2515_v20  ;;  %5993 = vrsqrt.f32 %v2527_v63 }
0x10d5   : > { %v2526_v60 = vadd.f32 1e-08, %v2522_v57 }
0x10d7   : > { %5995 = vrsqrt.f32 %v2526_v60 }
0x10dd   : > { %v5994_v25 = vpop.eup %5993 }
0x10de   : > { %v2535_v37 = vmul.f32 %v5994_v25, %v6953_v27 }
0x10e1   : > { %v5996_v38 = vpop.eup %5995 }
0x10e2   : > { %v2534_v34 = vmul.f32 %v5996_v38, %v6957_v44  ;;  %v5213_v38 = vld [vmem:[%s7822_s19 + $0x68] sm:$0xff] }
0x1116   : > { %v2519_v22 = vpop.xlane.xlu0 %2518 }
0x1117   : > { %v2524_v28 = vmul.f32 0.0078125, %v2519_v22 }
0x1119   : > { %v2528_v30 = vadd.f32 1e-08, %v2524_v28 }
0x111a   : > { %v2521_v21 = vpop.xlane.xlu1 %2520 }
0x111b   : > { %v2525_v23 = vmul.f32 0.0078125, %v2521_v21  ;;  %5997 = vrsqrt.f32 %v2528_v30  ;;  %v2942_v30 = vstv %s5220_s5  ;;  %s7826_s5 = smov 127  }
0x111d   : > { %v2529_v3 = vadd.f32 1e-08, %v2525_v23 }
0x111e   : > { %v2544_v62 = vpop.permute.xlu1 %2543  ;;  %v2540_v10 = vpop.permute.xlu0 %2539 }
0x111f   : > { %v2555_v33 = vmul.f32 %v2544_v62, %v2535_v37  ;;  %v2554_v12 = vmul.f32 %v2540_v10, %v2534_v34  ;;  %5999 = vrsqrt.f32 %v2529_v3 }
0x1122   : > { %v2560_v47 = vpop.permute.xlu1 %2559 }
0x1123   : > { %v2574_v35 = vadd.f32 %v2560_v47, %v2554_v12  ;;  %v2596_v46 = vpop.permute.xlu0 %2595 }
0x1125   : > { %v5998_v9 = vpop.eup %5997 }
0x1126   : > { %v2564_v53 = vpop.permute.xlu1 %2563  ;;  %v2536_v27 = vmul.f32 %v5998_v9, %v6961_v42  ;;  %v5212_v42 = vld [vmem:[%s7822_s19 + $0x60] sm:$0xff] }
0x1127   : > { %v2575_v55 = vadd.f32 %v2564_v53, %v2555_v33  ;;  %5518 = vmatprep.mubr.msk.f32.mxu0 %vm886_vm2, %v5212_v42  ;;  %v2823_v10 = vpop.permute.xlu0 %2822 }
0x1129   : > { %v5649_v13 = vpack.c.bf16 %v2575_v55, %v2574_v35  ;;  %v6000_v2 = vpop.eup %5999 }
0x112a   : > { %v2537_v44 = vmul.f32 %v6000_v2, %v6965_v11 }
0x112b   : > { %v2548_v26 = vpop.permute.xlu1 %2547  ;;  %5650 = vmatprep.subr.bf16.mxu1 %v5649_v13  ;;  %v2833_v55 = vpop.permute.xlu0 %2832 }
0x112c   : > { %5652 = vmatpush3.bf16.msra.mxu1 %v5649_v13  ;;  %v2556_v32 = vmul.f32 %v2548_v26, %v2536_v27 }
0x112f   : > { %v2552_v18 = vpop.permute.xlu1 %2551 }
0x1130   : > { %v2557_v54 = vmul.f32 %v2552_v18, %v2537_v44 }
0x1134   : > { %v2568_v39 = vpop.permute.xlu1 %2567 }
0x1135   : > { %v2576_v58 = vadd.f32 %v2568_v39, %v2556_v32 }
0x1138   : > { %v2572_v56 = vpop.permute.xlu1 %2571 }
0x1139   : > { %v2577_v61 = vadd.f32 %v2572_v56, %v2557_v54 }
0x113b   : > { %v5653_v14 = vpack.c.bf16 %v2577_v61, %v2576_v58 }
0x113d   : > { %5654 = vmatprep.subr.bf16.mxu1 %v5653_v14  ;;  %v2591_v11 = vpop.permute.xlu1 %2590 }
0x113e   : > { %5656 = vmatpush3.bf16.msra.mxu1 %v5653_v14 }
0x1141   : > { %5502 = vmatmul.mubr.msk.f32.vlgmr.msra.gmra.mrb[8].mxu1 %vm1441_vm13, %v5194_v40  ;;  %v2720_v45 = vpop.permute.xlu1 %2719 }
0x1145   : > { %v2725_v24 = vpop.permute.xlu1 %2724 }
0x1149   : > { %v2828_v23 = vpop.permute.xlu1 %2827 }
0x114d   : > { %v2838_v12 = vpop.permute.xlu1 %2837 }
0x1189   : > { %v5513_v29 = vpop.f32.mrb[14].mxu0 }
0x118a   : > { %v2799_v15 = vpop.f32.mrb[15].mxu0  ;;  %v2805_v63 = vadd.f32 %v5513_v29, %v2725_v24 }
0x118b   : > { %v2800_v21 = vadd.f32 %v2799_v15, %v2720_v45 }
0x1214   : > { %v5503_v48 = vpop.f32.mrb[8].mxu1 }
0x1215   : > { %v2692_v5 = vadd.f32 %v5503_v48, %v2596_v46  ;;  %v2686_v16 = vpop.f32.mrb[9].mxu1 }
0x1216   : > { %v2687_v1 = vadd.f32 %v2686_v16, %v2591_v11  ;;  %v5223_v16 = vld [vmem:[%s7823_s7 + $0x70] sm:$0xff] }
0x1217   : > { %v2710_v20 = vmul.f32 %v2708_v50, %v2692_v5  ;;  %v5224_v5 = vld [vmem:[%s7823_s7 + $0x78] sm:$0xff] }
0x1218   : > { %v2709_v57 = vmul.f32 %v2708_v50, %v2687_v1  ;;  %v5221_v50 = vld [vmem:[%s7823_s7 + $0x60] sm:$0xff] }
0x1219   : > { %v2712_v60 = vadd.f32 %v2710_v20, %v6842_v49  ;;  %v5214_v49 = vld [vmem:[%s7822_s19 + $0x70] sm:$0xff] }
0x121a   : > { %v2711_v22 = vadd.f32 %v2709_v57, %v6845_v31  ;;  %v5215_v31 = vld [vmem:[%s7822_s19 + $0x78] sm:$0xff]  ;;  %v5222_v57 = vld [vmem:[%s7823_s7 + $0x68] sm:$0xff] }
0x121b   : > { %v7054_v62 = vadd.f32 %v2805_v63, %v2712_v60 }
0x121c   : > { %v7056_v25 = vadd.f32 %v2800_v21, %v2711_v22 }
0x121e   : > { %v5661_v28 = vpack.c.bf16 %v7054_v62, %v7056_v25 }
0x1220   : > { %5662 = vmatprep.subr.bf16.mxu0 %v5661_v28 }
0x1221   : > { %5664 = vmatpush3.bf16.msra.mxu0 %v5661_v28 }
0x1224   : > { %5519 = vmatmul.mubr.msk.f32.vlgmr.msra.gmra.mrb[16].mxu0 %vm886_vm2, %v5213_v38 }
0x1225   : > { %5521 = vmatprep.mubr.msk.f32.mxu0 %vm886_vm2, %v5214_v49 }
0x1228   : > { %5522 = vmatmul.mubr.msk.f32.gmra.mrb[18].mxu0 %vm886_vm2, %v5215_v31 }
0x12f7   : > { %v5520_v47 = vpop.f32.mrb[16].mxu0 }
0x12f8   : > { %v2924_v37 = vadd.f32 %v5520_v47, %v2828_v23  ;;  %v2918_v34 = vpop.f32.mrb[17].mxu0 }
0x12f9   : > { %v2919_v3 = vadd.f32 %v2918_v34, %v2823_v10 }
0x12fa   : > { %v2944_v33 = vmul.f32 %v2942_v30, %v2924_v37  ;;  %vm2938_vm14 = vcmp.ge.f32.partialorder %v2924_v37, 0.0 }
0x12fb   : > { %v2943_v53 = vmul.f32 %v2942_v30, %v2919_v3  ;;  %v5523_v35 = vpop.f32.mrb[18].mxu0  ;;  %vm2937_vm15 = vcmp.ge.f32.partialorder %v2919_v3, 0.0 }
0x12fc   : > { %v2928_v13 = vpop.f32.mrb[19].mxu0  ;;  %v2948_v26 = vsel %vm2938_vm14, %v2924_v37, %v2944_v33  ;;  %v2934_v18 = vadd.f32 %v5523_v35, %v2838_v12 }
0x12fd   : > { %v2929_v9 = vadd.f32 %v2928_v13, %v2833_v55  ;;  %2953 = vadd.xlane.f32.xlu1 %v2948_v26  ;;  %v2947_v2 = vsel %vm2937_vm15, %v2919_v3, %v2943_v53 }
0x12fe   : > { %2951 = vadd.xlane.f32.xlu0 %v2947_v2  ;;  %v2946_v27 = vmul.f32 %v2942_v30, %v2934_v18  ;;  %vm2940_vm9 = vcmp.ge.f32.partialorder %v2934_v18, 0.0 }
0x12ff   : > { %v2945_v39 = vmul.f32 %v2942_v30, %v2929_v9  ;;  %vm2939_vm0 = vcmp.ge.f32.partialorder %v2929_v9, 0.0 }
0x1300   : > { %v2950_v32 = vsel %vm2940_vm9, %v2934_v18, %v2946_v27 }
0x1301   : > { %v2949_v44 = vsel %vm2939_vm0, %v2929_v9, %v2945_v39 }
0x1302   : > { %2955 = vadd.xlane.f32.xlu0 %v2949_v44 }
0x1306   : > { %2957 = vadd.xlane.f32.xlu0 %v2950_v32 }
0x130e   : > { %2996 = vperm.xlu1 %5883, %v7014_v51  }
0x1312   : > { %5885 = vset.pattern.permute.xlu1 %v6162_v36 }
0x138a   : > { %v2954_v54 = vpop.xlane.xlu1 %2953 }
0x138b   : > { %v2960_v56 = vmul.f32 0.0078125, %v2954_v54  ;;  %v2952_v58 = vpop.xlane.xlu0 %2951 }
0x138c   : > { %v2959_v61 = vmul.f32 0.0078125, %v2952_v58 }
0x138d   : > { %v7074_v14 = vsub.f32 %v2948_v26, %v2960_v56 }
0x138e   : > { %v7076_v40 = vsub.f32 %v2947_v2, %v2959_v61  ;;  %v2997_v63 = vpop.permute.xlu1 %2996 }
0x138f   : > { %v2956_v29 = vpop.xlane.xlu0 %2955  ;;  %v2968_v15 = vmul.f32 %v7074_v14, %v7074_v14 }
0x1390   : > { %v2967_v42 = vmul.f32 %v7076_v40, %v7076_v40  ;;  %v2961_v1 = vmul.f32 0.0078125, %v2956_v29 }
0x1391   : > { %2973 = vadd.xlane.f32.xlu0 %v2968_v15 }
0x1392   : > { %2971 = vadd.xlane.f32.xlu1 %v2967_v42  ;;  %v7109_v20 = vsub.f32 %v2949_v44, %v2961_v1 }
0x1393   : > { %v2958_v11 = vpop.xlane.xlu0 %2957 }
0x1394   : > { %v2962_v45 = vmul.f32 0.0078125, %v2958_v11  ;;  %v2969_v24 = vmul.f32 %v7109_v20, %v7109_v20 }
0x1396   : > { %v7082_v46 = vsub.f32 %v2950_v32, %v2962_v45 }
0x1398   : > { %v2970_v48 = vmul.f32 %v7082_v46, %v7082_v46 }
0x139a   : > { %2977 = vadd.xlane.f32.xlu0 %v2970_v48 }
0x13a3   : > { %3016 = vperm.xlu1 %5885, %v7014_v51  }
0x13a7   : > { %3020 = vperm.xlu1 %5885, %v7028_v17  }
0x13ab   : > { %5886 = vset.pattern.permute.xlu1 %v6161_v6 }
0x13ac   : > { %3004 = vperm.xlu1 %5886, %v7023_v59  }
0x13b0   : > { %3008 = vperm.xlu1 %5886, %v7035_v19   ;;  %3000 = vperm.xlu0 %5884, %v7028_v17  }
0x13b4   : > { %5887 = vset.pattern.permute.xlu1 %v6162_v36  ;;  %3089 = vperm.xlu0 %5884, %v5221_v50  }
0x13b5   : > { %3024 = vperm.xlu1 %5887, %v7023_v59  }
0x13b8   : > { %5892 = vset.pattern.permute.xlu0 %v6160_v4 }
0x13b9   : > { %3081 = vperm.xlu0 %5892, %v5224_v5  }
0x13bd   : > { %5893 = vset.pattern.permute.xlu0 %v6162_v36 }
0x13be   : > { %3113 = vperm.xlu0 %5893, %v5221_v50  }
0x13c2   : > { %3121 = vperm.xlu0 %5893, %v5223_v16  }
0x13c6   : > { %5897 = vset.pattern.permute.xlu0 %v6163_v41 }
0x13c7   : > { %3141 = vperm.xlu0 %5897, %v7028_v17  }
0x13cb   : > { %3145 = vperm.xlu0 %5897, %v7023_v59  }
0x13cf   : > { %5898 = vset.pattern.permute.xlu0 %v6166_v52 }
0x13d9   : > { %2975 = vadd.xlane.f32.xlu1 %v2969_v24 }
0x13ea   : > { %3028 = vperm.xlu1 %5887, %v7035_v19  }
0x13ee   : > { %5888 = vset.pattern.permute.xlu1 %v6160_v4 }
0x13ef   : > { %3066 = vperm.xlu1 %5888, %v5221_v50  }
0x13f3   : > { %3071 = vperm.xlu1 %5888, %v5222_v57  }
0x13f7   : > { %5889 = vset.pattern.permute.xlu1 %v6161_v6 }
0x13f8   : > { %3093 = vperm.xlu1 %5889, %v5222_v57  }
0x13fc   : > { %5890 = vset.pattern.permute.xlu1 %v6162_v36 }
0x13fd   : > { %3117 = vperm.xlu1 %5890, %v5222_v57  }
0x1401   : > { %5891 = vset.pattern.permute.xlu1 %v6160_v4 }
0x1402   : > { %3076 = vperm.xlu1 %5891, %v5223_v16  }
0x1406   : > { %5894 = vset.pattern.permute.xlu1 %v6161_v6 }
0x1407   : > { %3097 = vperm.xlu1 %5894, %v5223_v16  }
0x140b   : > { %3101 = vperm.xlu1 %5894, %v5224_v5  }
0x140f   : > { %5895 = vset.pattern.permute.xlu1 %v6162_v36 }
0x1410   : > { %3125 = vperm.xlu1 %5895, %v5224_v5  }
0x1414   : > { %5896 = vset.pattern.permute.xlu1 %v6163_v41 }
0x1415   : > { %3137 = vperm.xlu1 %5896, %v7014_v51  }
0x1419   : > { %3149 = vperm.xlu1 %5896, %v7035_v19  }
0x141d   : > { %5899 = vset.pattern.permute.xlu1 %v6166_v52 }
0x141e   : > { %v2974_v60 = vpop.xlane.xlu0 %2973 }
0x141f   : > { %v2980_v21 = vmul.f32 0.0078125, %v2974_v60  ;;  %v2972_v22 = vpop.xlane.xlu1 %2971 }
0x1420   : > { %v2979_v28 = vmul.f32 0.0078125, %v2972_v22 }
0x1421   : > { %v2984_v38 = vadd.f32 1e-08, %v2980_v21 }
0x1422   : > { %v2983_v49 = vadd.f32 1e-08, %v2979_v28 }
0x1423   : > { %6001 = vrsqrt.f32 %v2984_v38  ;;  %v3017_v31 = vpop.permute.xlu1 %3016 }
0x1424   : > { %6003 = vrsqrt.f32 %v2983_v49 }
0x1427   : > { %v2978_v23 = vpop.xlane.xlu0 %2977  ;;  %v3021_v12 = vpop.permute.xlu1 %3020 }
0x1428   : > { %v2982_v55 = vmul.f32 0.0078125, %v2978_v23 }
0x142a   : > { %v2986_v13 = vadd.f32 1e-08, %v2982_v55 }
0x142b   : > { %v3005_v26 = vpop.permute.xlu1 %3004 }
0x142c   : > { %6005 = vrsqrt.f32 %v2986_v13  ;;  %v3161_v13 = vstv %s5225_s1  ;;  %s5251_s1 = sld [smem:[#allocation3 + $0x200]] }
0x142d   : > { %v6002_v10 = vpop.eup %6001 }
0x142e   : > { %v6004_v47 = vpop.eup %6003  ;;  %v2992_v30 = vmul.f32 %v6002_v10, %v7074_v14 }
0x142f   : > { %v2991_v37 = vmul.f32 %v6004_v47, %v7076_v40  ;;  %v3001_v34 = vpop.permute.xlu0 %3000  ;;  %v3009_v18 = vpop.permute.xlu1 %3008 }
0x1430   : > { %v3012_v3 = vmul.f32 %v3001_v34, %v2992_v30 }
0x1431   : > { %v3011_v33 = vmul.f32 %v2997_v63, %v2991_v37 }
0x1432   : > { %v3032_v53 = vadd.f32 %v3021_v12, %v3012_v3 }
0x1433   : > { %v3031_v35 = vadd.f32 %v3017_v31, %v3011_v33  ;;  %v3090_v48 = vpop.permute.xlu0 %3089 }
0x1434   : > { %3042 = vrot.lane.b32.xlu1 %v3032_v53, %s7825_s4  ;;  %v3025_v2 = vpop.permute.xlu1 %3024 }
0x1435   : > { %3040 = vrot.lane.b32.xlu0 %v3031_v35, %s7825_s4  ;;  %v3104_v3 = vmul.f32 %v3090_v48, %v3031_v35 }
0x1436   : > { %v6006_v9 = vpop.eup %6005 }
0x1437   : > { %v2994_v39 = vmul.f32 %v6006_v9, %v7082_v46 }
0x1438   : > { %3054 = vrot.lane.b32.xlu1 %v3032_v53, %s7826_s5  ;;  %v3082_v50 = vpop.permute.xlu0 %3081 }
0x1439   : > { %v3014_v32 = vmul.f32 %v3009_v18, %v2994_v39 }
0x143c   : > { %3052 = vrot.lane.b32.xlu1 %v3031_v35, %s7826_s5 }
0x143d   : > { %v3114_v16 = vpop.permute.xlu0 %3113 }
0x1441   : > { %v3122_v57 = vpop.permute.xlu0 %3121 }
0x1446   : > { %v3142_v60 = vpop.permute.xlu0 %3141 }
0x1466   : > { %v2976_v27 = vpop.xlane.xlu1 %2975 }
0x1467   : > { %v2981_v44 = vmul.f32 0.0078125, %v2976_v27 }
0x1469   : > { %v2985_v54 = vadd.f32 1e-08, %v2981_v44 }
0x146a   : > { %v3029_v56 = vpop.permute.xlu1 %3028 }
0x146b   : > { %6007 = vrsqrt.f32 %v2985_v54  ;;  %v3034_v58 = vadd.f32 %v3029_v56, %v3014_v32 }
0x146d   : > { %3046 = vrot.lane.b32.xlu1 %v3034_v58, %s7825_s4 }
0x146e   : > { %v3067_v61 = vpop.permute.xlu1 %3066 }
0x1471   : > { %3058 = vrot.lane.b32.xlu1 %v3034_v58, %s7826_s5 }
0x1472   : > { %v3072_v14 = vpop.permute.xlu1 %3071 }
0x1475   : > { %v6008_v40 = vpop.eup %6007 }
0x1476   : > { %v2993_v29 = vmul.f32 %v6008_v40, %v7109_v20  ;;  %v3146_v20 = vpop.permute.xlu0 %3145 }
0x1477   : > { %v3094_v42 = vpop.permute.xlu1 %3093 }
0x1478   : > { %v3013_v15 = vmul.f32 %v3005_v26, %v2993_v29  ;;  %v3105_v23 = vmul.f32 %v3094_v42, %v3032_v53 }
0x147a   : > { %v3033_v11 = vadd.f32 %v3025_v2, %v3013_v15 }
0x147c   : > { %3044 = vrot.lane.b32.xlu0 %v3033_v11, %s7825_s4  ;;  %v3118_v45 = vpop.permute.xlu1 %3117  ;;  %s701_s4 = sand.u32 1, %s6148_s30  }
0x1480   : > { %3056 = vrot.lane.b32.xlu0 %v3033_v11, %s7826_s5  ;;  %s7827_s5 = smov 2  }
0x1481   : > { %v3077_v46 = vpop.permute.xlu1 %3076 }
0x1486   : > { %v3098_v5 = vpop.permute.xlu1 %3097 }
0x1487   : > { %v3106_v48 = vmul.f32 %v3098_v5, %v3033_v11 }
0x148a   : > { %v3102_v1 = vpop.permute.xlu1 %3101 }
0x148b   : > { %v3107_v15 = vmul.f32 %v3102_v1, %v3034_v58 }
0x148f   : > { %v3126_v24 = vpop.permute.xlu1 %3125 }
0x1494   : > { %v3138_v63 = vpop.permute.xlu1 %3137 }
0x1498   : > { %v3150_v21 = vpop.permute.xlu1 %3149 }
0x14a6   : > { %v3043_v22 = vpop.permute.xlu1 %3042 }
0x14a7   : > { %v3049_v28 = vsel %vm731_vm7, %v3043_v22, 0.0  ;;  %v3041_v38 = vpop.permute.xlu0 %3040 }
0x14a8   : > { %v3085_v49 = vmul.f32 %v3072_v14, %v3049_v28  ;;  %v3048_v31 = vsel %vm731_vm7, %v3041_v38, 0.0 }
0x14a9   : > { %v3084_v37 = vmul.f32 %v3067_v61, %v3048_v31 }
0x14aa   : > { %v3055_v10 = vpop.permute.xlu1 %3054  ;;  %v3109_v30 = vadd.f32 %v3105_v23, %v3085_v49 }
0x14ab   : > { %v3061_v47 = vsel %vm734_vm8, %v3055_v10, 0.0  ;;  %v3108_v26 = vadd.f32 %v3104_v3, %v3084_v37 }
0x14ac   : > { %v3129_v34 = vmul.f32 %v3118_v45, %v3061_v47 }
0x14ae   : > { %v3133_v33 = vadd.f32 %v3129_v34, %v3109_v30  ;;  %v3053_v12 = vpop.permute.xlu1 %3052 }
0x14af   : > { %v3060_v55 = vsel %vm734_vm8, %v3053_v12, 0.0 }
0x14b0   : > { %v3128_v18 = vmul.f32 %v3114_v16, %v3060_v55  ;;  %v3153_v9 = vadd.f32 %v3142_v60, %v3133_v33 }
0x14b2   : > { %v3132_v2 = vadd.f32 %v3128_v18, %v3108_v26  ;;  %vm3157_vm10 = vcmp.ge.f32.partialorder %v3153_v9, 0.0  ;;  %v3163_v53 = vmul.f32 %v3161_v13, %v3153_v9  ;;  %v5231_v26 = vld [vmem:[%s7750_s10 + $0x68] sm:$0xff]  ;;  %v7205_v18 = vld [vmem:[%s7749_s9 + $0x80] sm:$0xff] }
0x14b4   : > { %v3167_v39 = vsel %vm3157_vm10, %v3153_v9, %v3163_v53  ;;  %v3152_v27 = vadd.f32 %v3138_v63, %v3132_v2  ;;  %v7210_v9 = vld [vmem:[%s7749_s9 + $0x90] sm:$0xff]  ;;  %v7217_v2 = vld [vmem:[%s7749_s9 + $0x88] sm:$0xff]  ;;  %v7224_v53 = vld [vmem:[%s7749_s9 + $0x98] sm:$0xff] }
0x14b5   : > { %3172 = vadd.xlane.f32.xlu1 %v3167_v39 }
0x14b6   : > { %vm3156_vm11 = vcmp.ge.f32.partialorder %v3152_v27, 0.0  ;;  %v3162_v44 = vmul.f32 %v3161_v13, %v3152_v27 }
0x14b8   : > { %v3166_v32 = vsel %vm3156_vm11, %v3152_v27, %v3162_v44 }
0x14b9   : > { %3170 = vadd.xlane.f32.xlu0 %v3166_v32 }
0x14df   : > { %v3047_v35 = vpop.permute.xlu1 %3046 }
0x14e0   : > { %v3051_v56 = vsel %vm731_vm7, %v3047_v35, 0.0 }
0x14e1   : > { %v3087_v14 = vmul.f32 %v3082_v50, %v3051_v56 }
0x14e3   : > { %v3059_v54 = vpop.permute.xlu1 %3058  ;;  %v3111_v16 = vadd.f32 %v3107_v15, %v3087_v14 }
0x14e4   : > { %v3063_v61 = vsel %vm734_vm8, %v3059_v54, 0.0 }
0x14e5   : > { %v3131_v42 = vmul.f32 %v3126_v24, %v3063_v61 }
0x14e7   : > { %v3135_v22 = vadd.f32 %v3131_v42, %v3111_v16 }
0x14e9   : > { %v3155_v23 = vadd.f32 %v3150_v21, %v3135_v22 }
0x14eb   : > { %v3165_v47 = vmul.f32 %v3161_v13, %v3155_v23 }
0x14ee   : > { %v3045_v40 = vpop.permute.xlu0 %3044 }
0x14ef   : > { %v3050_v29 = vsel %vm731_vm7, %v3045_v40, 0.0  ;;  %vm3159_vm7 = vcmp.ge.f32.partialorder %v3155_v23, 0.0 }
0x14f0   : > { %v3086_v45 = vmul.f32 %v3077_v46, %v3050_v29  ;;  %v3169_v58 = vsel %vm3159_vm7, %v3155_v23, %v3165_v47 }
0x14f2   : > { %v3057_v63 = vpop.permute.xlu0 %3056  ;;  %v3110_v28 = vadd.f32 %v3106_v48, %v3086_v45 }
0x14f3   : > { %v3062_v60 = vsel %vm734_vm8, %v3057_v63, 0.0 }
0x14f4   : > { %v3130_v38 = vmul.f32 %v3122_v57, %v3062_v60 }
0x14f6   : > { %v3134_v49 = vadd.f32 %v3130_v38, %v3110_v28 }
0x14f8   : > { %v3154_v31 = vadd.f32 %v3146_v20, %v3134_v49 }
0x14fa   : > { %vm3158_vm12 = vcmp.ge.f32.partialorder %v3154_v31, 0.0  ;;  %v3164_v50 = vmul.f32 %v3161_v13, %v3154_v31 }
0x14fc   : > { %v3168_v10 = vsel %vm3158_vm12, %v3154_v31, %v3164_v50 }
0x14fd   : > { %3174 = vadd.xlane.f32.xlu0 %v3168_v10 }
0x1501   : > { %3176 = vadd.xlane.f32.xlu0 %v3169_v58 }
0x1542   : > { %v3173_v11 = vpop.xlane.xlu1 %3172 }
0x1543   : > { %v3179_v46 = vmul.f32 0.0078125, %v3173_v11 }
0x1545   : > { %v7155_v5 = vsub.f32 %v3167_v39, %v3179_v46 }
0x1546   : > { %v3171_v1 = vpop.xlane.xlu0 %3170 }
0x1547   : > { %v3178_v24 = vmul.f32 0.0078125, %v3171_v1  ;;  %v3187_v57 = vmul.f32 %v7155_v5, %v7155_v5 }
0x1549   : > { %v7159_v30 = vsub.f32 %v3166_v32, %v3178_v24  ;;  %3192 = vadd.xlane.f32.xlu1 %v3187_v57 }
0x154b   : > { %v3186_v21 = vmul.f32 %v7159_v30, %v7159_v30 }
0x154d   : > { %3190 = vadd.xlane.f32.xlu0 %v3186_v21 }
0x158a   : > { %v3175_v20 = vpop.xlane.xlu0 %3174 }
0x158b   : > { %v3180_v37 = vmul.f32 0.0078125, %v3175_v20 }
0x158d   : > { %v7163_v34 = vsub.f32 %v3168_v10, %v3180_v37 }
0x158e   : > { %v3177_v3 = vpop.xlane.xlu0 %3176 }
0x158f   : > { %v3181_v33 = vmul.f32 0.0078125, %v3177_v3  ;;  %v3188_v12 = vmul.f32 %v7163_v34, %v7163_v34  ;;  %v5227_v3 = vld [vmem:[%s7748_s8 + $0x68] sm:$0xff] }
0x1591   : > { %v7167_v55 = vsub.f32 %v3169_v58, %v3181_v33  ;;  %3194 = vadd.xlane.f32.xlu0 %v3188_v12 }
0x1593   : > { %v3189_v13 = vmul.f32 %v7167_v55, %v7167_v55 }
0x1595   : > { %3196 = vadd.xlane.f32.xlu1 %v3189_v13 }
0x15a6   : > { %3219 = vperm.xlu1 %5899, %v7028_v17  }
0x15a7   : > { %3215 = vperm.xlu0 %5898, %v7014_v51  }
0x15aa   : > { %5900 = vset.pattern.permute.xlu1 %v6167_v0 }
0x15ab   : > { %3235 = vperm.xlu1 %5900, %v7014_v51   ;;  %5904 = vset.pattern.permute.xlu0 %v6160_v4  ;;  %v5195_v51 = vld [vmem:[%s7748_s8 + $0x50] sm:$0xff] }
0x15ac   : > { %5504 = vmatprep.mubr.msk.f32.mxu1 %vm1441_vm13, %v5195_v51  ;;  %3271 = vperm.xlu0 %5904, %v5231_v26  }
0x15af   : > { %3239 = vperm.xlu1 %5900, %v7028_v17   ;;  %v5196_v17 = vld [vmem:[%s7748_s8 + $0x58] sm:$0xff] }
0x15b0   : > { %5505 = vmatmul.mubr.msk.f32.gmra.mrb[4].mxu1 %vm1441_vm13, %v5196_v17  ;;  %3411 = vperm.xlu0 %5904, %v7210_v9  }
0x15b3   : > { %5901 = vset.pattern.permute.xlu1 %v6166_v52 }
0x15b4   : > { %3223 = vperm.xlu1 %5901, %v7023_v59   ;;  %5906 = vset.pattern.permute.xlu0 %v6161_v6 }
0x15b8   : > { %3227 = vperm.xlu1 %5901, %v7035_v19  }
0x15bc   : > { %5902 = vset.pattern.permute.xlu1 %v6167_v0 }
0x15bd   : > { %3243 = vperm.xlu1 %5902, %v7023_v59   ;;  %v5226_v59 = vld [vmem:[%s7748_s8 + $0x60] sm:$0xff] }
0x15be   : > { %5532 = vmatprep.mubr.msk.f32.mxu1 %vm1441_vm13, %v5226_v59 }
0x15c1   : > { %3247 = vperm.xlu1 %5902, %v7035_v19   ;;  %v5230_v19 = vld [vmem:[%s7750_s10 + $0x60] sm:$0xff] }
0x15c5   : > { %5903 = vset.pattern.permute.xlu1 %v6160_v4 }
0x15c6   : > { %3266 = vperm.xlu1 %5903, %v5230_v19  }
0x15ca   : > { %3401 = vperm.xlu1 %5903, %v7205_v18  }
0x15ce   : > { %3406 = vperm.xlu1 %5903, %v7217_v2  }
0x15d2   : > { %3416 = vperm.xlu1 %5903, %v7224_v53  }
0x15d6   : > { %5905 = vset.pattern.permute.xlu1 %v6161_v6  ;;  %v3193_v39 = vpop.xlane.xlu1 %3192 }
0x15d7   : > { %v3199_v44 = vmul.f32 0.0078125, %v3193_v39 }
0x15d9   : > { %v3203_v35 = vadd.f32 1e-08, %v3199_v44 }
0x15da   : > { %v3191_v27 = vpop.xlane.xlu0 %3190 }
0x15db   : > { %v3198_v32 = vmul.f32 0.0078125, %v3191_v27  ;;  %6009 = vrsqrt.f32 %v3203_v35  ;;  %v5245_v35 = vld [vmem:[%s7822_s19 + $0x90] sm:$0xff] }
0x15dd   : > { %v3202_v54 = vadd.f32 1e-08, %v3198_v32  ;;  %v5244_v32 = vld [vmem:[%s7822_s19 + $0x88] sm:$0xff] }
0x15df   : > { %6011 = vrsqrt.f32 %v3202_v54 }
0x15e5   : > { %v6010_v40 = vpop.eup %6009 }
0x15e6   : > { %v3211_v63 = vmul.f32 %v6010_v40, %v7155_v5 }
0x15e9   : > { %v6012_v15 = vpop.eup %6011 }
0x15ea   : > { %v3210_v60 = vmul.f32 %v6012_v15, %v7159_v30 }
0x161e   : > { %v3195_v61 = vpop.xlane.xlu0 %3194 }
0x161f   : > { %v3200_v29 = vmul.f32 0.0078125, %v3195_v61  ;;  %v3521_v61 = vstv %s5251_s1  ;;  %s7828_s1 = smov 126  }
0x1621   : > { %v3204_v16 = vadd.f32 1e-08, %v3200_v29 }
0x1622   : > { %v3197_v56 = vpop.xlane.xlu1 %3196 }
0x1623   : > { %v3201_v42 = vmul.f32 0.0078125, %v3197_v56  ;;  %6013 = vrsqrt.f32 %v3204_v16 }
0x1625   : > { %v3205_v22 = vadd.f32 1e-08, %v3201_v42 }
0x1626   : > { %v3220_v14 = vpop.permute.xlu1 %3219  ;;  %v3216_v45 = vpop.permute.xlu0 %3215 }
0x1627   : > { %v3231_v28 = vmul.f32 %v3220_v14, %v3211_v63  ;;  %v3230_v38 = vmul.f32 %v3216_v45, %v3210_v60  ;;  %6015 = vrsqrt.f32 %v3205_v22 }
0x162a   : > { %v3236_v48 = vpop.permute.xlu1 %3235 }
0x162b   : > { %v3250_v31 = vadd.f32 %v3236_v48, %v3230_v38  ;;  %v3272_v33 = vpop.permute.xlu0 %3271 }
0x162d   : > { %v6014_v58 = vpop.eup %6013 }
0x162e   : > { %v3240_v49 = vpop.permute.xlu1 %3239  ;;  %v3212_v5 = vmul.f32 %v6014_v58, %v7163_v34  ;;  %v5243_v34 = vld [vmem:[%s7822_s19 + $0x80] sm:$0xff] }
0x162f   : > { %v3251_v23 = vadd.f32 %v3240_v49, %v3231_v28  ;;  %5542 = vmatprep.mubr.msk.f32.mxu0 %vm886_vm2, %v5243_v34  ;;  %v3412_v16 = vpop.permute.xlu0 %3411  ;;  %v5255_v34 = vld [vmem:[%s7823_s7 + $0x98] sm:$0xff] }
0x1631   : > { %v5665_v50 = vpack.c.bf16 %v3251_v23, %v3250_v31  ;;  %v6016_v11 = vpop.eup %6015 }
0x1632   : > { %v3213_v1 = vmul.f32 %v6016_v11, %v7167_v55  ;;  %v3384_v55 = vstv %s5238_s27  ;;  %s7831_s27 = sld [smem:[#allocation18_spill]] }
0x1633   : > { %v3224_v10 = vpop.permute.xlu1 %3223  ;;  %5666 = vmatprep.subr.bf16.mxu1 %v5665_v50 }
0x1634   : > { %5668 = vmatpush3.bf16.msra.mxu1 %v5665_v50  ;;  %v3232_v24 = vmul.f32 %v3224_v10, %v3212_v5 }
0x1637   : > { %v3228_v47 = vpop.permute.xlu1 %3227 }
0x1638   : > { %v3233_v57 = vmul.f32 %v3228_v47, %v3213_v1 }
0x163c   : > { %v3244_v46 = vpop.permute.xlu1 %3243 }
0x163d   : > { %v3252_v21 = vadd.f32 %v3244_v46, %v3232_v24 }
0x1640   : > { %v3248_v30 = vpop.permute.xlu1 %3247 }
0x1641   : > { %v3253_v20 = vadd.f32 %v3248_v30, %v3233_v57 }
0x1643   : > { %v5669_v37 = vpack.c.bf16 %v3253_v20, %v3252_v21 }
0x1645   : > { %5670 = vmatprep.subr.bf16.mxu1 %v5669_v37  ;;  %v3267_v13 = vpop.permute.xlu1 %3266 }
0x1646   : > { %5672 = vmatpush3.bf16.msra.mxu1 %v5669_v37 }
0x1649   : > { %5533 = vmatmul.mubr.msk.f32.vlgmr.msra.gmra.mrb[10].mxu1 %vm1441_vm13, %v5227_v3  ;;  %v5252_v3 = vld [vmem:[%s7823_s7 + $0x80] sm:$0xff] }
0x171c   : > { %v5534_v12 = vpop.f32.mrb[10].mxu1 }
0x171d   : > { %v3368_v51 = vadd.f32 %v5534_v12, %v3272_v33  ;;  %v3362_v17 = vpop.f32.mrb[11].mxu1  ;;  %v5254_v33 = vld [vmem:[%s7823_s7 + $0x90] sm:$0xff] }
0x171e   : > { %v3363_v59 = vadd.f32 %v3362_v17, %v3267_v13 }
0x171f   : > { %v3386_v19 = vmul.f32 %v3384_v55, %v3368_v51  ;;  %v5253_v51 = vld [vmem:[%s7823_s7 + $0x88] sm:$0xff] }
0x1720   : > { %v3385_v26 = vmul.f32 %v3384_v55, %v3363_v59 }
0x1721   : > { %v7241_v39 = vadd.f32 %v3386_v19, %v7054_v62  ;;  %v5246_v62 = vld [vmem:[%s7822_s19 + $0x98] sm:$0xff] }
0x1722   : > { %v7244_v27 = vadd.f32 %v3385_v26, %v7056_v25  ;;  %v3402_v25 = vpop.permute.xlu1 %3401 }
0x1724   : > { %v5673_v44 = vpack.c.bf16 %v7241_v39, %v7244_v27 }
0x1726   : > { %5674 = vmatprep.subr.bf16.mxu0 %v5673_v44  ;;  %v3407_v54 = vpop.permute.xlu1 %3406 }
0x1727   : > { %5676 = vmatpush3.bf16.msra.mxu0 %v5673_v44 }
0x172a   : > { %5543 = vmatmul.mubr.msk.f32.vlgmr.msra.gmra.mrb[20].mxu0 %vm886_vm2, %v5244_v32  ;;  %v3417_v42 = vpop.permute.xlu1 %3416 }
0x172b   : > { %5545 = vmatprep.mubr.msk.f32.mxu0 %vm886_vm2, %v5245_v35 }
0x172e   : > { %5546 = vmatmul.mubr.msk.f32.gmra.mrb[22].mxu0 %vm886_vm2, %v5246_v62 }
0x17fd   : > { %v5544_v56 = vpop.f32.mrb[20].mxu0 }
0x17fe   : > { %v3503_v14 = vadd.f32 %v5544_v56, %v3407_v54  ;;  %v3497_v40 = vpop.f32.mrb[21].mxu0 }
0x17ff   : > { %v3498_v29 = vadd.f32 %v3497_v40, %v3402_v25 }
0x1800   : > { %v3523_v15 = vmul.f32 %v3521_v61, %v3503_v14  ;;  %vm3517_vm8 = vcmp.ge.f32.partialorder %v3503_v14, 0.0 }
0x1801   : > { %v3522_v45 = vmul.f32 %v3521_v61, %v3498_v29  ;;  %v5547_v48 = vpop.f32.mrb[22].mxu0  ;;  %vm3516_vm14 = vcmp.ge.f32.partialorder %v3498_v29, 0.0 }
0x1802   : > { %v3507_v63 = vpop.f32.mrb[23].mxu0  ;;  %v3527_v60 = vsel %vm3517_vm8, %v3503_v14, %v3523_v15  ;;  %v3513_v22 = vadd.f32 %v5547_v48, %v3417_v42 }
0x1803   : > { %v3508_v28 = vadd.f32 %v3507_v63, %v3412_v16  ;;  %3532 = vadd.xlane.f32.xlu1 %v3527_v60  ;;  %v3526_v38 = vsel %vm3516_vm14, %v3498_v29, %v3522_v45 }
0x1804   : > { %3530 = vadd.xlane.f32.xlu0 %v3526_v38  ;;  %v3525_v31 = vmul.f32 %v3521_v61, %v3513_v22  ;;  %vm3519_vm0 = vcmp.ge.f32.partialorder %v3513_v22, 0.0 }
0x1805   : > { %v3524_v49 = vmul.f32 %v3521_v61, %v3508_v28  ;;  %vm3518_vm15 = vcmp.ge.f32.partialorder %v3508_v28, 0.0 }
0x1806   : > { %v3529_v50 = vsel %vm3519_vm0, %v3513_v22, %v3525_v31 }
0x1807   : > { %v3528_v23 = vsel %vm3518_vm15, %v3508_v28, %v3524_v49 }
0x1808   : > { %3534 = vadd.xlane.f32.xlu0 %v3528_v23 }
0x180c   : > { %3536 = vadd.xlane.f32.xlu0 %v3529_v50 }
0x1814   : > { %3575 = vperm.xlu1 %5905, %v7205_v18  }
0x1818   : > { %5907 = vset.pattern.permute.xlu1 %v6162_v36 }
0x1890   : > { %v3533_v10 = vpop.xlane.xlu1 %3532 }
0x1891   : > { %v3539_v47 = vmul.f32 0.0078125, %v3533_v10  ;;  %v3531_v58 = vpop.xlane.xlu0 %3530 }
0x1892   : > { %v3538_v11 = vmul.f32 0.0078125, %v3531_v58 }
0x1893   : > { %v7262_v46 = vsub.f32 %v3527_v60, %v3539_v47 }
0x1894   : > { %v7264_v5 = vsub.f32 %v3526_v38, %v3538_v11  ;;  %v3576_v17 = vpop.permute.xlu1 %3575 }
0x1895   : > { %v3535_v1 = vpop.xlane.xlu0 %3534  ;;  %v3547_v24 = vmul.f32 %v7262_v46, %v7262_v46 }
0x1896   : > { %v3546_v57 = vmul.f32 %v7264_v5, %v7264_v5  ;;  %v3540_v12 = vmul.f32 0.0078125, %v3535_v1 }
0x1897   : > { %3552 = vadd.xlane.f32.xlu0 %v3547_v24 }
0x1898   : > { %3550 = vadd.xlane.f32.xlu1 %v3546_v57  ;;  %v7297_v55 = vsub.f32 %v3528_v23, %v3540_v12 }
0x1899   : > { %v3537_v30 = vpop.xlane.xlu0 %3536 }
0x189a   : > { %v3541_v21 = vmul.f32 0.0078125, %v3537_v30  ;;  %v3548_v13 = vmul.f32 %v7297_v55, %v7297_v55 }
0x189c   : > { %v7270_v20 = vsub.f32 %v3529_v50, %v3541_v21 }
0x189e   : > { %v3549_v37 = vmul.f32 %v7270_v20, %v7270_v20 }
0x18a0   : > { %3556 = vadd.xlane.f32.xlu0 %v3549_v37 }
0x18a9   : > { %3595 = vperm.xlu1 %5907, %v7205_v18  }
0x18ad   : > { %3599 = vperm.xlu1 %5907, %v7217_v2  }
0x18b1   : > { %5908 = vset.pattern.permute.xlu1 %v6161_v6 }
0x18b2   : > { %3583 = vperm.xlu1 %5908, %v7210_v9  }
0x18b6   : > { %3587 = vperm.xlu1 %5908, %v7224_v53   ;;  %3579 = vperm.xlu0 %5906, %v7217_v2  }
0x18ba   : > { %5909 = vset.pattern.permute.xlu1 %v6162_v36  ;;  %3668 = vperm.xlu0 %5906, %v5252_v3  }
0x18bb   : > { %3603 = vperm.xlu1 %5909, %v7210_v9  }
0x18be   : > { %5914 = vset.pattern.permute.xlu0 %v6160_v4 }
0x18bf   : > { %3660 = vperm.xlu0 %5914, %v5255_v34  }
0x18c3   : > { %5915 = vset.pattern.permute.xlu0 %v6162_v36 }
0x18c4   : > { %3692 = vperm.xlu0 %5915, %v5252_v3  }
0x18c8   : > { %3700 = vperm.xlu0 %5915, %v5254_v33  }
0x18cc   : > { %5919 = vset.pattern.permute.xlu0 %v6163_v41 }
0x18cd   : > { %3720 = vperm.xlu0 %5919, %v7217_v2  }
0x18d1   : > { %3724 = vperm.xlu0 %5919, %v7210_v9  }
0x18d5   : > { %5920 = vset.pattern.permute.xlu0 %v6166_v52 }
0x18df   : > { %3554 = vadd.xlane.f32.xlu1 %v3548_v13 }
0x18f0   : > { %3607 = vperm.xlu1 %5909, %v7224_v53  }
0x18f4   : > { %5910 = vset.pattern.permute.xlu1 %v6160_v4 }
0x18f5   : > { %3645 = vperm.xlu1 %5910, %v5252_v3  }
0x18f9   : > { %3650 = vperm.xlu1 %5910, %v5253_v51  }
0x18fd   : > { %5911 = vset.pattern.permute.xlu1 %v6161_v6 }
0x18fe   : > { %3672 = vperm.xlu1 %5911, %v5253_v51  }
0x1902   : > { %5912 = vset.pattern.permute.xlu1 %v6162_v36 }
0x1903   : > { %3696 = vperm.xlu1 %5912, %v5253_v51  }
0x1907   : > { %5913 = vset.pattern.permute.xlu1 %v6160_v4 }
0x1908   : > { %3655 = vperm.xlu1 %5913, %v5254_v33  }
0x190c   : > { %5916 = vset.pattern.permute.xlu1 %v6161_v6 }
0x190d   : > { %3676 = vperm.xlu1 %5916, %v5254_v33  }
0x1911   : > { %3680 = vperm.xlu1 %5916, %v5255_v34  }
0x1915   : > { %5917 = vset.pattern.permute.xlu1 %v6162_v36 }
0x1916   : > { %3704 = vperm.xlu1 %5917, %v5255_v34  }
0x191a   : > { %5918 = vset.pattern.permute.xlu1 %v6163_v41 }
0x191b   : > { %3716 = vperm.xlu1 %5918, %v7205_v18  }
0x191f   : > { %3728 = vperm.xlu1 %5918, %v7224_v53  }
0x1923   : > { %5921 = vset.pattern.permute.xlu1 %v6166_v52 }
0x1924   : > { %v3553_v59 = vpop.xlane.xlu0 %3552 }
0x1925   : > { %v3559_v19 = vmul.f32 0.0078125, %v3553_v59  ;;  %v3551_v26 = vpop.xlane.xlu1 %3550 }
0x1926   : > { %v3558_v44 = vmul.f32 0.0078125, %v3551_v26 }
0x1927   : > { %v3563_v32 = vadd.f32 1e-08, %v3559_v19 }
0x1928   : > { %v3562_v35 = vadd.f32 1e-08, %v3558_v44 }
0x1929   : > { %6017 = vrsqrt.f32 %v3563_v32  ;;  %v3596_v62 = vpop.permute.xlu1 %3595 }
0x192a   : > { %6019 = vrsqrt.f32 %v3562_v35 }
0x192d   : > { %v3557_v25 = vpop.xlane.xlu0 %3556  ;;  %v3600_v42 = vpop.permute.xlu1 %3599 }
0x192e   : > { %v3561_v16 = vmul.f32 0.0078125, %v3557_v25 }
0x1930   : > { %v3565_v63 = vadd.f32 1e-08, %v3561_v16 }
0x1931   : > { %v3584_v60 = vpop.permute.xlu1 %3583 }
0x1932   : > { %6021 = vrsqrt.f32 %v3565_v63  ;;  %v3740_v63 = vstv %s5256_s26  ;;  %s5282_s26 = sld [smem:[#allocation3 + $0x280]] }
0x1933   : > { %v6018_v54 = vpop.eup %6017 }
0x1934   : > { %v6020_v56 = vpop.eup %6019  ;;  %v3571_v61 = vmul.f32 %v6018_v54, %v7262_v46 }
0x1935   : > { %v3570_v14 = vmul.f32 %v6020_v56, %v7264_v5  ;;  %v3580_v40 = vpop.permute.xlu0 %3579  ;;  %v3588_v22 = vpop.permute.xlu1 %3587 }
0x1936   : > { %v3591_v29 = vmul.f32 %v3580_v40, %v3571_v61 }
0x1937   : > { %v3590_v15 = vmul.f32 %v3576_v17, %v3570_v14 }
0x1938   : > { %v3611_v45 = vadd.f32 %v3600_v42, %v3591_v29 }
0x1939   : > { %v3610_v48 = vadd.f32 %v3596_v62, %v3590_v15  ;;  %v3669_v37 = vpop.permute.xlu0 %3668 }
0x193a   : > { %3621 = vrot.lane.b32.xlu1 %v3611_v45, %s7827_s5  ;;  %v3604_v38 = vpop.permute.xlu1 %3603 }
0x193b   : > { %3619 = vrot.lane.b32.xlu0 %v3610_v48, %s7827_s5  ;;  %v3683_v29 = vmul.f32 %v3669_v37, %v3610_v48 }
0x193c   : > { %v6022_v28 = vpop.eup %6021 }
0x193d   : > { %v3573_v49 = vmul.f32 %v6022_v28, %v7270_v20 }
0x193e   : > { %3633 = vrot.lane.b32.xlu1 %v3611_v45, %s7828_s1  ;;  %v3661_v3 = vpop.permute.xlu0 %3660 }
0x193f   : > { %v3593_v50 = vmul.f32 %v3588_v22, %v3573_v49 }
0x1942   : > { %3631 = vrot.lane.b32.xlu1 %v3610_v48, %s7828_s1 }
0x1943   : > { %v3693_v33 = vpop.permute.xlu0 %3692 }
0x1947   : > { %v3701_v51 = vpop.permute.xlu0 %3700 }
0x194c   : > { %v3721_v59 = vpop.permute.xlu0 %3720 }
0x196c   : > { %v3555_v31 = vpop.xlane.xlu1 %3554 }
0x196d   : > { %v3560_v23 = vmul.f32 0.0078125, %v3555_v31 }
0x196f   : > { %v3564_v10 = vadd.f32 1e-08, %v3560_v23 }
0x1970   : > { %v3608_v47 = vpop.permute.xlu1 %3607 }
0x1971   : > { %6023 = vrsqrt.f32 %v3564_v10  ;;  %v3613_v58 = vadd.f32 %v3608_v47, %v3593_v50 }
0x1973   : > { %3625 = vrot.lane.b32.xlu1 %v3613_v58, %s7827_s5 }
0x1974   : > { %v3646_v11 = vpop.permute.xlu1 %3645 }
0x1977   : > { %3637 = vrot.lane.b32.xlu1 %v3613_v58, %s7828_s1 }
0x1978   : > { %v3651_v46 = vpop.permute.xlu1 %3650 }
0x197b   : > { %v6024_v5 = vpop.eup %6023 }
0x197c   : > { %v3572_v1 = vmul.f32 %v6024_v5, %v7297_v55  ;;  %v3725_v55 = vpop.permute.xlu0 %3724 }
0x197d   : > { %v3673_v57 = vpop.permute.xlu1 %3672 }
0x197e   : > { %v3592_v24 = vmul.f32 %v3584_v60, %v3572_v1  ;;  %v3684_v25 = vmul.f32 %v3673_v57, %v3611_v45 }
0x1980   : > { %v3612_v30 = vadd.f32 %v3604_v38, %v3592_v24 }
0x1982   : > { %3623 = vrot.lane.b32.xlu0 %v3612_v30, %s7827_s5  ;;  %v3697_v21 = vpop.permute.xlu1 %3696  ;;  %s4539_s5 = sld [smem:[#allocation2]] }
0x1986   : > { %3635 = vrot.lane.b32.xlu0 %v3612_v30, %s7828_s1  ;;  %s7829_s1 = smov 4  }
0x1987   : > { %v3656_v20 = vpop.permute.xlu1 %3655 }
0x198c   : > { %v3677_v34 = vpop.permute.xlu1 %3676 }
0x198d   : > { %v3685_v37 = vmul.f32 %v3677_v34, %v3612_v30 }
0x1990   : > { %v3681_v12 = vpop.permute.xlu1 %3680 }
0x1991   : > { %v3686_v24 = vmul.f32 %v3681_v12, %v3613_v58 }
0x1995   : > { %v3705_v13 = vpop.permute.xlu1 %3704 }
0x199a   : > { %v3717_v17 = vpop.permute.xlu1 %3716 }
0x199e   : > { %v3729_v19 = vpop.permute.xlu1 %3728 }
0x19ac   : > { %v3622_v26 = vpop.permute.xlu1 %3621 }
0x19ad   : > { %v3628_v44 = vsel %vm732_vm4, %v3622_v26, 0.0  ;;  %v3620_v32 = vpop.permute.xlu0 %3619 }
0x19ae   : > { %v3664_v35 = vmul.f32 %v3651_v46, %v3628_v44  ;;  %v3627_v62 = vsel %vm732_vm4, %v3620_v32, 0.0 }
0x19af   : > { %v3663_v14 = vmul.f32 %v3646_v11, %v3627_v62 }
0x19b0   : > { %v3634_v54 = vpop.permute.xlu1 %3633  ;;  %v3688_v61 = vadd.f32 %v3684_v25, %v3664_v35 }
0x19b1   : > { %v3640_v56 = vsel %vm735_vm5, %v3634_v54, 0.0  ;;  %v3687_v60 = vadd.f32 %v3683_v29, %v3663_v14 }
0x19b2   : > { %v3708_v40 = vmul.f32 %v3697_v21, %v3640_v56 }
0x19b4   : > { %v3712_v15 = vadd.f32 %v3708_v40, %v3688_v61  ;;  %v3632_v42 = vpop.permute.xlu1 %3631 }
0x19b5   : > { %v3639_v16 = vsel %vm735_vm5, %v3632_v42, 0.0 }
0x19b6   : > { %v3707_v22 = vmul.f32 %v3693_v33, %v3639_v16  ;;  %v3732_v28 = vadd.f32 %v3721_v59, %v3712_v15 }
0x19b8   : > { %v3711_v38 = vadd.f32 %v3707_v22, %v3687_v60  ;;  %vm3736_vm9 = vcmp.ge.f32.partialorder %v3732_v28, 0.0  ;;  %v3742_v45 = vmul.f32 %v3740_v63, %v3732_v28  ;;  %v5262_v60 = vld [vmem:[%s7750_s10 + $0x88] sm:$0xff]  ;;  %v7393_v22 = vld [vmem:[%s7749_s9 + $0xa0] sm:$0xff] }
0x19ba   : > { %v3746_v49 = vsel %vm3736_vm9, %v3732_v28, %v3742_v45  ;;  %v3731_v31 = vadd.f32 %v3717_v17, %v3711_v38  ;;  %v7398_v28 = vld [vmem:[%s7749_s9 + $0xb0] sm:$0xff]  ;;  %v7405_v38 = vld [vmem:[%s7749_s9 + $0xa8] sm:$0xff]  ;;  %v7412_v45 = vld [vmem:[%s7749_s9 + $0xb8] sm:$0xff] }
0x19bb   : > { %3751 = vadd.xlane.f32.xlu1 %v3746_v49 }
0x19bc   : > { %vm3735_vm10 = vcmp.ge.f32.partialorder %v3731_v31, 0.0  ;;  %v3741_v23 = vmul.f32 %v3740_v63, %v3731_v31 }
0x19be   : > { %v3745_v50 = vsel %vm3735_vm10, %v3731_v31, %v3741_v23  ;;  %vm4752_vm10 = vcmask 1041408  }
0x19bf   : > { %3749 = vadd.xlane.f32.xlu0 %v3745_v50 }
0x19e5   : > { %v3626_v48 = vpop.permute.xlu1 %3625 }
0x19e6   : > { %v3630_v47 = vsel %vm732_vm4, %v3626_v48, 0.0 }
0x19e7   : > { %v3666_v46 = vmul.f32 %v3661_v3, %v3630_v47 }
0x19e9   : > { %v3638_v10 = vpop.permute.xlu1 %3637  ;;  %v3690_v33 = vadd.f32 %v3686_v24, %v3666_v46 }
0x19ea   : > { %v3642_v11 = vsel %vm735_vm5, %v3638_v10, 0.0 }
0x19eb   : > { %v3710_v57 = vmul.f32 %v3705_v13, %v3642_v11 }
0x19ed   : > { %v3714_v26 = vadd.f32 %v3710_v57, %v3690_v33 }
0x19ef   : > { %v3734_v25 = vadd.f32 %v3729_v19, %v3714_v26 }
0x19f1   : > { %v3744_v56 = vmul.f32 %v3740_v63, %v3734_v25 }
0x19f4   : > { %v3624_v5 = vpop.permute.xlu0 %3623 }
0x19f5   : > { %v3629_v1 = vsel %vm732_vm4, %v3624_v5, 0.0  ;;  %vm3738_vm4 = vcmp.ge.f32.partialorder %v3734_v25, 0.0 }
0x19f6   : > { %v3665_v21 = vmul.f32 %v3656_v20, %v3629_v1  ;;  %v3748_v58 = vsel %vm3738_vm4, %v3734_v25, %v3744_v56 }
0x19f8   : > { %v3636_v17 = vpop.permute.xlu0 %3635  ;;  %v3689_v44 = vadd.f32 %v3685_v37, %v3665_v21 }
0x19f9   : > { %v3641_v59 = vsel %vm735_vm5, %v3636_v17, 0.0 }
0x19fa   : > { %v3709_v32 = vmul.f32 %v3701_v51, %v3641_v59 }
0x19fc   : > { %v3713_v35 = vadd.f32 %v3709_v32, %v3689_v44 }
0x19fe   : > { %v3733_v62 = vadd.f32 %v3725_v55, %v3713_v35 }
0x1a00   : > { %vm3737_vm11 = vcmp.ge.f32.partialorder %v3733_v62, 0.0  ;;  %v3743_v3 = vmul.f32 %v3740_v63, %v3733_v62 }
0x1a02   : > { %v3747_v54 = vsel %vm3737_vm11, %v3733_v62, %v3743_v3  ;;  %vm4759_vm11 = vcmask 1024  }
0x1a03   : > { %3753 = vadd.xlane.f32.xlu0 %v3747_v54 }
0x1a07   : > { %3755 = vadd.xlane.f32.xlu0 %v3748_v58 }
0x1a48   : > { %v3752_v30 = vpop.xlane.xlu1 %3751 }
0x1a49   : > { %v3758_v20 = vmul.f32 0.0078125, %v3752_v30 }
0x1a4b   : > { %v7343_v34 = vsub.f32 %v3746_v49, %v3758_v20 }
0x1a4c   : > { %v3750_v12 = vpop.xlane.xlu0 %3749 }
0x1a4d   : > { %v3757_v13 = vmul.f32 0.0078125, %v3750_v12  ;;  %v3766_v51 = vmul.f32 %v7343_v34, %v7343_v34 }
0x1a4f   : > { %v7347_v61 = vsub.f32 %v3745_v50, %v3757_v13  ;;  %3771 = vadd.xlane.f32.xlu1 %v3766_v51 }
0x1a51   : > { %v3765_v19 = vmul.f32 %v7347_v61, %v7347_v61 }
0x1a53   : > { %3769 = vadd.xlane.f32.xlu0 %v3765_v19 }
0x1a90   : > { %v3754_v55 = vpop.xlane.xlu0 %3753 }
0x1a91   : > { %v3759_v14 = vmul.f32 0.0078125, %v3754_v55 }
0x1a93   : > { %v7351_v40 = vsub.f32 %v3747_v54, %v3759_v14 }
0x1a94   : > { %v3756_v29 = vpop.xlane.xlu0 %3755 }
0x1a95   : > { %v3760_v15 = vmul.f32 0.0078125, %v3756_v29  ;;  %v3767_v42 = vmul.f32 %v7351_v40, %v7351_v40  ;;  %v5258_v29 = vld [vmem:[%s7748_s8 + $0x88] sm:$0xff] }
0x1a97   : > { %v7355_v16 = vsub.f32 %v3748_v58, %v3760_v15  ;;  %3773 = vadd.xlane.f32.xlu0 %v3767_v42 }
0x1a99   : > { %v3768_v63 = vmul.f32 %v7355_v16, %v7355_v16 }
0x1a9b   : > { %3775 = vadd.xlane.f32.xlu1 %v3768_v63 }
0x1aac   : > { %3798 = vperm.xlu1 %5921, %v7217_v2  }
0x1aad   : > { %3794 = vperm.xlu0 %5920, %v7205_v18  }
0x1ab0   : > { %5922 = vset.pattern.permute.xlu1 %v6167_v0 }
0x1ab1   : > { %3814 = vperm.xlu1 %5922, %v7205_v18   ;;  %5926 = vset.pattern.permute.xlu0 %v6160_v4  ;;  %v5228_v18 = vld [vmem:[%s7748_s8 + $0x70] sm:$0xff] }
0x1ab2   : > { %5535 = vmatprep.mubr.msk.f32.mxu1 %vm1441_vm13, %v5228_v18  ;;  %3850 = vperm.xlu0 %5926, %v5262_v60  }
0x1ab5   : > { %3818 = vperm.xlu1 %5922, %v7217_v2   ;;  %v5229_v2 = vld [vmem:[%s7748_s8 + $0x78] sm:$0xff] }
0x1ab6   : > { %5536 = vmatmul.mubr.msk.f32.gmra.mrb[4].mxu1 %vm1441_vm13, %v5229_v2  ;;  %3990 = vperm.xlu0 %5926, %v7398_v28  }
0x1ab9   : > { %5923 = vset.pattern.permute.xlu1 %v6166_v52 }
0x1aba   : > { %3802 = vperm.xlu1 %5923, %v7210_v9   ;;  %5928 = vset.pattern.permute.xlu0 %v6161_v6 }
0x1abe   : > { %3806 = vperm.xlu1 %5923, %v7224_v53  }
0x1ac2   : > { %5924 = vset.pattern.permute.xlu1 %v6167_v0 }
0x1ac3   : > { %3822 = vperm.xlu1 %5924, %v7210_v9   ;;  %v5257_v9 = vld [vmem:[%s7748_s8 + $0x80] sm:$0xff] }
0x1ac4   : > { %5556 = vmatprep.mubr.msk.f32.mxu1 %vm1441_vm13, %v5257_v9 }
0x1ac7   : > { %3826 = vperm.xlu1 %5924, %v7224_v53   ;;  %v5261_v53 = vld [vmem:[%s7750_s10 + $0x80] sm:$0xff] }
0x1acb   : > { %5925 = vset.pattern.permute.xlu1 %v6160_v4 }
0x1acc   : > { %3845 = vperm.xlu1 %5925, %v5261_v53  }
0x1ad0   : > { %3980 = vperm.xlu1 %5925, %v7393_v22  }
0x1ad4   : > { %3985 = vperm.xlu1 %5925, %v7405_v38  }
0x1ad8   : > { %3995 = vperm.xlu1 %5925, %v7412_v45  }
0x1adc   : > { %5927 = vset.pattern.permute.xlu1 %v6161_v6  ;;  %v3772_v49 = vpop.xlane.xlu1 %3771 }
0x1add   : > { %v3778_v23 = vmul.f32 0.0078125, %v3772_v49 }
0x1adf   : > { %v3782_v48 = vadd.f32 1e-08, %v3778_v23 }
0x1ae0   : > { %v3770_v31 = vpop.xlane.xlu0 %3769 }
0x1ae1   : > { %v3777_v50 = vmul.f32 0.0078125, %v3770_v31  ;;  %6025 = vrsqrt.f32 %v3782_v48  ;;  %v5276_v48 = vld [vmem:[%s7822_s19 + $0xb0] sm:$0xff] }
0x1ae3   : > { %v3781_v10 = vadd.f32 1e-08, %v3777_v50  ;;  %v5275_v50 = vld [vmem:[%s7822_s19 + $0xa8] sm:$0xff] }
0x1ae5   : > { %6027 = vrsqrt.f32 %v3781_v10 }
0x1aeb   : > { %v6026_v5 = vpop.eup %6025 }
0x1aec   : > { %v3790_v17 = vmul.f32 %v6026_v5, %v7343_v34 }
0x1aef   : > { %v6028_v24 = vpop.eup %6027 }
0x1af0   : > { %v3789_v59 = vmul.f32 %v6028_v24, %v7347_v61 }
0x1b24   : > { %v3774_v11 = vpop.xlane.xlu0 %3773 }
0x1b25   : > { %v3779_v1 = vmul.f32 0.0078125, %v3774_v11  ;;  %v4100_v11 = vstv %s5282_s26  ;;  %s7830_s26 = smov 124  }
0x1b27   : > { %v3783_v33 = vadd.f32 1e-08, %v3779_v1 }
0x1b28   : > { %v3776_v47 = vpop.xlane.xlu1 %3775 }
0x1b29   : > { %v3780_v57 = vmul.f32 0.0078125, %v3776_v47  ;;  %6029 = vrsqrt.f32 %v3783_v33 }
0x1b2b   : > { %v3784_v26 = vadd.f32 1e-08, %v3780_v57 }
0x1b2c   : > { %v3799_v46 = vpop.permute.xlu1 %3798  ;;  %v3795_v21 = vpop.permute.xlu0 %3794 }
0x1b2d   : > { %v3810_v44 = vmul.f32 %v3799_v46, %v3790_v17  ;;  %v3809_v32 = vmul.f32 %v3795_v21, %v3789_v59  ;;  %6031 = vrsqrt.f32 %v3784_v26 }
0x1b30   : > { %v3815_v37 = vpop.permute.xlu1 %3814 }
0x1b31   : > { %v3829_v62 = vadd.f32 %v3815_v37, %v3809_v32  ;;  %v3851_v15 = vpop.permute.xlu0 %3850 }
0x1b33   : > { %v6030_v58 = vpop.eup %6029 }
0x1b34   : > { %v3819_v35 = vpop.permute.xlu1 %3818  ;;  %v3791_v34 = vmul.f32 %v6030_v58, %v7351_v40  ;;  %v5274_v40 = vld [vmem:[%s7822_s19 + $0xa0] sm:$0xff] }
0x1b35   : > { %v3830_v25 = vadd.f32 %v3819_v35, %v3810_v44  ;;  %5566 = vmatprep.mubr.msk.f32.mxu0 %vm886_vm2, %v5274_v40  ;;  %v3991_v33 = vpop.permute.xlu0 %3990  ;;  %v5286_v40 = vld [vmem:[%s7823_s7 + $0xb8] sm:$0xff] }
0x1b37   : > { %v5677_v3 = vpack.c.bf16 %v3830_v25, %v3829_v62  ;;  %v6032_v30 = vpop.eup %6031 }
0x1b38   : > { %v3792_v12 = vmul.f32 %v6032_v30, %v7355_v16  ;;  %v3963_v16 = vstv %s5269_s6 }
0x1b39   : > { %v3803_v54 = vpop.permute.xlu1 %3802  ;;  %5678 = vmatprep.subr.bf16.mxu1 %v5677_v3 }
0x1b3a   : > { %5680 = vmatpush3.bf16.msra.mxu1 %v5677_v3  ;;  %v3811_v13 = vmul.f32 %v3803_v54, %v3791_v34 }
0x1b3d   : > { %v3807_v56 = vpop.permute.xlu1 %3806 }
0x1b3e   : > { %v3812_v51 = vmul.f32 %v3807_v56, %v3792_v12 }
0x1b42   : > { %v3823_v20 = vpop.permute.xlu1 %3822 }
0x1b43   : > { %v3831_v19 = vadd.f32 %v3823_v20, %v3811_v13 }
0x1b46   : > { %v3827_v61 = vpop.permute.xlu1 %3826 }
0x1b47   : > { %v3832_v55 = vadd.f32 %v3827_v61, %v3812_v51 }
0x1b49   : > { %v5681_v14 = vpack.c.bf16 %v3832_v55, %v3831_v19 }
0x1b4b   : > { %5682 = vmatprep.subr.bf16.mxu1 %v5681_v14  ;;  %v3846_v63 = vpop.permute.xlu1 %3845 }
0x1b4c   : > { %5684 = vmatpush3.bf16.msra.mxu1 %v5681_v14 }
0x1b4f   : > { %5557 = vmatmul.mubr.msk.f32.vlgmr.msra.gmra.mrb[12].mxu1 %vm1441_vm13, %v5258_v29  ;;  %v5283_v29 = vld [vmem:[%s7823_s7 + $0xa0] sm:$0xff] }
0x1c22   : > { %v5558_v42 = vpop.f32.mrb[12].mxu1 }
0x1c23   : > { %v3947_v18 = vadd.f32 %v5558_v42, %v3851_v15  ;;  %v3941_v2 = vpop.f32.mrb[13].mxu1  ;;  %v5285_v15 = vld [vmem:[%s7823_s7 + $0xb0] sm:$0xff] }
0x1c24   : > { %v3942_v9 = vadd.f32 %v3941_v2, %v3846_v63 }
0x1c25   : > { %v3965_v53 = vmul.f32 %v3963_v16, %v3947_v18  ;;  %v5284_v18 = vld [vmem:[%s7823_s7 + $0xa8] sm:$0xff] }
0x1c26   : > { %v3964_v60 = vmul.f32 %v3963_v16, %v3942_v9 }
0x1c27   : > { %v3967_v49 = vadd.f32 %v3965_v53, %v7241_v39  ;;  %v5277_v39 = vld [vmem:[%s7822_s19 + $0xb8] sm:$0xff] }
0x1c28   : > { %v3966_v31 = vadd.f32 %v3964_v60, %v7244_v27  ;;  %v3981_v27 = vpop.permute.xlu1 %3980 }
0x1c2a   : > { %v5685_v23 = vpack.c.bf16 %v3967_v49, %v3966_v31 }
0x1c2c   : > { %5686 = vmatprep.subr.bf16.mxu0 %v5685_v23  ;;  %v3986_v10 = vpop.permute.xlu1 %3985 }
0x1c2d   : > { %5688 = vmatpush3.bf16.msra.mxu0 %v5685_v23 }
0x1c30   : > { %5567 = vmatmul.mubr.msk.f32.vlgmr.msra.gmra.mrb[24].mxu0 %vm886_vm2, %v5275_v50  ;;  %v3996_v57 = vpop.permute.xlu1 %3995 }
0x1c31   : > { %5569 = vmatprep.mubr.msk.f32.mxu0 %vm886_vm2, %v5276_v48 }
0x1c34   : > { %5570 = vmatmul.mubr.msk.f32.gmra.mrb[26].mxu0 %vm886_vm2, %v5277_v39 }
0x1d03   : > { %v5568_v47 = vpop.f32.mrb[24].mxu0 }
0x1d04   : > { %v4082_v46 = vadd.f32 %v5568_v47, %v3986_v10  ;;  %v4076_v5 = vpop.f32.mrb[25].mxu0 }
0x1d05   : > { %v4077_v1 = vadd.f32 %v4076_v5, %v3981_v27 }
0x1d06   : > { %v4102_v24 = vmul.f32 %v4100_v11, %v4082_v46  ;;  %vm4096_vm5 = vcmp.ge.f32.partialorder %v4082_v46, 0.0 }
0x1d07   : > { %v4101_v21 = vmul.f32 %v4100_v11, %v4077_v1  ;;  %v5571_v37 = vpop.f32.mrb[26].mxu0  ;;  %vm4095_vm12 = vcmp.ge.f32.partialorder %v4077_v1, 0.0 }
0x1d08   : > { %v4086_v17 = vpop.f32.mrb[27].mxu0  ;;  %v4106_v59 = vsel %vm4096_vm5, %v4082_v46, %v4102_v24  ;;  %v4092_v26 = vadd.f32 %v5571_v37, %v3996_v57 }
0x1d09   : > { %v4087_v44 = vadd.f32 %v4086_v17, %v3991_v33  ;;  %4111 = vadd.xlane.f32.xlu1 %v4106_v59  ;;  %v4105_v32 = vsel %vm4095_vm12, %v4077_v1, %v4101_v21 }
0x1d0a   : > { %4109 = vadd.xlane.f32.xlu0 %v4105_v32  ;;  %v4104_v62 = vmul.f32 %v4100_v11, %v4092_v26  ;;  %vm4098_vm8 = vcmp.ge.f32.partialorder %v4092_v26, 0.0 }
0x1d0b   : > { %v4103_v35 = vmul.f32 %v4100_v11, %v4087_v44  ;;  %vm4097_vm7 = vcmp.ge.f32.partialorder %v4087_v44, 0.0 }
0x1d0c   : > { %v4108_v3 = vsel %vm4098_vm8, %v4092_v26, %v4104_v62 }
0x1d0d   : > { %v4107_v25 = vsel %vm4097_vm7, %v4087_v44, %v4103_v35 }
0x1d0e   : > { %4113 = vadd.xlane.f32.xlu0 %v4107_v25 }
0x1d12   : > { %4115 = vadd.xlane.f32.xlu0 %v4108_v3 }
0x1d1a   : > { %4154 = vperm.xlu1 %5927, %v7393_v22  }
0x1d1e   : > { %5929 = vset.pattern.permute.xlu1 %v6162_v36 }
0x1d96   : > { %v4112_v54 = vpop.xlane.xlu1 %4111 }
0x1d97   : > { %v4118_v56 = vmul.f32 0.0078125, %v4112_v54  ;;  %v4110_v58 = vpop.xlane.xlu0 %4109 }
0x1d98   : > { %v4117_v30 = vmul.f32 0.0078125, %v4110_v58 }
0x1d99   : > { %v7444_v20 = vsub.f32 %v4106_v59, %v4118_v56 }
0x1d9a   : > { %v7446_v34 = vsub.f32 %v4105_v32, %v4117_v30  ;;  %v4155_v2 = vpop.permute.xlu1 %4154 }
0x1d9b   : > { %v4114_v12 = vpop.xlane.xlu0 %4113  ;;  %v4126_v13 = vmul.f32 %v7444_v20, %v7444_v20 }
0x1d9c   : > { %v4125_v51 = vmul.f32 %v7446_v34, %v7446_v34  ;;  %v4119_v42 = vmul.f32 0.0078125, %v4114_v12 }
0x1d9d   : > { %4131 = vadd.xlane.f32.xlu0 %v4126_v13 }
0x1d9e   : > { %4129 = vadd.xlane.f32.xlu1 %v4125_v51  ;;  %v7479_v16 = vsub.f32 %v4107_v25, %v4119_v42 }
0x1d9f   : > { %v4116_v61 = vpop.xlane.xlu0 %4115 }
0x1da0   : > { %v4120_v19 = vmul.f32 0.0078125, %v4116_v61  ;;  %v4127_v63 = vmul.f32 %v7479_v16, %v7479_v16 }
0x1da2   : > { %v7452_v55 = vsub.f32 %v4108_v3, %v4120_v19 }
0x1da4   : > { %v4128_v14 = vmul.f32 %v7452_v55, %v7452_v55 }
0x1da6   : > { %4135 = vadd.xlane.f32.xlu0 %v4128_v14 }
0x1daf   : > { %4174 = vperm.xlu1 %5929, %v7393_v22  }
0x1db3   : > { %4178 = vperm.xlu1 %5929, %v7405_v38  }
0x1db7   : > { %5930 = vset.pattern.permute.xlu1 %v6161_v6 }
0x1db8   : > { %4162 = vperm.xlu1 %5930, %v7398_v28  }
0x1dbc   : > { %4166 = vperm.xlu1 %5930, %v7412_v45   ;;  %4158 = vperm.xlu0 %5928, %v7405_v38  }
0x1dc0   : > { %5931 = vset.pattern.permute.xlu1 %v6162_v36  ;;  %4247 = vperm.xlu0 %5928, %v5283_v29  }
0x1dc1   : > { %4182 = vperm.xlu1 %5931, %v7398_v28  }
0x1dc4   : > { %5936 = vset.pattern.permute.xlu0 %v6160_v4 }
0x1dc5   : > { %4239 = vperm.xlu0 %5936, %v5286_v40  }
0x1dc9   : > { %5937 = vset.pattern.permute.xlu0 %v6162_v36 }
0x1dca   : > { %4271 = vperm.xlu0 %5937, %v5283_v29  }
0x1dce   : > { %4279 = vperm.xlu0 %5937, %v5285_v15  }
0x1dd2   : > { %5941 = vset.pattern.permute.xlu0 %v6163_v41 }
0x1dd3   : > { %4299 = vperm.xlu0 %5941, %v7405_v38  }
0x1dd7   : > { %4303 = vperm.xlu0 %5941, %v7398_v28  }
0x1ddb   : > { %5942 = vset.pattern.permute.xlu0 %v6166_v52 }
0x1de5   : > { %4133 = vadd.xlane.f32.xlu1 %v4127_v63 }
0x1df6   : > { %4186 = vperm.xlu1 %5931, %v7412_v45  }
0x1dfa   : > { %5932 = vset.pattern.permute.xlu1 %v6160_v4 }
0x1dfb   : > { %4224 = vperm.xlu1 %5932, %v5283_v29  }
0x1dff   : > { %4229 = vperm.xlu1 %5932, %v5284_v18  }
0x1e03   : > { %5933 = vset.pattern.permute.xlu1 %v6161_v6 }
0x1e04   : > { %4251 = vperm.xlu1 %5933, %v5284_v18  }
0x1e08   : > { %5934 = vset.pattern.permute.xlu1 %v6162_v36 }
0x1e09   : > { %4275 = vperm.xlu1 %5934, %v5284_v18  }
0x1e0d   : > { %5935 = vset.pattern.permute.xlu1 %v6160_v4 }
0x1e0e   : > { %4234 = vperm.xlu1 %5935, %v5285_v15  }
0x1e12   : > { %5938 = vset.pattern.permute.xlu1 %v6161_v6 }
0x1e13   : > { %4255 = vperm.xlu1 %5938, %v5285_v15  }
0x1e17   : > { %4259 = vperm.xlu1 %5938, %v5286_v40  }
0x1e1b   : > { %5939 = vset.pattern.permute.xlu1 %v6162_v36 }
0x1e1c   : > { %4283 = vperm.xlu1 %5939, %v5286_v40  }
0x1e20   : > { %5940 = vset.pattern.permute.xlu1 %v6163_v41 }
0x1e21   : > { %4295 = vperm.xlu1 %5940, %v7393_v22  }
0x1e25   : > { %4307 = vperm.xlu1 %5940, %v7412_v45  }
0x1e29   : > { %5943 = vset.pattern.permute.xlu1 %v6166_v52 }
0x1e2a   : > { %v4132_v9 = vpop.xlane.xlu0 %4131 }
0x1e2b   : > { %v4138_v53 = vmul.f32 0.0078125, %v4132_v9  ;;  %v4130_v60 = vpop.xlane.xlu1 %4129 }
0x1e2c   : > { %v4137_v49 = vmul.f32 0.0078125, %v4130_v60 }
0x1e2d   : > { %v4142_v31 = vadd.f32 1e-08, %v4138_v53 }
0x1e2e   : > { %v4141_v6 = vadd.f32 1e-08, %v4137_v49 }
0x1e2f   : > { %6033 = vrsqrt.f32 %v4142_v31  ;;  %v4175_v23 = vpop.permute.xlu1 %4174 }
0x1e30   : > { %6035 = vrsqrt.f32 %v4141_v6 }
0x1e33   : > { %v4136_v36 = vpop.xlane.xlu0 %4135  ;;  %v4179_v11 = vpop.permute.xlu1 %4178 }
0x1e34   : > { %v4140_v1 = vmul.f32 0.0078125, %v4136_v36 }
0x1e36   : > { %v4144_v24 = vadd.f32 1e-08, %v4140_v1 }
0x1e37   : > { %v4163_v57 = vpop.permute.xlu1 %4162 }
0x1e38   : > { %6037 = vrsqrt.f32 %v4144_v24 }
0x1e39   : > { %v6034_v50 = vpop.eup %6033 }
0x1e3a   : > { %v6036_v48 = vpop.eup %6035  ;;  %v4150_v41 = vmul.f32 %v6034_v50, %v7444_v20 }
0x1e3b   : > { %v4149_v39 = vmul.f32 %v6036_v48, %v7446_v34  ;;  %v4159_v27 = vpop.permute.xlu0 %4158  ;;  %v4167_v21 = vpop.permute.xlu1 %4166 }
0x1e3c   : > { %v4170_v10 = vmul.f32 %v4159_v27, %v4150_v41 }
0x1e3d   : > { %v4169_v47 = vmul.f32 %v4155_v2, %v4149_v39 }
0x1e3e   : > { %v4190_v46 = vadd.f32 %v4179_v11, %v4170_v10 }
0x1e3f   : > { %v4189_v5 = vadd.f32 %v4175_v23, %v4169_v47  ;;  %v4248_v13 = vpop.permute.xlu0 %4247  ;;  %v4319_v47 = vstv %s5287_s24  ;;  %s7682_s24 = scalar_lea.hbm %s7760_s20, %s5312_s3 }
0x1e40   : > { %4200 = vrot.lane.b32.xlu1 %v4190_v46, %s7829_s1  ;;  %v4183_v33 = vpop.permute.xlu1 %4182 }
0x1e41   : > { %4198 = vrot.lane.b32.xlu0 %v4189_v5, %s7829_s1  ;;  %v4262_v41 = vmul.f32 %v4248_v13, %v4189_v5 }
0x1e42   : > { %v6038_v37 = vpop.eup %6037 }
0x1e43   : > { %v4152_v17 = vmul.f32 %v6038_v37, %v7452_v55 }
0x1e44   : > { %4212 = vrot.lane.b32.xlu1 %v4190_v46, %s7830_s26  ;;  %v4240_v19 = vpop.permute.xlu0 %4239 }
0x1e45   : > { %v4172_v44 = vmul.f32 %v4167_v21, %v4152_v17 }
0x1e48   : > { %4210 = vrot.lane.b32.xlu1 %v4189_v5, %s7830_s26 }
0x1e49   : > { %v4272_v29 = vpop.permute.xlu0 %4271 }
0x1e4d   : > { %v4280_v15 = vpop.permute.xlu0 %4279 }
0x1e72   : > { %v4134_v59 = vpop.xlane.xlu1 %4133 }
0x1e73   : > { %v4139_v26 = vmul.f32 0.0078125, %v4134_v59 }
0x1e75   : > { %v4143_v32 = vadd.f32 1e-08, %v4139_v26 }
0x1e76   : > { %v4187_v35 = vpop.permute.xlu1 %4186 }
0x1e77   : > { %6039 = vrsqrt.f32 %v4143_v32  ;;  %v4192_v62 = vadd.f32 %v4187_v35, %v4172_v44 }
0x1e79   : > { %4204 = vrot.lane.b32.xlu1 %v4192_v62, %s7829_s1 }
0x1e7a   : > { %v4225_v25 = vpop.permute.xlu1 %4224 }
0x1e7d   : > { %4216 = vrot.lane.b32.xlu1 %v4192_v62, %s7830_s26 }
0x1e7e   : > { %v4230_v3 = vpop.permute.xlu1 %4229 }
0x1e81   : > { %v6040_v54 = vpop.eup %6039 }
0x1e82   : > { %v4151_v56 = vmul.f32 %v6040_v54, %v7479_v16  ;;  %v4300_v16 = vpop.permute.xlu0 %4299 }
0x1e83   : > { %v4252_v58 = vpop.permute.xlu1 %4251 }
0x1e84   : > { %v4171_v30 = vmul.f32 %v4163_v57, %v4151_v56  ;;  %v4263_v31 = vmul.f32 %v4252_v58, %v4190_v46 }
0x1e86   : > { %v4191_v20 = vadd.f32 %v4183_v33, %v4171_v30  ;;  %v4304_v18 = vpop.permute.xlu0 %4303 }
0x1e88   : > { %4202 = vrot.lane.b32.xlu0 %v4191_v20, %s7829_s1  ;;  %v4276_v34 = vpop.permute.xlu1 %4275 }
0x1e8c   : > { %4214 = vrot.lane.b32.xlu0 %v4191_v20, %s7830_s26 }
0x1e8d   : > { %v4235_v12 = vpop.permute.xlu1 %4234 }
0x1e92   : > { %v4256_v51 = vpop.permute.xlu1 %4255 }
0x1e93   : > { %v4264_v61 = vmul.f32 %v4256_v51, %v4191_v20 }
0x1e96   : > { %v4260_v55 = vpop.permute.xlu1 %4259 }
0x1e97   : > { %v4265_v14 = vmul.f32 %v4260_v55, %v4192_v62 }
0x1e9b   : > { %v4284_v40 = vpop.permute.xlu1 %4283 }
0x1ea0   : > { %v4296_v42 = vpop.permute.xlu1 %4295 }
0x1ea4   : > { %v4308_v63 = vpop.permute.xlu1 %4307 }
0x1eb2   : > { %v4201_v2 = vpop.permute.xlu1 %4200 }
0x1eb3   : > { %v4207_v9 = vsel %vm733_vm3, %v4201_v2, 0.0  ;;  %v4199_v53 = vpop.permute.xlu0 %4198 }
0x1eb4   : > { %v4243_v60 = vmul.f32 %v4230_v3, %v4207_v9  ;;  %v4206_v49 = vsel %vm733_vm3, %v4199_v53, 0.0 }
0x1eb5   : > { %v4242_v50 = vmul.f32 %v4225_v25, %v4206_v49 }
0x1eb6   : > { %v4213_v6 = vpop.permute.xlu1 %4212  ;;  %v4267_v36 = vadd.f32 %v4263_v31, %v4243_v60 }
0x1eb7   : > { %v4219_v23 = vsel %vm736_vm6, %v4213_v6, 0.0  ;;  %v4266_v11 = vadd.f32 %v4262_v41, %v4242_v50  ;;  %v5232_v50 = vld [vmem:[%s7750_s10 + $0x70] sm:$0xff] }
0x1eb8   : > { %v4287_v48 = vmul.f32 %v4276_v34, %v4219_v23  ;;  %v5263_v41 = vld [vmem:[%s7750_s10 + $0x90] sm:$0xff] }
0x1eba   : > { %v4291_v39 = vadd.f32 %v4287_v48, %v4267_v36  ;;  %v4211_v27 = vpop.permute.xlu1 %4210  ;;  %v5169_v36 = vld [vmem:[%s7750_s10 + $0x38] sm:$0xff] }
0x1ebb   : > { %v4218_v10 = vsel %vm736_vm6, %v4211_v27, 0.0  ;;  %v5200_v48 = vld [vmem:[%s7750_s10 + $0x58] sm:$0xff]  ;;  %v5294_v27 = vld [vmem:[%s7750_s10 + $0xb0] sm:$0xff] }
0x1ebc   : > { %v4311_v1 = vadd.f32 %v4300_v16, %v4291_v39  ;;  %v4286_v24 = vmul.f32 %v4272_v29, %v4218_v10  ;;  %v5233_v39 = vld [vmem:[%s7750_s10 + $0x78] sm:$0xff] }
0x1ebd   : > { %v5264_v10 = vld [vmem:[%s7750_s10 + $0x98] sm:$0xff] }
0x1ebe   : > { %v4290_v57 = vadd.f32 %v4286_v24, %v4266_v11  ;;  %vm4315_vm14 = vcmp.ge.f32.partialorder %v4311_v1, 0.0  ;;  %v4321_v46 = vmul.f32 %v4319_v47, %v4311_v1  ;;  %v5295_v11 = vld [vmem:[%s7750_s10 + $0xb8] sm:$0xff]  ;;  %v4550_v24 = vld [vmem:[%s7754_s14 + $0x8] sm:$0xff] }
0x1ec0   : > { %v4310_v21 = vadd.f32 %v4296_v42, %v4290_v57  ;;  %v4325_v37 = vsel %vm4315_vm14, %v4311_v1, %v4321_v46  ;;  %v4551_v1 = vld [vmem:[%s7754_s14 + $0x10] sm:$0xff]  ;;  %v4552_v57 = vld [vmem:[%s7754_s14 + $0x18] sm:$0xff] }
0x1ec1   : > { %4330 = vadd.xlane.f32.xlu1 %v4325_v37 }
0x1ec2   : > { %vm4314_vm15 = vcmp.ge.f32.partialorder %v4310_v21, 0.0  ;;  %v4320_v33 = vmul.f32 %v4319_v47, %v4310_v21 }
0x1ec4   : > { %v4324_v17 = vsel %vm4314_vm15, %v4310_v21, %v4320_v33 }
0x1ec5   : > { %4328 = vadd.xlane.f32.xlu0 %v4324_v17 }
0x1eeb   : > { %v4205_v5 = vpop.permute.xlu1 %4204 }
0x1eec   : > { %v4209_v26 = vsel %vm733_vm3, %v4205_v5, 0.0 }
0x1eed   : > { %v4245_v32 = vmul.f32 %v4240_v19, %v4209_v26 }
0x1eef   : > { %v4217_v59 = vpop.permute.xlu1 %4216  ;;  %v4269_v54 = vadd.f32 %v4265_v14, %v4245_v32 }
0x1ef0   : > { %v4221_v44 = vsel %vm736_vm6, %v4217_v59, 0.0 }
0x1ef1   : > { %v4289_v25 = vmul.f32 %v4284_v40, %v4221_v44 }
0x1ef3   : > { %v4293_v30 = vadd.f32 %v4289_v25, %v4269_v54 }
0x1ef5   : > { %v4313_v51 = vadd.f32 %v4308_v63, %v4293_v30 }
0x1ef7   : > { %v4323_v42 = vmul.f32 %v4319_v47, %v4313_v51  ;;  %vm4317_vm9 = vcmp.ge.f32.partialorder %v4313_v51, 0.0 }
0x1ef9   : > { %v4327_v16 = vsel %vm4317_vm9, %v4313_v51, %v4323_v42 }
0x1efa   : > { %v4203_v35 = vpop.permute.xlu0 %4202 }
0x1efb   : > { %v4208_v62 = vsel %vm733_vm3, %v4203_v35, 0.0  ;;  %vm6173_vm3 = vmmov 0  }
0x1efc   : > { %v4244_v3 = vmul.f32 %v4235_v12, %v4208_v62 }
0x1efe   : > { %v4215_v56 = vpop.permute.xlu0 %4214  ;;  %v4268_v20 = vadd.f32 %v4264_v61, %v4244_v3 }
0x1eff   : > { %v4220_v58 = vsel %vm736_vm6, %v4215_v56, 0.0 }
0x1f00   : > { %v4288_v34 = vmul.f32 %v4280_v15, %v4220_v58 }
0x1f02   : > { %v4292_v13 = vadd.f32 %v4288_v34, %v4268_v20 }
0x1f04   : > { %v4312_v55 = vadd.f32 %v4304_v18, %v4292_v13 }
0x1f06   : > { %vm4316_vm0 = vcmp.ge.f32.partialorder %v4312_v55, 0.0  ;;  %v4322_v29 = vmul.f32 %v4319_v47, %v4312_v55  ;;  %v4549_v47 = vld [vmem:[%s7754_s14] sm:$0xff] }
0x1f08   : > { %v4326_v19 = vsel %vm4316_vm0, %v4312_v55, %v4322_v29 }
0x1f09   : > { %4332 = vadd.xlane.f32.xlu0 %v4326_v19 }
0x1f0d   : > { %4334 = vadd.xlane.f32.xlu0 %v4327_v16 }
0x1f4e   : > { %v4331_v12 = vpop.xlane.xlu1 %4330 }
0x1f4f   : > { %v4337_v14 = vmul.f32 0.0078125, %v4331_v12 }
0x1f51   : > { %v7525_v40 = vsub.f32 %v4325_v37, %v4337_v14 }
0x1f52   : > { %v4329_v43 = vpop.xlane.xlu0 %4328 }
0x1f53   : > { %v4336_v2 = vmul.f32 0.0078125, %v4329_v43  ;;  %v4345_v61 = vmul.f32 %v7525_v40, %v7525_v40 }
0x1f55   : > { %v7529_v15 = vsub.f32 %v4324_v17, %v4336_v2  ;;  %4350 = vadd.xlane.f32.xlu1 %v4345_v61 }
0x1f57   : > { %v4344_v63 = vmul.f32 %v7529_v15, %v7529_v15 }
0x1f59   : > { %4348 = vadd.xlane.f32.xlu0 %v4344_v63 }
0x1f96   : > { %v4333_v18 = vpop.xlane.xlu0 %4332 }
0x1f97   : > { %v4338_v9 = vmul.f32 0.0078125, %v4333_v18 }
0x1f99   : > { %v7533_v53 = vsub.f32 %v4326_v19, %v4338_v9 }
0x1f9a   : > { %v4335_v60 = vpop.xlane.xlu0 %4334 }
0x1f9b   : > { %v4339_v49 = vmul.f32 0.0078125, %v4335_v60  ;;  %v4346_v31 = vmul.f32 %v7533_v53, %v7533_v53 }
0x1f9d   : > { %v7537_v6 = vsub.f32 %v4327_v16, %v4339_v49  ;;  %4352 = vadd.xlane.f32.xlu0 %v4346_v31  ;;  %v5289_v49 = vld [vmem:[%s7748_s8 + $0xa8] sm:$0xff]  ;;  %v5290_v31 = vld [vmem:[%s7748_s8 + $0xb0] sm:$0xff] }
0x1f9f   : > { %v4347_v23 = vmul.f32 %v7537_v6, %v7537_v6 }
0x1fa1   : > { %4354 = vadd.xlane.f32.xlu1 %v4347_v23  ;;  %v6174_v23 = vmov 0.0  }
0x1fb2   : > { %4377 = vperm.xlu1 %5943, %v7405_v38  }
0x1fb3   : > { %4373 = vperm.xlu0 %5942, %v7393_v22  }
0x1fb6   : > { %5944 = vset.pattern.permute.xlu1 %v6167_v0 }
0x1fb7   : > { %4393 = vperm.xlu1 %5944, %v7393_v22   ;;  %5948 = vset.pattern.permute.xlu0 %v6160_v4  ;;  %v5259_v22 = vld [vmem:[%s7748_s8 + $0x90] sm:$0xff] }
0x1fb8   : > { %5559 = vmatprep.mubr.msk.f32.mxu1 %vm1441_vm13, %v5259_v22  ;;  %v4545_v22 = vld [vmem:[%s7753_s13] sm:$0xff] }
0x1fb9   : > { %5590 = vmatprep.mubr.msk.f32.mxu0 %vm886_vm2, %v4545_v22 }
0x1fbb   : > { %4397 = vperm.xlu1 %5944, %v7405_v38   ;;  %v5260_v38 = vld [vmem:[%s7748_s8 + $0x98] sm:$0xff] }
0x1fbc   : > { %5560 = vmatmul.mubr.msk.f32.gmra.mrb[4].mxu1 %vm1441_vm13, %v5260_v38 }
0x1fbf   : > { %5945 = vset.pattern.permute.xlu1 %v6166_v52  ;;  %v5288_v52 = vld [vmem:[%s7748_s8 + $0xa0] sm:$0xff] }
0x1fc0   : > { %4381 = vperm.xlu1 %5945, %v7398_v28   ;;  %5580 = vmatprep.mubr.msk.f32.mxu1 %vm1441_vm13, %v5288_v52 }
0x1fc4   : > { %4385 = vperm.xlu1 %5945, %v7412_v45  }
0x1fc8   : > { %5946 = vset.pattern.permute.xlu1 %v6167_v0  ;;  %v1419_v0 = vld [vmem:[%s7750_s10 + $0x10] sm:$0xff] }
0x1fc9   : > { %4401 = vperm.xlu1 %5946, %v7398_v28   ;;  %v1420_v28 = vld [vmem:[%s7750_s10 + $0x18] sm:$0xff] }
0x1fca   : > { %1438 = vperm.xlu0 %5948, %v1420_v28  }
0x1fcd   : > { %4405 = vperm.xlu1 %5946, %v7412_v45   ;;  %v5168_v45 = vld [vmem:[%s7750_s10 + $0x30] sm:$0xff] }
0x1fd1   : > { %5947 = vset.pattern.permute.xlu1 %v6160_v4  ;;  %v5199_v4 = vld [vmem:[%s7750_s10 + $0x50] sm:$0xff] }
0x1fd2   : > { %1433 = vperm.xlu1 %5947, %v1419_v0   ;;  %2600 = vperm.xlu0 %5948, %v5199_v4  }
0x1fd6   : > { %2017 = vperm.xlu1 %5947, %v5168_v45   ;;  %3276 = vperm.xlu0 %5948, %v5232_v50  }
0x1fda   : > { %2022 = vperm.xlu1 %5947, %v5169_v36   ;;  %3855 = vperm.xlu0 %5948, %v5263_v41  }
0x1fde   : > { %2605 = vperm.xlu1 %5947, %v5200_v48   ;;  %4432 = vperm.xlu0 %5948, %v5294_v27  }
0x1fe2   : > { %3281 = vperm.xlu1 %5947, %v5233_v39   ;;  %4555 = vperm.xlu0 %5948, %v4549_v47   ;;  %v4351_v46 = vpop.xlane.xlu1 %4350 }
0x1fe3   : > { %v4357_v37 = vmul.f32 0.0078125, %v4351_v46 }
0x1fe5   : > { %v4361_v17 = vadd.f32 1e-08, %v4357_v37 }
0x1fe6   : > { %3860 = vperm.xlu1 %5947, %v5264_v10   ;;  %4565 = vperm.xlu0 %5948, %v4551_v1   ;;  %v4349_v21 = vpop.xlane.xlu0 %4348 }
0x1fe7   : > { %v4356_v33 = vmul.f32 0.0078125, %v4349_v21  ;;  %6041 = vrsqrt.f32 %v4361_v17 }
0x1fe9   : > { %v4360_v5 = vadd.f32 1e-08, %v4356_v33 }
0x1fea   : > { %4437 = vperm.xlu1 %5947, %v5295_v11  }
0x1feb   : > { %6043 = vrsqrt.f32 %v4360_v5 }
0x1fee   : > { %4560 = vperm.xlu1 %5947, %v4550_v24  }
0x1ff1   : > { %v6042_v32 = vpop.eup %6041 }
0x1ff2   : > { %4570 = vperm.xlu1 %5947, %v4552_v57   ;;  %v4369_v58 = vmul.f32 %v6042_v32, %v7525_v40 }
0x1ff5   : > { %v6044_v62 = vpop.eup %6043 }
0x1ff6   : > { %v4368_v30 = vmul.f32 %v6044_v62, %v7529_v15 }
0x202a   : > { %v4353_v26 = vpop.xlane.xlu0 %4352 }
0x202b   : > { %v4358_v35 = vmul.f32 0.0078125, %v4353_v26  ;;  %v4540_v26 = vstv %s4539_s5  ;;  %s5126_s5 = sshll.u32 %s701_s4, 5 }
0x202c   : > { %s7656_s1 = scalar_lea.vmem [#allocation8], %s5126_s5 }
0x202d   : > { %v4362_v56 = vadd.f32 1e-08, %v4358_v35  ;;  %s4980_s11 = sshll.u32 %s7656_s1, 4  ;;  %s7676_s11 = int_to_ptr.vmem [resolvable:$true] %s4980_s11 }
0x202e   : > { %v4355_v59 = vpop.xlane.xlu1 %4354  ;;  %s6086_s6 = scalar_lea.vmem %s7676_s11, 512 }
0x202f   : > { %v4359_v25 = vmul.f32 0.0078125, %v4355_v59  ;;  %6045 = vrsqrt.f32 %v4362_v56  ;;  %p6087_p10 = scmp.ne.s32.totalorder %s7676_s11, %s6086_s6 }
0x2031   : > { %v4363_v20 = vadd.f32 1e-08, %v4359_v25  ;;  %p6088_p0 = pnand %p6087_p10, %p7832_p12 }
0x2032   : > { %v4378_v44 = vpop.permute.xlu1 %4377  ;;  %v4374_v3 = vpop.permute.xlu0 %4373 }
0x2033   : > { %v4389_v34 = vmul.f32 %v4378_v44, %v4369_v58  ;;  %v4388_v13 = vmul.f32 %v4374_v3, %v4368_v30  ;;  %6047 = vrsqrt.f32 %v4363_v20  ;;  %v4678_v58 = vld [vmem:[%s7755_s15] sm:$0x3]  ;;  %v4546_v20 = vld [vmem:[%s7753_s13 + $0x8] sm:$0xff]  ;;  %p6089_p7 = pneg %p6088_p0 }
0x2036   : > { %v4394_v54 = vpop.permute.xlu1 %4393 }
0x2037   : > { %v4408_v55 = vadd.f32 %v4394_v54, %v4388_v13  ;;  %v4548_v13 = vld [vmem:[%s7753_s13 + $0x18] sm:$0xff] }
0x2039   : > { %v6046_v12 = vpop.eup %6045 }
0x203a   : > { %v4398_v51 = vpop.permute.xlu1 %4397  ;;  %v4370_v40 = vmul.f32 %v6046_v12, %v7533_v53  ;;  %v5291_v53 = vld [vmem:[%s7748_s8 + $0xb8] sm:$0xff] }
0x203b   : > { %v4409_v29 = vadd.f32 %v4398_v51, %v4389_v34  ;;  %v4547_v34 = vld [vmem:[%s7753_s13 + $0x10] sm:$0xff] }
0x203d   : > { %v5689_v19 = vpack.c.bf16 %v4409_v29, %v4408_v55  ;;  %v6048_v14 = vpop.eup %6047 }
0x203e   : > { %v4371_v2 = vmul.f32 %v6048_v14, %v7537_v6  ;;  %v6172_v6 = vmov 0.0|0.0  }
0x203f   : > { %v4382_v42 = vpop.permute.xlu1 %4381  ;;  %5690 = vmatprep.subr.bf16.mxu1 %v5689_v19 }
0x2040   : > { %5692 = vmatpush3.bf16.msra.mxu1 %v5689_v19  ;;  %v4390_v61 = vmul.f32 %v4382_v42, %v4370_v40 }
0x2043   : > { %v4386_v16 = vpop.permute.xlu1 %4385 }
0x2044   : > { %v4391_v15 = vmul.f32 %v4386_v16, %v4371_v2 }
0x2048   : > { %v4402_v43 = vpop.permute.xlu1 %4401 }
0x2049   : > { %v4410_v18 = vadd.f32 %v4402_v43, %v4390_v61  ;;  %v1439_v28 = vpop.permute.xlu0 %1438 }
0x204c   : > { %v4406_v63 = vpop.permute.xlu1 %4405 }
0x204d   : > { %v4411_v9 = vadd.f32 %v4406_v63, %v4391_v15 }
0x204f   : > { %v5693_v60 = vpack.c.bf16 %v4411_v9, %v4410_v18 }
0x2051   : > { %5694 = vmatprep.subr.bf16.mxu1 %v5693_v60  ;;  %v1434_v38 = vpop.permute.xlu1 %1433  ;;  %v2601_v4 = vpop.permute.xlu0 %2600 }
0x2052   : > { %5696 = vmatpush3.bf16.msra.mxu1 %v5693_v60 }
0x2053   : > { %5701 = vmatprep.subr.bf16.mxu1 %v6172_v6 }
0x2055   : > { %5581 = vmatmul.mubr.msk.f32.vlgmr.msra.gmra.mrb[14].mxu1 %vm1441_vm13, %v5289_v49  ;;  %v2018_v52 = vpop.permute.xlu1 %2017  ;;  %v3277_v39 = vpop.permute.xlu0 %3276 }
0x2056   : > { %5583 = vmatprep.mubr.msk.f32.mxu1 %vm1441_vm13, %v5290_v31  ;;  %v5716_v50 = vadd.f32 %v2018_v52, %v1434_v38  ;;  %v4792_v52 = vld [vmem:[%s7831_s27] sm:$0xf]  ;;  %s7686_s27 = scalar_lea.sflag [#allocation4], %s701_s4 }
0x2058   : > { %v5717_v27 = vadd.f32 %v5716_v50, %v2601_v4 }
0x2059   : > { %5584 = vmatmul.mubr.msk.f32.gmra.mrb[4].mxu1 %vm1441_vm13, %v5291_v53  ;;  %v2023_v0 = vpop.permute.xlu1 %2022  ;;  %v3856_v1 = vpop.permute.xlu0 %3855 }
0x205a   : > { %5600 = vmatprep.mubr.msk.f32.mxu1 %vm6173_vm3, %v6174_v23  ;;  %v5710_v36 = vadd.f32 %v2023_v0, %v1439_v28  ;;  %v5718_v11 = vadd.f32 %v5717_v27, %v3277_v39 }
0x205c   : > { %v5719_v57 = vadd.f32 %v5718_v11, %v3856_v1 }
0x205d   : > { %v2606_v45 = vpop.permute.xlu1 %2605  ;;  %v4433_v17 = vpop.permute.xlu0 %4432 }
0x205e   : > { %v5711_v41 = vadd.f32 %v5710_v36, %v2606_v45  ;;  %v5720_v5 = vadd.f32 %v5719_v57, %v4433_v17 }
0x2061   : > { %v3282_v48 = vpop.permute.xlu1 %3281  ;;  %v4556_v42 = vpop.permute.xlu0 %4555 }
0x2062   : > { %v5712_v10 = vadd.f32 %v5711_v41, %v3282_v48 }
0x2065   : > { %v3861_v47 = vpop.permute.xlu1 %3860  ;;  %v4566_v63 = vpop.permute.xlu0 %4565 }
0x2066   : > { %v5713_v24 = vadd.f32 %v5712_v10, %v3861_v47 }
0x2069   : > { %v4438_v37 = vpop.permute.xlu1 %4437 }
0x206a   : > { %v5714_v33 = vadd.f32 %v5713_v24, %v4438_v37 }
0x206d   : > { %v4561_v19 = vpop.permute.xlu1 %4560 }
0x2071   : > { %v4571_v2 = vpop.permute.xlu1 %4570 }
0x2128   : > { %v5582_v46 = vpop.f32.mrb[14].mxu1 }
0x2129   : > { %v4518_v21 = vpop.f32.mrb[15].mxu1 }
0x212c   : > { %v5585_v59 = vpop.f32.mrb[4].mxu1 }
0x212d   : > { %v5715_v44 = vadd.f32 %v5714_v33, %v5585_v59  ;;  %v4526_v32 = vpop.f32.mrb[5].mxu1 }
0x212e   : > { %v5721_v35 = vadd.f32 %v5720_v5, %v4526_v32 }
0x212f   : > { %v4542_v62 = vmul.f32 %v5715_v44, %v4540_v26  ;;  %vm4538_vm13 = vcmp.ge.f32.partialorder %v5715_v44, 0.0 }
0x2130   : > { %v4541_v25 = vmul.f32 %v5721_v35, %v4540_v26  ;;  %v5702_v3 = vpack.c.bf16 %v5715_v44, %v5721_v35  ;;  %vm4537_vm6 = vcmp.ge.f32.partialorder %v5721_v35, 0.0 }
0x2131   : > { %v4544_v54 = vsel %vm4538_vm13, %v5715_v44, %v4542_v62 }
0x2132   : > { %5703 = vmatpush3.bf16.msra.mxu1 %v5702_v3  ;;  %v4543_v56 = vsel %vm4537_vm6, %v5721_v35, %v4541_v25 }
0x2133   : > { %v5697_v30 = vpack.c.bf16 %v4544_v54, %v4543_v56  ;;  %5704 = vmatprep.subr.bf16.mxu1 %v6172_v6 }
0x2135   : > { %5698 = vmatprep.subr.bf16.mxu0 %v5697_v30  ;;  %5601 = vmatmul.mubr.msk.f32.vlgmr.msra.gmra.mrb[16].mxu1 %vm886_vm2, %v4678_v58 }
0x2136   : > { %5700 = vmatpush3.bf16.msra.mxu0 %v5697_v30  ;;  %5607 = vmatprep.mubr.msk.f32.mxu1 %vm6173_vm3, %v6174_v23 }
0x2137   : > { %5707 = vmatprep.subr.bf16.mxu0 %v6172_v6 }
0x2139   : > { %5591 = vmatmul.mubr.msk.f32.vlgmr.msra.gmra.mrb[28].mxu0 %vm886_vm2, %v4546_v20 }
0x213a   : > { %5593 = vmatprep.mubr.msk.f32.mxu0 %vm886_vm2, %v4547_v34 }
0x213d   : > { %5594 = vmatmul.mubr.msk.f32.gmra.mrb[30].mxu0 %vm886_vm2, %v4548_v13 }
0x213e   : > { %5614 = vmatprep.mubr.msk.f32.mxu0 %vm6173_vm3, %v6174_v23 }
0x2208   : > { %v4748_v51 = vpop.f32.mrb[16].mxu1 }
0x2209   : > { %v4753_v55 = vsel %vm4752_vm10, %v4748_v51, 0.0  ;;  %v5602_v29 = vpop.f32.mrb[17].mxu1 }
0x220a   : > { %4754 = vadd.xlane.f32.xlu0 %v4753_v55 }
0x220c   : > { %v5592_v16 = vpop.f32.mrb[28].mxu0 }
0x220d   : > { %v4657_v12 = vadd.f32 %v5592_v16, %v4561_v19  ;;  %v4651_v14 = vpop.f32.mrb[29].mxu0 }
0x220e   : > { %v4652_v43 = vadd.f32 %v4651_v14, %v4556_v42 }
0x220f   : > { %v4671_v40 = vmax.f32 %v4657_v12, 0.0 }
0x2210   : > { %v4670_v61 = vmax.f32 %v4652_v43, 0.0  ;;  %v5595_v15 = vpop.f32.mrb[30].mxu0 }
0x2211   : > { %4675 = vst [vmem:[%s7656_s1 + $0x8] sm:$0xff] %v4671_v40  ;;  %v4791_v18 = vmul.f32 %v6407_v7, %v4671_v40  ;;  %v4667_v9 = vadd.f32 %v5595_v15, %v4571_v2  ;;  %v4661_v60 = vpop.f32.mrb[31].mxu0 }
0x2212   : > { %4674 = vst [vmem:[%s7656_s1] sm:$0xff] %v4670_v61  ;;  %v4790_v49 = vmul.f32 %v4670_v61, %v6409_v8  ;;  %v4662_v31 = vadd.f32 %v4661_v60, %v4566_v63 }
0x2213   : > { %v4673_v53 = vmax.f32 %v4667_v9, 0.0 }
0x2214   : > { %v5705_v6 = vpack.c.bf16 %v4791_v18, %v4790_v49  ;;  %v4672_v23 = vmax.f32 %v4662_v31, 0.0 }
0x2215   : > { %4677 = vst [vmem:[%s7656_s1 + $0x18] sm:$0xff] %v4673_v53  ;;  %v4867_v22 = vmul.f32 %v6407_v7, %v4673_v53  ;;  %v4757_v7 = vld [vmem:[%s7756_s16] sm:$0x3] }
0x2216   : > { %4676 = vst [vmem:[%s7656_s1 + $0x10] sm:$0xff] %v4672_v23  ;;  %v4866_v38 = vmul.f32 %v4672_v23, %v6409_v8  ;;  %5706 = vmatpush3.bf16.msra.mxu1 %v5705_v6  ;;  %s6175_s1 = smov [#allocation8]  }
0x2217   : > { %s6090_s2 = sshll.u32 %s6175_s1, 4  ;;  %s6091_s2 = int_to_ptr.vmem [resolvable:$false] %s6090_s2 }
0x2218   : > { %v5708_v0 = vpack.c.bf16 %v4867_v22, %v4866_v38  ;;  %s6092_s7 = scalar_lea.vmem %s6091_s2, 1024  ;;  %p6093_p8 = scmp.lt.s32.totalorder %s7676_s11, %s6091_s2 }
0x2219   : > { %5608 = vmatmul.mubr.msk.f32.vlgmr.msra.gmra.mrb[18].mxu1 %vm886_vm2, %v4792_v52  ;;  %p6094_p11 = scmp.lt.s32.totalorder %s6092_s7, %s6086_s6 }
0x221a   : > { %5709 = vmatpush3.bf16.msra.mxu0 %v5708_v0 }
0x221b   : > { %p6095_p13 = por %p6094_p11, %p6093_p8 }
0x221d   : > { %5615 = vmatmul.mubr.msk.f32.vlgmr.msra.gmra.mrb[32].mxu0 %vm886_vm2, %v4792_v52  ;;  %p6096_p1 = pnand %p6095_p13, %p6089_p7 }
0x2297   : > { %v4755_v28 = vpop.xlane.xlu0 %4754 }
0x2298   : > { %v4756_v45 = vmul.f32 0.0078125, %v4755_v28 }
0x229a   : > { %v4758_v8 = vadd.f32 %v4757_v7, %v4756_v45 }
0x229c   : > { %v4760_v4 = vsel %vm4759_vm11, %v4758_v8, -inf }
0x229d   : > { %v4761_v36 = vrot.slane %v4760_v4, 4 }
0x229f   : > { %v4762_v50 = vmax.f32 %v4760_v4, %v4761_v36 }
0x22a1   : > { %v4763_v48 = vrot.slane %v4762_v50, 2 }
0x22a3   : > { %v4764_v41 = vmax.f32 %v4762_v50, %v4763_v48 }
0x22a5   : > { %v4765_v39 = vrot.slane %v4764_v41, 1 }
0x22a7   : > { %v4766_v27 = vmax.f32 %v4764_v41, %v4765_v39 }
0x22a9   : > { %v4767_v10 = vsub.f32 %v4758_v8, %v4766_v27 }
0x22ab   : > { %v4768_v47 = vmul.f32 1.442695, %v4767_v10 }
0x22ac   : > { %6099 = shalt.err (!%p6096_p1)
}
0x22ad   : > { %s6100_s18 = scalar_lea.hbm %s7682_s24, 512  ;;  %s6104_s5 = scalar_lea.hbm %s7760_s20, 1024 }
0x22ae   : > { %p6101_p2 = scmp.ne.s32.totalorder %s7682_s24, %s6100_s18  ;;  %p6105_p9 = scmp.lt.u32.totalorder %s7682_s24, %s7760_s20 }
0x22af   : > { %p6106_p5 = scmp.lt.u32.totalorder %s6104_s5, %s6100_s18  ;;  %p6108_p10 = scmp.lt.u32.totalorder %s6100_s18, %s7682_s24 }
0x22b0   : > { %p6102_p3 = pnand %p6101_p2, %p7832_p12 }
0x22b1   : > { %p6107_p6 = por %p6106_p5, %p6105_p9 }
0x22b2   : > { %p6103_p4 = pneg %p6102_p3 }
0x22b3   : > { %p6109_p0 = por %p6108_p10, %p6107_p6 }
0x22b5   : > { %p6110_p7 = pnand %p6109_p0, %p6103_p4 }
0x22b7   : > { %6113 = shalt.err (!%p6110_p7)
}
0x22b8   : > { %s6176_s7 = smov 128   ;;  %s6177_s6 = smov 8   ;;  %6049 = vpow2.f32 %v4768_v47  ;;  %v6055_v55 = vld [vmem:[%s6390_s23] sm:$0xf] }
0x22b9   : > { %5744 = dma.vmem_to_hbm [thread:$0]  (%p7832_p12), %s7676_s11, 512, %s7682_s24, %s7686_s27, %s6176_s7, %s6176_s7, %s6177_s6  }
0x22ba   : > { %s5129_s2 = sshll.u32 %s6384_s28, 1  ;;  %s5128_s24 = sshll.u32 %s6384_s28, 3 }
0x22bb   : > { %s727_s3 = scalar_lea.vmem %s7762_s22, %s5129_s2  ;;  %s723_s26 = scalar_lea.vmem %s7761_s21, %s5128_s24 }
0x22c2   : > { %v6050_v11 = vpop.eup %6049 }
0x22c3   : > { %v4770_v1 = vsel %vm4759_vm11, %v6050_v11, 0.0 }
0x22c4   : > { %v4771_v24 = vrot.slane %v4770_v1, 4 }
0x22c6   : > { %v4772_v57 = vadd.f32 %v4771_v24, %v4770_v1 }
0x22c8   : > { %v4773_v46 = vrot.slane %v4772_v57, 2 }
0x22ca   : > { %v4774_v21 = vadd.f32 %v4773_v46, %v4772_v57 }
0x22cc   : > { %v4775_v37 = vrot.slane %v4774_v21, 1 }
0x22ce   : > { %v4776_v33 = vadd.f32 %v4775_v37, %v4774_v21 }
0x22d0   : > { %6051 = vrcp.f32 %v4776_v33 }
0x22da   : > { %v6052_v17 = vpop.eup %6051 }
0x22db   : > { %v4778_v5 = vmul.f32 %v6052_v17, %v6050_v11 }
0x22dd   : > { %4779 = vst.msk [vmem:[%s727_s3] sm:$0x3] %vm4759_vm11, %v4778_v5  ;;  %v4780_v59 = vsel %vm4759_vm11, %v4778_v5, 0.0 }
0x22de   : > { %v4781_v26 = vrot.slane %v4780_v59, 4 }
0x22e0   : > { %v4782_v44 = vadd.f32 %v4781_v26, %v4780_v59 }
0x22e2   : > { %v4783_v32 = vrot.slane %v4782_v44, 2 }
0x22e4   : > { %v4784_v35 = vadd.f32 %v4783_v32, %v4782_v44 }
0x22e6   : > { %v4785_v62 = vrot.slane %v4784_v35, 1 }
0x22e8   : > { %v4786_v25 = vadd.f32 %v4785_v62, %v4784_v35 }
0x22ea   : > { %v4787_v3 = vadd.f32 1e-08, %v4786_v25 }
0x22ec   : > { %6053 = vrcp.f32 %v4787_v3  ;;  %v4862_v58 = vpop.f32.mrb[18].mxu1 }
0x22ed   : > { %v5609_v30 = vpop.f32.mrb[19].mxu1 }
0x22f0   : > { %v4934_v34 = vpop.f32.mrb[32].mxu0 }
0x22f1   : > { %v4939_v13 = vadd.f32 %v4934_v34, %v4862_v58  ;;  %v5616_v51 = vpop.f32.mrb[33].mxu0 }
0x22f3   : > { %v4940_v29 = vsub.f32 %v6055_v55, %v4939_v13 }
0x22f6   : > { %v6054_v54 = vpop.eup %6053 }
0x22f7   : > { %v4789_v56 = vmul.f32 %v6054_v54, %v4778_v5 }
0x22f9   : > { %5732 = vpush %v4789_v56  ;;  %v4947_v20 = vrot.slane %v4789_v56, 1 }
0x22fb   : > { %5734 = vpush %v4947_v20 }
0x232a   : > { %s5733_s25 = spop %5732 }
0x232b   : > { %v4943_v19 = vstv %s5733_s25 }
0x232c   : > { %v4945_v42 = vmul.f32 %v4943_v19, %v4940_v29  ;;  %s5735_s11 = spop %5734 }
0x232d   : > { %v4949_v16 = vstv %s5735_s11 }
0x232e   : > { %v4946_v12 = vadd.f32 %v4945_v42, %v4862_v58  ;;  %v4951_v14 = vmul.f32 %v4949_v16, %v4940_v29 }
0x2330   : > { %v4952_v43 = vadd.f32 %v4951_v14, %v4934_v34 }
0x2332   : > { %v4954_v40 = vrot.slane %v4952_v43, 4 }
0x2334   : > { %v4956_v2 = vsel %vm746_vm1, %v4946_v12, %v4954_v40 }
0x2335   : > { %4957 = vst [vmem:[%s723_s26] sm:$0xff] %v4956_v2 }
0x2336 PF: > { %s7833_s23 = sld [smem:[#allocation15_spill]]  ;;  %p5761_p12 = scmp.ge.s32.totalorder %s6156_s0, 2 }
0x2337   : > { %s5001_s1 = sand.u32 1, %s6144_s29  }
0x2338   : > { %s5002_s7 = scalar_lea.sflag [#allocation4], %s5001_s1 }
0x233c   : > { %p7834_p8 = scmp.ne.s32.totalorder %s7833_s23, 0 }
0x233e   : > { %p5754_p11 = pnand %p5761_p12, %p7834_p8 }
0x2340   : > { %6139 = dma.done.wait (!%p5754_p11), %s5002_s7, 512  }
0x2341   : > { %6141 = vsyncadd (!%p5754_p11), %s5002_s7, 4294966784  ;;  %s7835_s0 = sld [smem:[#allocation13_spill]]  ;;  %s7836_s28 = sld [smem:[#allocation12_spill]] }
0x2342   : > { %s7837_s4 = sld [smem:[#allocation14_spill]]  ;;  %s7838_s29 = smov %s6148_s30 }
0x2347   : > { %p36_p13 = scmp.ge.s32.totalorder %s7835_s0, 4   ;;  %s7839_s30 = smov %s7836_s28 }
0x2349   :  { %38 = sbr.rel (!%p36_p13) target bundleno = 18 (0x12), region = 193 }
0x2350   :  { %5021 = vsyncpa [#allocation4], 1 }
0x2351   :  { %5023 = vsyncpa [#allocation4 + $0x1], 1 }
0x2352   :  { %5024 = vsyncpa [#allocation5], 1 }
0x2353   :  { %5026 = vsyncpa [#allocation5 + $0x1], 1 }
0x2354   :  { %5027 = vsyncpa [#allocation7], 1 }

</bundles_post_ra>
